<compile_context>
chip_gen: v5e
topology: v5e:2x2
jax: 0.10.0
libtpu: 0.0.40
codegen_flags: <defaults>
</compile_context>

<pallas_src>
import functools

import jax
import jax.numpy as jnp
from jax.experimental import pallas as pl
from jax.experimental.pallas import tpu as pltpu


def _round_up(x, m):
    return (x + m - 1) // m * m


def _sigmoid(x):
    # Spelled out so it lowers through the always-supported EUP exp path.
    return 1.0 / (1.0 + jnp.exp(-x))


def prev_cmd_lstm_kernel(cmd_ref, ew_ref, whh_ref, out_ref, gx_ref, *, seq_len):
    """One grid step runs TM sequences for all `seq_len` timesteps.

    cmd_ref : (T*TM, 1) int32   token ids, t-major (all TM sequences for t=0, then t=1, ...)
    ew_ref  : (C, 4*Hp)         E_zeroed @ W_ih^T + (b_ih+b_hh), gate chunks padded to Hp
    whh_ref : (Hp, 4*Hp)        W_hh^T, padded
    out_ref : (TM, Hp) f32      last hidden state
    gx_ref  : (T*TM, 4*Hp) f32  VMEM scratch holding the hoisted input projection
    """
    T = seq_len
    TT = cmd_ref.shape[0]
    TM = TT // T
    C, H4p = ew_ref.shape
    Hp = whh_ref.shape[0]

    ew = ew_ref[...]
    whh = whh_ref[...]

    # ---- Hoisted input projection: ONE (T*TM, C) @ (C, 4Hp) MXU matmul, bias folded in. ----
    tokens = cmd_ref[...]                                                 # (T*TM, 1) int32
    lane_ids = jax.lax.broadcasted_iota(jnp.int32, (TT, C), 1)
    onehot = jnp.where(tokens == lane_ids, 1.0, 0.0).astype(ew.dtype)     # exact 0/1 in bf16
    gx_ref[...] = jnp.dot(onehot, ew, preferred_element_type=jnp.float32)

    # ---- Serial recurrence over T (static unroll; T is small & fixed). ----
    # Rows are split into independent halves so the LLO scheduler overlaps the h@Whh MXU
    # matmul of one half with the EUP/VPU pointwise tail of the other.
    n_split = 2 if (TM >= 16 and TM % 16 == 0) else 1
    rm = TM // n_split
    h = [jnp.zeros((rm, Hp), jnp.float32) for _ in range(n_split)]
    c = [jnp.zeros((rm, Hp), jnp.float32) for _ in range(n_split)]

    for t in range(T):
        for s in range(n_split):
            row0 = t * TM + s * rm
            gh = jnp.dot(h[s].astype(whh.dtype), whh,
                         preferred_element_type=jnp.float32)              # (rm, 4Hp)
            gates = gx_ref[row0:row0 + rm, :] + gh
            i_g = _sigmoid(gates[:, 0 * Hp:1 * Hp])
            f_g = _sigmoid(gates[:, 1 * Hp:2 * Hp])
            g_g = jnp.tanh(gates[:, 2 * Hp:3 * Hp])
            o_g = _sigmoid(gates[:, 3 * Hp:4 * Hp])
            c[s] = f_g * c[s] + i_g * g_g
            h[s] = o_g * jnp.tanh(c[s])

    for s in range(n_split):
        out_ref[s * rm:(s + 1) * rm, :] = h[s]


def prev_cmd_rnn_forward(prev_cmd, emb_weight, w_ih, w_hh, b_ih, b_hh, *,
                         block_m=None, ew_dtype=jnp.bfloat16,
                         recurrent_dtype=jnp.float32):
    """prev_cmd: (B, U, T) int32; emb_weight: (C, D); w_ih: (4H, D); w_hh: (4H, H);
    b_ih, b_hh: (4H,).  Returns (B, U, H) f32.

    The PyTorch module's `num_cmd` forward arg is unused — T comes from prev_cmd's shape.
    NOTE: token ids >= C yield a zero input contribution here; PyTorch's Embedding would raise.
    """
    B, U, T = prev_cmd.shape
    C, D = emb_weight.shape
    H = w_hh.shape[1]
    assert w_ih.shape == (4 * H, D) and w_hh.shape == (4 * H, H)

    hi = jax.lax.Precision.HIGHEST

    # nn.Embedding(padding_idx=0): row 0 embeds to zero (bias still applies via the fold).
    emb = emb_weight.astype(jnp.float32).at[0].set(0.0)

    # Fold the embedding through the input projection AND fold the LSTM bias in:
    #   EW[c] = E[c] @ W_ih^T + (b_ih + b_hh)                     -> (C, 4H)
    ew = jnp.dot(emb, w_ih.astype(jnp.float32).T, precision=hi)
    ew = ew + (b_ih.astype(jnp.float32) + b_hh.astype(jnp.float32))[None, :]
    whh_t = w_hh.astype(jnp.float32).T                            # (H, 4H)

    # Pad hidden to lane-dense Hp (multiple of 128); re-layout the PyTorch gate chunks
    # (i, f, g, o) of size H into chunks of size Hp.  Padded gate columns are 0 and provably
    # stay 0 through the recurrence (sigmoid(0)*0 terms).
    # TODO(synk): for small H on v5e, pack the 4 gates into ceil(4H/128)*128 lanes for the
    # nonlinearity stage instead of padding each gate to 128 (cuts EUP work 4x at H=32).
    Hp = _round_up(max(H, 1), 128)
    H4p = 4 * Hp
    ew_p = jnp.zeros((C, H4p), jnp.float32)
    whh_p = jnp.zeros((Hp, H4p), jnp.float32)
    for k in range(4):
        ew_p = ew_p.at[:, k * Hp:k * Hp + H].set(ew[:, k * H:(k + 1) * H])
        whh_p = whh_p.at[:H, k * Hp:k * Hp + H].set(whh_t[:, k * H:(k + 1) * H])
    # bf16 EW table: one-hot selection => one rounding per pre-activation element and half
    # the DMA/VMEM footprint.  Recurrent operands default to f32.
    # TODO(synk): set recurrent_dtype=jnp.bfloat16 if the accuracy budget allows — rounding
    # on the h@Whh path compounds over T steps.
    ew_p = ew_p.astype(ew_dtype)
    whh_p = whh_p.astype(recurrent_dtype)

    # Flatten (B, U) -> M sequences, tile TM per grid step.
    M = B * U
    cmd = prev_cmd.reshape(M, T).astype(jnp.int32)
    if block_m is not None:
        tm = _round_up(block_m, 8)
    else:
        # MXU/lane-friendly default: multiple of 128, and >= 2 grid steps when M is big
        # enough so both v7x TensorCores get balanced work.
        tm = min(512, max(128, _round_up(M, 128)))
        if M > 128 and pl.cdiv(M, tm) < 2:
            tm = max(128, _round_up(pl.cdiv(M, 2), 128))
    M_pad = _round_up(M, tm)
    if M_pad != M:
        cmd = jnp.pad(cmd, ((0, M_pad - M), (0, 0)))   # padded rows use token 0 (sliced off)
    G = M_pad // tm

    # Per-tile t-major token layout: the kernel reads one (T*tm, 1) slab whose rows are
    # [t=0: all tm sequences, then t=1, ...] so gx[t*TM:(t+1)*TM] is a contiguous slab.
    cmd_tiles = cmd.reshape(G, tm, T).transpose(0, 2, 1).reshape(G, T * tm, 1)

    # TODO(synk): for realistic vocab sizes (C >~ 1-2K) replace the in-kernel one-hot with a
    # wrapper-side gather gx = EW[prev_cmd] (or a scalar-prefetched DMA gather), so the cost
    # scales with T*4Hp rather than C.

    # Explicit VMEM budget from the real buffer sizes (assume double buffering so the
    # non-Buffered fallback also fits), plus headroom for the gx scratch and gate temps.
    ew_bytes = C * H4p * jnp.dtype(ew_dtype).itemsize
    whh_bytes = Hp * H4p * jnp.dtype(recurrent_dtype).itemsize
    io_bytes = 2 * (T * tm * 4) + 2 * (tm * Hp * 4)
    scratch_bytes = T * tm * H4p * 4 + T * tm * C * 4 + 10 * tm * Hp * 4
    vmem_limit = int(min(64 << 20, max(16 << 20,
                                       2 * (ew_bytes + whh_bytes) + io_bytes + 2 * scratch_bytes)))

    cost = pl.CostEstimate(
        flops=2 * M_pad * T * (C + Hp) * H4p,
        transcendentals=5 * M_pad * T * Hp,
        bytes_accessed=4 * M_pad * T + ew_bytes + whh_bytes + 4 * M_pad * Hp,
    )

    kernel = functools.partial(prev_cmd_lstm_kernel, seq_len=T)

    def call(single_buffer_weights):
        # Grid-invariant weight blocks never change index, so a second buffer only doubles
        # their VMEM residency (matters on v7x's 64 MiB VMEM at real vocab sizes).
        if single_buffer_weights:
            def wspec(shape):
                return pl.BlockSpec(shape, lambda m: (0, 0), pipeline_mode=pl.Buffered(1))
        else:
            def wspec(shape):
                return pl.BlockSpec(shape, lambda m: (0, 0))
        return pl.pallas_call(
            kernel,
            out_shape=jax.ShapeDtypeStruct((M_pad, Hp), jnp.float32),
            grid_spec=pltpu.PrefetchScalarGridSpec(
                num_scalar_prefetch=0,
                grid=(G,),
                in_specs=[
                    pl.BlockSpec((None, T * tm, 1), lambda m: (m, 0, 0)),   # token ids
                    wspec((C, H4p)),                                        # EW(+bias) table
                    wspec((Hp, H4p)),                                       # W_hh^T
                ],
                out_specs=pl.BlockSpec((tm, Hp), lambda m: (m, 0)),
                scratch_shapes=[pltpu.VMEM((T * tm, H4p), jnp.float32)],    # hoisted gx
            ),
            compiler_params=pltpu.CompilerParams(
                dimension_semantics=("parallel",),
                vmem_limit_bytes=vmem_limit),
            cost_estimate=cost,
        )(cmd_tiles, ew_p, whh_p)

    try:
        out = call(True)
    except Exception:  # noqa: BLE001
        # TODO(synk): pl.Buffered(1) single-buffering unsupported on this jax build — fall
        # back to default double buffering of the invariant weight blocks.
        out = call(False)

    return out[:M, :H].reshape(B, U, H)


def prev_cmd_rnn_reference(prev_cmd, emb_weight, w_ih, w_hh, b_ih, b_hh):
    """Pure-JAX reference reproducing the PyTorch module (padding_idx=0 emb + LSTM, last step)."""
    B, U, T = prev_cmd.shape
    H = w_hh.shape[1]
    hi = jax.lax.Precision.HIGHEST
    emb = emb_weight.astype(jnp.float32).at[0].set(0.0)
    M = B * U
    x = emb[prev_cmd.reshape(M, T)]                                # (M, T, D)
    h = jnp.zeros((M, H), jnp.float32)
    c = jnp.zeros((M, H), jnp.float32)
    for t in range(T):
        gates = (jnp.dot(x[:, t], w_ih.T, precision=hi) + b_ih
                 + jnp.dot(h, w_hh.T, precision=hi) + b_hh)
        i = jax.nn.sigmoid(gates[:, 0:H])
        f = jax.nn.sigmoid(gates[:, H:2 * H])
        g = jnp.tanh(gates[:, 2 * H:3 * H])
        o = jax.nn.sigmoid(gates[:, 3 * H:4 * H])
        c = f * c + i * g
        h = o * jnp.tanh(c)
    return h.reshape(B, U, H)


if __name__ == "__main__":
    B, U, T = 2, 8, 8              # batch, num_unit, num_padded_prev_cmds
    num_ctype, emb_dim = 16, 32    # H == out_dim == emb_dim
    H = emb_dim

    key = jax.random.PRNGKey(0)
    k_cmd, k_emb, k_wih, k_whh, k_bih, k_bhh = jax.random.split(key, 6)

    prev_cmd = jax.random.randint(k_cmd, (B, U, T), 0, num_ctype, dtype=jnp.int32)
    emb_weight = jax.random.normal(k_emb, (num_ctype, emb_dim), dtype=jnp.float32)

    bound = 1.0 / (H ** 0.5)       # nn.LSTM default init range
    w_ih = jax.random.uniform(k_wih, (4 * H, emb_dim), minval=-bound, maxval=bound, dtype=jnp.float32)
    w_hh = jax.random.uniform(k_whh, (4 * H, H), minval=-bound, maxval=bound, dtype=jnp.float32)
    b_ih = jax.random.uniform(k_bih, (4 * H,), minval=-bound, maxval=bound, dtype=jnp.float32)
    b_hh = jax.random.uniform(k_bhh, (4 * H,), minval=-bound, maxval=bound, dtype=jnp.float32)

    ref = prev_cmd_rnn_reference(prev_cmd, emb_weight, w_ih, w_hh, b_ih, b_hh)

    # Run 1: all-f32 operands, block_m=8 -> 2 grid steps (exercises the tiled/"parallel"
    # multi-step path and the unsplit recurrence).  Tolerance leaves room for bf16 operand
    # rounding that default-precision MXU matmuls may apply; any structural bug would show
    # up as O(0.1+) errors.
    out_f32 = prev_cmd_rnn_forward(prev_cmd, emb_weight, w_ih, w_hh, b_ih, b_hh,
                                   block_m=8, ew_dtype=jnp.float32,
                                   recurrent_dtype=jnp.float32)
    out_f32 = jax.block_until_ready(out_f32)
    assert out_f32.shape == (B, U, H)
    assert jnp.allclose(out_f32, ref, atol=2e-2, rtol=2e-2), "f32 path mismatch vs reference"

    # Run 2: default fast path (bf16 EW table, default 128-row tile, split recurrence).
    # bf16 table rounding compounds over T=8 recurrent steps -> looser tolerance.
    out_fast = prev_cmd_rnn_forward(prev_cmd, emb_weight, w_ih, w_hh, b_ih, b_hh)
    out_fast = jax.block_until_ready(out_fast)
    assert out_fast.shape == (B, U, H)
    assert jnp.allclose(out_fast, ref, atol=4e-2, rtol=4e-2), "bf16 path mismatch vs reference"

    print("KERNEL_OK")
</pallas_src>

<mosaic_0001>
module attributes {stable_mosaic.version = 11 : i64} {
  func.func @prev_cmd_lstm_kernel(%arg0: i32, %arg1: memref<1x64x1xi32, #tpu.memory_space<vmem>>, %arg2: memref<16x512xf32, #tpu.memory_space<vmem>>, %arg3: memref<128x512xf32, #tpu.memory_space<vmem>>, %arg4: memref<8x128xf32, #tpu.memory_space<vmem>>, %arg5: memref<64x512xf32, #tpu.memory_space<vmem>>) attributes {dimension_semantics = [#tpu.dimension_semantics<parallel>], iteration_bounds = array<i64: 2>, scalar_prefetch = 0 : i64, scratch_operands = 1 : i64, tpu.core_type = #tpu.core_type<tc>, window_params = [{transform_indices = @transform_0, window_bounds = array<i64: 1, 64, 1>}, {pipeline_mode = #tpu.pipeline_mode<synchronous>, transform_indices = @transform_1, window_bounds = array<i64: 16, 512>}, {pipeline_mode = #tpu.pipeline_mode<synchronous>, transform_indices = @transform_2, window_bounds = array<i64: 128, 512>}, {transform_indices = @transform_3, window_bounds = array<i64: 8, 128>}]} {
    %c0 = arith.constant 0 : index
    %c0_0 = arith.constant 0 : index
    %0 = vector.load %arg2[%c0, %c0_0] : memref<16x512xf32, #tpu.memory_space<vmem>>, vector<16x512xf32>
    %c0_1 = arith.constant 0 : index
    %c0_2 = arith.constant 0 : index
    %1 = vector.load %arg3[%c0_1, %c0_2] : memref<128x512xf32, #tpu.memory_space<vmem>>, vector<128x512xf32>
    %c0_3 = arith.constant 0 : index
    %c0_4 = arith.constant 0 : index
    %c0_5 = arith.constant 0 : index
    %2 = vector.load %arg1[%c0_3, %c0_4, %c0_5] : memref<1x64x1xi32, #tpu.memory_space<vmem>>, vector<1x64x1xi32>
    %3 = vector.shape_cast %2 : vector<1x64x1xi32> to vector<64x1xi32>
    %4 = tpu.iota {dimensions = array<i32: 1>} : vector<64x16xi32>
    %5 = vector.broadcast %3 : vector<64x1xi32> to vector<64x16xi32>
    %6 = arith.cmpi eq, %5, %4 : vector<64x16xi32>
    %cst = arith.constant 1.000000e+00 : f32
    %cst_6 = arith.constant 0.000000e+00 : f32
    %7 = vector.broadcast %cst : f32 to vector<64x16xf32>
    %8 = vector.broadcast %cst_6 : f32 to vector<64x16xf32>
    %9 = arith.select %6, %7, %8 : vector<64x16xi1>, vector<64x16xf32>
    %cst_7 = arith.constant dense<0.000000e+00> : vector<64x512xf32>
    %10 = tpu.matmul %9, %0, %cst_7 {dimension_numbers = #tpu.dot_dimension_numbers<[1], [0], [0], [1], [0, 0, 1, 1], [], []>} : vector<64x16xf32>, vector<16x512xf32>, vector<64x512xf32> -> vector<64x512xf32>
    %c0_8 = arith.constant 0 : index
    %c0_9 = arith.constant 0 : index
    %11 = vector.load %arg5[%c0_8, %c0_9] : memref<64x512xf32, #tpu.memory_space<vmem>>, vector<64x512xf32>
    tpu.vector_store %arg5[%c0_8, %c0_9], %10 {strides = array<i32>} : memref<64x512xf32, #tpu.memory_space<vmem>>, vector<64x512xf32>,
    %cst_10 = arith.constant 0.000000e+00 : f32
    %12 = vector.broadcast %cst_10 : f32 to vector<8x128xf32>
    %cst_11 = arith.constant 0.000000e+00 : f32
    %13 = vector.broadcast %cst_11 : f32 to vector<8x128xf32>
    %cst_12 = arith.constant dense<0.000000e+00> : vector<8x512xf32>
    %14 = tpu.matmul %12, %1, %cst_12 {dimension_numbers = #tpu.dot_dimension_numbers<[1], [0], [0], [1], [0, 0, 1, 1], [], []>} : vector<8x128xf32>, vector<128x512xf32>, vector<8x512xf32> -> vector<8x512xf32>
    %c0_13 = arith.constant 0 : index
    %c0_14 = arith.constant 0 : index
    %15 = vector.load %arg5[%c0_13, %c0_14] : memref<64x512xf32, #tpu.memory_space<vmem>>, vector<8x512xf32>
    %16 = arith.addf %15, %14 : vector<8x512xf32>
    %17 = vector.extract_strided_slice %16 {offsets = [0, 0], sizes = [8, 128], strides = [1, 1]} : vector<8x512xf32> to vector<8x128xf32>
    %cst_15 = arith.constant 0.000000e+00 : f32
    %18 = vector.broadcast %cst_15 : f32 to vector<8x128xf32>
    %19 = arith.subf %18, %17 : vector<8x128xf32>
    %20 = math.exp %19 : vector<8x128xf32>
    %cst_16 = arith.constant 1.000000e+00 : f32
    %21 = vector.broadcast %cst_16 : f32 to vector<8x128xf32>
    %22 = arith.addf %21, %20 : vector<8x128xf32>
    %cst_17 = arith.constant 1.000000e+00 : f32
    %23 = vector.broadcast %cst_17 : f32 to vector<8x128xf32>
    %24 = arith.divf %23, %22 : vector<8x128xf32>
    %25 = vector.extract_strided_slice %16 {offsets = [0, 128], sizes = [8, 128], strides = [1, 1]} : vector<8x512xf32> to vector<8x128xf32>
    %cst_18 = arith.constant 0.000000e+00 : f32
    %26 = vector.broadcast %cst_18 : f32 to vector<8x128xf32>
    %27 = arith.subf %26, %25 : vector<8x128xf32>
    %28 = math.exp %27 : vector<8x128xf32>
    %cst_19 = arith.constant 1.000000e+00 : f32
    %29 = vector.broadcast %cst_19 : f32 to vector<8x128xf32>
    %30 = arith.addf %29, %28 : vector<8x128xf32>
    %cst_20 = arith.constant 1.000000e+00 : f32
    %31 = vector.broadcast %cst_20 : f32 to vector<8x128xf32>
    %32 = arith.divf %31, %30 : vector<8x128xf32>
    %33 = vector.extract_strided_slice %16 {offsets = [0, 256], sizes = [8, 128], strides = [1, 1]} : vector<8x512xf32> to vector<8x128xf32>
    %34 = math.tanh %33 : vector<8x128xf32>
    %35 = vector.extract_strided_slice %16 {offsets = [0, 384], sizes = [8, 128], strides = [1, 1]} : vector<8x512xf32> to vector<8x128xf32>
    %cst_21 = arith.constant 0.000000e+00 : f32
    %36 = vector.broadcast %cst_21 : f32 to vector<8x128xf32>
    %37 = arith.subf %36, %35 : vector<8x128xf32>
    %38 = math.exp %37 : vector<8x128xf32>
    %cst_22 = arith.constant 1.000000e+00 : f32
    %39 = vector.broadcast %cst_22 : f32 to vector<8x128xf32>
    %40 = arith.addf %39, %38 : vector<8x128xf32>
    %cst_23 = arith.constant 1.000000e+00 : f32
    %41 = vector.broadcast %cst_23 : f32 to vector<8x128xf32>
    %42 = arith.divf %41, %40 : vector<8x128xf32>
    %43 = arith.mulf %32, %13 : vector<8x128xf32>
    %44 = arith.mulf %24, %34 : vector<8x128xf32>
    %45 = arith.addf %43, %44 : vector<8x128xf32>
    %46 = math.tanh %45 : vector<8x128xf32>
    %47 = arith.mulf %42, %46 : vector<8x128xf32>
    %cst_24 = arith.constant dense<0.000000e+00> : vector<8x512xf32>
    %48 = tpu.matmul %47, %1, %cst_24 {dimension_numbers = #tpu.dot_dimension_numbers<[1], [0], [0], [1], [0, 0, 1, 1], [], []>} : vector<8x128xf32>, vector<128x512xf32>, vector<8x512xf32> -> vector<8x512xf32>
    %c8 = arith.constant 8 : index
    %c0_25 = arith.constant 0 : index
    %49 = vector.load %arg5[%c8, %c0_25] : memref<64x512xf32, #tpu.memory_space<vmem>>, vector<8x512xf32>
    %50 = arith.addf %49, %48 : vector<8x512xf32>
    %51 = vector.extract_strided_slice %50 {offsets = [0, 0], sizes = [8, 128], strides = [1, 1]} : vector<8x512xf32> to vector<8x128xf32>
    %cst_26 = arith.constant 0.000000e+00 : f32
    %52 = vector.broadcast %cst_26 : f32 to vector<8x128xf32>
    %53 = arith.subf %52, %51 : vector<8x128xf32>
    %54 = math.exp %53 : vector<8x128xf32>
    %cst_27 = arith.constant 1.000000e+00 : f32
    %55 = vector.broadcast %cst_27 : f32 to vector<8x128xf32>
    %56 = arith.addf %55, %54 : vector<8x128xf32>
    %cst_28 = arith.constant 1.000000e+00 : f32
    %57 = vector.broadcast %cst_28 : f32 to vector<8x128xf32>
    %58 = arith.divf %57, %56 : vector<8x128xf32>
    %59 = vector.extract_strided_slice %50 {offsets = [0, 128], sizes = [8, 128], strides = [1, 1]} : vector<8x512xf32> to vector<8x128xf32>
    %cst_29 = arith.constant 0.000000e+00 : f32
    %60 = vector.broadcast %cst_29 : f32 to vector<8x128xf32>
    %61 = arith.subf %60, %59 : vector<8x128xf32>
    %62 = math.exp %61 : vector<8x128xf32>
    %cst_30 = arith.constant 1.000000e+00 : f32
    %63 = vector.broadcast %cst_30 : f32 to vector<8x128xf32>
    %64 = arith.addf %63, %62 : vector<8x128xf32>
    %cst_31 = arith.constant 1.000000e+00 : f32
    %65 = vector.broadcast %cst_31 : f32 to vector<8x128xf32>
    %66 = arith.divf %65, %64 : vector<8x128xf32>
    %67 = vector.extract_strided_slice %50 {offsets = [0, 256], sizes = [8, 128], strides = [1, 1]} : vector<8x512xf32> to vector<8x128xf32>
    %68 = math.tanh %67 : vector<8x128xf32>
    %69 = vector.extract_strided_slice %50 {offsets = [0, 384], sizes = [8, 128], strides = [1, 1]} : vector<8x512xf32> to vector<8x128xf32>
    %cst_32 = arith.constant 0.000000e+00 : f32
    %70 = vector.broadcast %cst_32 : f32 to vector<8x128xf32>
    %71 = arith.subf %70, %69 : vector<8x128xf32>
    %72 = math.exp %71 : vector<8x128xf32>
    %cst_33 = arith.constant 1.000000e+00 : f32
    %73 = vector.broadcast %cst_33 : f32 to vector<8x128xf32>
    %74 = arith.addf %73, %72 : vector<8x128xf32>
    %cst_34 = arith.constant 1.000000e+00 : f32
    %75 = vector.broadcast %cst_34 : f32 to vector<8x128xf32>
    %76 = arith.divf %75, %74 : vector<8x128xf32>
    %77 = arith.mulf %66, %45 : vector<8x128xf32>
    %78 = arith.mulf %58, %68 : vector<8x128xf32>
    %79 = arith.addf %77, %78 : vector<8x128xf32>
    %80 = math.tanh %79 : vector<8x128xf32>
    %81 = arith.mulf %76, %80 : vector<8x128xf32>
    %cst_35 = arith.constant dense<0.000000e+00> : vector<8x512xf32>
    %82 = tpu.matmul %81, %1, %cst_35 {dimension_numbers = #tpu.dot_dimension_numbers<[1], [0], [0], [1], [0, 0, 1, 1], [], []>} : vector<8x128xf32>, vector<128x512xf32>, vector<8x512xf32> -> vector<8x512xf32>
    %c16 = arith.constant 16 : index
    %c0_36 = arith.constant 0 : index
    %83 = vector.load %arg5[%c16, %c0_36] : memref<64x512xf32, #tpu.memory_space<vmem>>, vector<8x512xf32>
    %84 = arith.addf %83, %82 : vector<8x512xf32>
    %85 = vector.extract_strided_slice %84 {offsets = [0, 0], sizes = [8, 128], strides = [1, 1]} : vector<8x512xf32> to vector<8x128xf32>
    %cst_37 = arith.constant 0.000000e+00 : f32
    %86 = vector.broadcast %cst_37 : f32 to vector<8x128xf32>
    %87 = arith.subf %86, %85 : vector<8x128xf32>
    %88 = math.exp %87 : vector<8x128xf32>
    %cst_38 = arith.constant 1.000000e+00 : f32
    %89 = vector.broadcast %cst_38 : f32 to vector<8x128xf32>
    %90 = arith.addf %89, %88 : vector<8x128xf32>
    %cst_39 = arith.constant 1.000000e+00 : f32
    %91 = vector.broadcast %cst_39 : f32 to vector<8x128xf32>
    %92 = arith.divf %91, %90 : vector<8x128xf32>
    %93 = vector.extract_strided_slice %84 {offsets = [0, 128], sizes = [8, 128], strides = [1, 1]} : vector<8x512xf32> to vector<8x128xf32>
    %cst_40 = arith.constant 0.000000e+00 : f32
    %94 = vector.broadcast %cst_40 : f32 to vector<8x128xf32>
    %95 = arith.subf %94, %93 : vector<8x128xf32>
    %96 = math.exp %95 : vector<8x128xf32>
    %cst_41 = arith.constant 1.000000e+00 : f32
    %97 = vector.broadcast %cst_41 : f32 to vector<8x128xf32>
    %98 = arith.addf %97, %96 : vector<8x128xf32>
    %cst_42 = arith.constant 1.000000e+00 : f32
    %99 = vector.broadcast %cst_42 : f32 to vector<8x128xf32>
    %100 = arith.divf %99, %98 : vector<8x128xf32>
    %101 = vector.extract_strided_slice %84 {offsets = [0, 256], sizes = [8, 128], strides = [1, 1]} : vector<8x512xf32> to vector<8x128xf32>
    %102 = math.tanh %101 : vector<8x128xf32>
    %103 = vector.extract_strided_slice %84 {offsets = [0, 384], sizes = [8, 128], strides = [1, 1]} : vector<8x512xf32> to vector<8x128xf32>
    %cst_43 = arith.constant 0.000000e+00 : f32
    %104 = vector.broadcast %cst_43 : f32 to vector<8x128xf32>
    %105 = arith.subf %104, %103 : vector<8x128xf32>
    %106 = math.exp %105 : vector<8x128xf32>
    %cst_44 = arith.constant 1.000000e+00 : f32
    %107 = vector.broadcast %cst_44 : f32 to vector<8x128xf32>
    %108 = arith.addf %107, %106 : vector<8x128xf32>
    %cst_45 = arith.constant 1.000000e+00 : f32
    %109 = vector.broadcast %cst_45 : f32 to vector<8x128xf32>
    %110 = arith.divf %109, %108 : vector<8x128xf32>
    %111 = arith.mulf %100, %79 : vector<8x128xf32>
    %112 = arith.mulf %92, %102 : vector<8x128xf32>
    %113 = arith.addf %111, %112 : vector<8x128xf32>
    %114 = math.tanh %113 : vector<8x128xf32>
    %115 = arith.mulf %110, %114 : vector<8x128xf32>
    %cst_46 = arith.constant dense<0.000000e+00> : vector<8x512xf32>
    %116 = tpu.matmul %115, %1, %cst_46 {dimension_numbers = #tpu.dot_dimension_numbers<[1], [0], [0], [1], [0, 0, 1, 1], [], []>} : vector<8x128xf32>, vector<128x512xf32>, vector<8x512xf32> -> vector<8x512xf32>
    %c24 = arith.constant 24 : index
    %c0_47 = arith.constant 0 : index
    %117 = vector.load %arg5[%c24, %c0_47] : memref<64x512xf32, #tpu.memory_space<vmem>>, vector<8x512xf32>
    %118 = arith.addf %117, %116 : vector<8x512xf32>
    %119 = vector.extract_strided_slice %118 {offsets = [0, 0], sizes = [8, 128], strides = [1, 1]} : vector<8x512xf32> to vector<8x128xf32>
    %cst_48 = arith.constant 0.000000e+00 : f32
    %120 = vector.broadcast %cst_48 : f32 to vector<8x128xf32>
    %121 = arith.subf %120, %119 : vector<8x128xf32>
    %122 = math.exp %121 : vector<8x128xf32>
    %cst_49 = arith.constant 1.000000e+00 : f32
    %123 = vector.broadcast %cst_49 : f32 to vector<8x128xf32>
    %124 = arith.addf %123, %122 : vector<8x128xf32>
    %cst_50 = arith.constant 1.000000e+00 : f32
    %125 = vector.broadcast %cst_50 : f32 to vector<8x128xf32>
    %126 = arith.divf %125, %124 : vector<8x128xf32>
    %127 = vector.extract_strided_slice %118 {offsets = [0, 128], sizes = [8, 128], strides = [1, 1]} : vector<8x512xf32> to vector<8x128xf32>
    %cst_51 = arith.constant 0.000000e+00 : f32
    %128 = vector.broadcast %cst_51 : f32 to vector<8x128xf32>
    %129 = arith.subf %128, %127 : vector<8x128xf32>
    %130 = math.exp %129 : vector<8x128xf32>
    %cst_52 = arith.constant 1.000000e+00 : f32
    %131 = vector.broadcast %cst_52 : f32 to vector<8x128xf32>
    %132 = arith.addf %131, %130 : vector<8x128xf32>
    %cst_53 = arith.constant 1.000000e+00 : f32
    %133 = vector.broadcast %cst_53 : f32 to vector<8x128xf32>
    %134 = arith.divf %133, %132 : vector<8x128xf32>
    %135 = vector.extract_strided_slice %118 {offsets = [0, 256], sizes = [8, 128], strides = [1, 1]} : vector<8x512xf32> to vector<8x128xf32>
    %136 = math.tanh %135 : vector<8x128xf32>
    %137 = vector.extract_strided_slice %118 {offsets = [0, 384], sizes = [8, 128], strides = [1, 1]} : vector<8x512xf32> to vector<8x128xf32>
    %cst_54 = arith.constant 0.000000e+00 : f32
    %138 = vector.broadcast %cst_54 : f32 to vector<8x128xf32>
    %139 = arith.subf %138, %137 : vector<8x128xf32>
    %140 = math.exp %139 : vector<8x128xf32>
    %cst_55 = arith.constant 1.000000e+00 : f32
    %141 = vector.broadcast %cst_55 : f32 to vector<8x128xf32>
    %142 = arith.addf %141, %140 : vector<8x128xf32>
    %cst_56 = arith.constant 1.000000e+00 : f32
    %143 = vector.broadcast %cst_56 : f32 to vector<8x128xf32>
    %144 = arith.divf %143, %142 : vector<8x128xf32>
    %145 = arith.mulf %134, %113 : vector<8x128xf32>
    %146 = arith.mulf %126, %136 : vector<8x128xf32>
    %147 = arith.addf %145, %146 : vector<8x128xf32>
    %148 = math.tanh %147 : vector<8x128xf32>
    %149 = arith.mulf %144, %148 : vector<8x128xf32>
    %cst_57 = arith.constant dense<0.000000e+00> : vector<8x512xf32>
    %150 = tpu.matmul %149, %1, %cst_57 {dimension_numbers = #tpu.dot_dimension_numbers<[1], [0], [0], [1], [0, 0, 1, 1], [], []>} : vector<8x128xf32>, vector<128x512xf32>, vector<8x512xf32> -> vector<8x512xf32>
    %c32 = arith.constant 32 : index
    %c0_58 = arith.constant 0 : index
    %151 = vector.load %arg5[%c32, %c0_58] : memref<64x512xf32, #tpu.memory_space<vmem>>, vector<8x512xf32>
    %152 = arith.addf %151, %150 : vector<8x512xf32>
    %153 = vector.extract_strided_slice %152 {offsets = [0, 0], sizes = [8, 128], strides = [1, 1]} : vector<8x512xf32> to vector<8x128xf32>
    %cst_59 = arith.constant 0.000000e+00 : f32
    %154 = vector.broadcast %cst_59 : f32 to vector<8x128xf32>
    %155 = arith.subf %154, %153 : vector<8x128xf32>
    %156 = math.exp %155 : vector<8x128xf32>
    %cst_60 = arith.constant 1.000000e+00 : f32
    %157 = vector.broadcast %cst_60 : f32 to vector<8x128xf32>
    %158 = arith.addf %157, %156 : vector<8x128xf32>
    %cst_61 = arith.constant 1.000000e+00 : f32
    %159 = vector.broadcast %cst_61 : f32 to vector<8x128xf32>
    %160 = arith.divf %159, %158 : vector<8x128xf32>
    %161 = vector.extract_strided_slice %152 {offsets = [0, 128], sizes = [8, 128], strides = [1, 1]} : vector<8x512xf32> to vector<8x128xf32>
    %cst_62 = arith.constant 0.000000e+00 : f32
    %162 = vector.broadcast %cst_62 : f32 to vector<8x128xf32>
    %163 = arith.subf %162, %161 : vector<8x128xf32>
    %164 = math.exp %163 : vector<8x128xf32>
    %cst_63 = arith.constant 1.000000e+00 : f32
    %165 = vector.broadcast %cst_63 : f32 to vector<8x128xf32>
    %166 = arith.addf %165, %164 : vector<8x128xf32>
    %cst_64 = arith.constant 1.000000e+00 : f32
    %167 = vector.broadcast %cst_64 : f32 to vector<8x128xf32>
    %168 = arith.divf %167, %166 : vector<8x128xf32>
    %169 = vector.extract_strided_slice %152 {offsets = [0, 256], sizes = [8, 128], strides = [1, 1]} : vector<8x512xf32> to vector<8x128xf32>
    %170 = math.tanh %169 : vector<8x128xf32>
    %171 = vector.extract_strided_slice %152 {offsets = [0, 384], sizes = [8, 128], strides = [1, 1]} : vector<8x512xf32> to vector<8x128xf32>
    %cst_65 = arith.constant 0.000000e+00 : f32
    %172 = vector.broadcast %cst_65 : f32 to vector<8x128xf32>
    %173 = arith.subf %172, %171 : vector<8x128xf32>
    %174 = math.exp %173 : vector<8x128xf32>
    %cst_66 = arith.constant 1.000000e+00 : f32
    %175 = vector.broadcast %cst_66 : f32 to vector<8x128xf32>
    %176 = arith.addf %175, %174 : vector<8x128xf32>
    %cst_67 = arith.constant 1.000000e+00 : f32
    %177 = vector.broadcast %cst_67 : f32 to vector<8x128xf32>
    %178 = arith.divf %177, %176 : vector<8x128xf32>
    %179 = arith.mulf %168, %147 : vector<8x128xf32>
    %180 = arith.mulf %160, %170 : vector<8x128xf32>
    %181 = arith.addf %179, %180 : vector<8x128xf32>
    %182 = math.tanh %181 : vector<8x128xf32>
    %183 = arith.mulf %178, %182 : vector<8x128xf32>
    %cst_68 = arith.constant dense<0.000000e+00> : vector<8x512xf32>
    %184 = tpu.matmul %183, %1, %cst_68 {dimension_numbers = #tpu.dot_dimension_numbers<[1], [0], [0], [1], [0, 0, 1, 1], [], []>} : vector<8x128xf32>, vector<128x512xf32>, vector<8x512xf32> -> vector<8x512xf32>
    %c40 = arith.constant 40 : index
    %c0_69 = arith.constant 0 : index
    %185 = vector.load %arg5[%c40, %c0_69] : memref<64x512xf32, #tpu.memory_space<vmem>>, vector<8x512xf32>
    %186 = arith.addf %185, %184 : vector<8x512xf32>
    %187 = vector.extract_strided_slice %186 {offsets = [0, 0], sizes = [8, 128], strides = [1, 1]} : vector<8x512xf32> to vector<8x128xf32>
    %cst_70 = arith.constant 0.000000e+00 : f32
    %188 = vector.broadcast %cst_70 : f32 to vector<8x128xf32>
    %189 = arith.subf %188, %187 : vector<8x128xf32>
    %190 = math.exp %189 : vector<8x128xf32>
    %cst_71 = arith.constant 1.000000e+00 : f32
    %191 = vector.broadcast %cst_71 : f32 to vector<8x128xf32>
    %192 = arith.addf %191, %190 : vector<8x128xf32>
    %cst_72 = arith.constant 1.000000e+00 : f32
    %193 = vector.broadcast %cst_72 : f32 to vector<8x128xf32>
    %194 = arith.divf %193, %192 : vector<8x128xf32>
    %195 = vector.extract_strided_slice %186 {offsets = [0, 128], sizes = [8, 128], strides = [1, 1]} : vector<8x512xf32> to vector<8x128xf32>
    %cst_73 = arith.constant 0.000000e+00 : f32
    %196 = vector.broadcast %cst_73 : f32 to vector<8x128xf32>
    %197 = arith.subf %196, %195 : vector<8x128xf32>
    %198 = math.exp %197 : vector<8x128xf32>
    %cst_74 = arith.constant 1.000000e+00 : f32
    %199 = vector.broadcast %cst_74 : f32 to vector<8x128xf32>
    %200 = arith.addf %199, %198 : vector<8x128xf32>
    %cst_75 = arith.constant 1.000000e+00 : f32
    %201 = vector.broadcast %cst_75 : f32 to vector<8x128xf32>
    %202 = arith.divf %201, %200 : vector<8x128xf32>
    %203 = vector.extract_strided_slice %186 {offsets = [0, 256], sizes = [8, 128], strides = [1, 1]} : vector<8x512xf32> to vector<8x128xf32>
    %204 = math.tanh %203 : vector<8x128xf32>
    %205 = vector.extract_strided_slice %186 {offsets = [0, 384], sizes = [8, 128], strides = [1, 1]} : vector<8x512xf32> to vector<8x128xf32>
    %cst_76 = arith.constant 0.000000e+00 : f32
    %206 = vector.broadcast %cst_76 : f32 to vector<8x128xf32>
    %207 = arith.subf %206, %205 : vector<8x128xf32>
    %208 = math.exp %207 : vector<8x128xf32>
    %cst_77 = arith.constant 1.000000e+00 : f32
    %209 = vector.broadcast %cst_77 : f32 to vector<8x128xf32>
    %210 = arith.addf %209, %208 : vector<8x128xf32>
    %cst_78 = arith.constant 1.000000e+00 : f32
    %211 = vector.broadcast %cst_78 : f32 to vector<8x128xf32>
    %212 = arith.divf %211, %210 : vector<8x128xf32>
    %213 = arith.mulf %202, %181 : vector<8x128xf32>
    %214 = arith.mulf %194, %204 : vector<8x128xf32>
    %215 = arith.addf %213, %214 : vector<8x128xf32>
    %216 = math.tanh %215 : vector<8x128xf32>
    %217 = arith.mulf %212, %216 : vector<8x128xf32>
    %cst_79 = arith.constant dense<0.000000e+00> : vector<8x512xf32>
    %218 = tpu.matmul %217, %1, %cst_79 {dimension_numbers = #tpu.dot_dimension_numbers<[1], [0], [0], [1], [0, 0, 1, 1], [], []>} : vector<8x128xf32>, vector<128x512xf32>, vector<8x512xf32> -> vector<8x512xf32>
    %c48 = arith.constant 48 : index
    %c0_80 = arith.constant 0 : index
    %219 = vector.load %arg5[%c48, %c0_80] : memref<64x512xf32, #tpu.memory_space<vmem>>, vector<8x512xf32>
    %220 = arith.addf %219, %218 : vector<8x512xf32>
    %221 = vector.extract_strided_slice %220 {offsets = [0, 0], sizes = [8, 128], strides = [1, 1]} : vector<8x512xf32> to vector<8x128xf32>
    %cst_81 = arith.constant 0.000000e+00 : f32
    %222 = vector.broadcast %cst_81 : f32 to vector<8x128xf32>
    %223 = arith.subf %222, %221 : vector<8x128xf32>
    %224 = math.exp %223 : vector<8x128xf32>
    %cst_82 = arith.constant 1.000000e+00 : f32
    %225 = vector.broadcast %cst_82 : f32 to vector<8x128xf32>
    %226 = arith.addf %225, %224 : vector<8x128xf32>
    %cst_83 = arith.constant 1.000000e+00 : f32
    %227 = vector.broadcast %cst_83 : f32 to vector<8x128xf32>
    %228 = arith.divf %227, %226 : vector<8x128xf32>
    %229 = vector.extract_strided_slice %220 {offsets = [0, 128], sizes = [8, 128], strides = [1, 1]} : vector<8x512xf32> to vector<8x128xf32>
    %cst_84 = arith.constant 0.000000e+00 : f32
    %230 = vector.broadcast %cst_84 : f32 to vector<8x128xf32>
    %231 = arith.subf %230, %229 : vector<8x128xf32>
    %232 = math.exp %231 : vector<8x128xf32>
    %cst_85 = arith.constant 1.000000e+00 : f32
    %233 = vector.broadcast %cst_85 : f32 to vector<8x128xf32>
    %234 = arith.addf %233, %232 : vector<8x128xf32>
    %cst_86 = arith.constant 1.000000e+00 : f32
    %235 = vector.broadcast %cst_86 : f32 to vector<8x128xf32>
    %236 = arith.divf %235, %234 : vector<8x128xf32>
    %237 = vector.extract_strided_slice %220 {offsets = [0, 256], sizes = [8, 128], strides = [1, 1]} : vector<8x512xf32> to vector<8x128xf32>
    %238 = math.tanh %237 : vector<8x128xf32>
    %239 = vector.extract_strided_slice %220 {offsets = [0, 384], sizes = [8, 128], strides = [1, 1]} : vector<8x512xf32> to vector<8x128xf32>
    %cst_87 = arith.constant 0.000000e+00 : f32
    %240 = vector.broadcast %cst_87 : f32 to vector<8x128xf32>
    %241 = arith.subf %240, %239 : vector<8x128xf32>
    %242 = math.exp %241 : vector<8x128xf32>
    %cst_88 = arith.constant 1.000000e+00 : f32
    %243 = vector.broadcast %cst_88 : f32 to vector<8x128xf32>
    %244 = arith.addf %243, %242 : vector<8x128xf32>
    %cst_89 = arith.constant 1.000000e+00 : f32
    %245 = vector.broadcast %cst_89 : f32 to vector<8x128xf32>
    %246 = arith.divf %245, %244 : vector<8x128xf32>
    %247 = arith.mulf %236, %215 : vector<8x128xf32>
    %248 = arith.mulf %228, %238 : vector<8x128xf32>
    %249 = arith.addf %247, %248 : vector<8x128xf32>
    %250 = math.tanh %249 : vector<8x128xf32>
    %251 = arith.mulf %246, %250 : vector<8x128xf32>
    %cst_90 = arith.constant dense<0.000000e+00> : vector<8x512xf32>
    %252 = tpu.matmul %251, %1, %cst_90 {dimension_numbers = #tpu.dot_dimension_numbers<[1], [0], [0], [1], [0, 0, 1, 1], [], []>} : vector<8x128xf32>, vector<128x512xf32>, vector<8x512xf32> -> vector<8x512xf32>
    %c56 = arith.constant 56 : index
    %c0_91 = arith.constant 0 : index
    %253 = vector.load %arg5[%c56, %c0_91] : memref<64x512xf32, #tpu.memory_space<vmem>>, vector<8x512xf32>
    %254 = arith.addf %253, %252 : vector<8x512xf32>
    %255 = vector.extract_strided_slice %254 {offsets = [0, 0], sizes = [8, 128], strides = [1, 1]} : vector<8x512xf32> to vector<8x128xf32>
    %cst_92 = arith.constant 0.000000e+00 : f32
    %256 = vector.broadcast %cst_92 : f32 to vector<8x128xf32>
    %257 = arith.subf %256, %255 : vector<8x128xf32>
    %258 = math.exp %257 : vector<8x128xf32>
    %cst_93 = arith.constant 1.000000e+00 : f32
    %259 = vector.broadcast %cst_93 : f32 to vector<8x128xf32>
    %260 = arith.addf %259, %258 : vector<8x128xf32>
    %cst_94 = arith.constant 1.000000e+00 : f32
    %261 = vector.broadcast %cst_94 : f32 to vector<8x128xf32>
    %262 = arith.divf %261, %260 : vector<8x128xf32>
    %263 = vector.extract_strided_slice %254 {offsets = [0, 128], sizes = [8, 128], strides = [1, 1]} : vector<8x512xf32> to vector<8x128xf32>
    %cst_95 = arith.constant 0.000000e+00 : f32
    %264 = vector.broadcast %cst_95 : f32 to vector<8x128xf32>
    %265 = arith.subf %264, %263 : vector<8x128xf32>
    %266 = math.exp %265 : vector<8x128xf32>
    %cst_96 = arith.constant 1.000000e+00 : f32
    %267 = vector.broadcast %cst_96 : f32 to vector<8x128xf32>
    %268 = arith.addf %267, %266 : vector<8x128xf32>
    %cst_97 = arith.constant 1.000000e+00 : f32
    %269 = vector.broadcast %cst_97 : f32 to vector<8x128xf32>
    %270 = arith.divf %269, %268 : vector<8x128xf32>
    %271 = vector.extract_strided_slice %254 {offsets = [0, 256], sizes = [8, 128], strides = [1, 1]} : vector<8x512xf32> to vector<8x128xf32>
    %272 = math.tanh %271 : vector<8x128xf32>
    %273 = vector.extract_strided_slice %254 {offsets = [0, 384], sizes = [8, 128], strides = [1, 1]} : vector<8x512xf32> to vector<8x128xf32>
    %cst_98 = arith.constant 0.000000e+00 : f32
    %274 = vector.broadcast %cst_98 : f32 to vector<8x128xf32>
    %275 = arith.subf %274, %273 : vector<8x128xf32>
    %276 = math.exp %275 : vector<8x128xf32>
    %cst_99 = arith.constant 1.000000e+00 : f32
    %277 = vector.broadcast %cst_99 : f32 to vector<8x128xf32>
    %278 = arith.addf %277, %276 : vector<8x128xf32>
    %cst_100 = arith.constant 1.000000e+00 : f32
    %279 = vector.broadcast %cst_100 : f32 to vector<8x128xf32>
    %280 = arith.divf %279, %278 : vector<8x128xf32>
    %281 = arith.mulf %270, %249 : vector<8x128xf32>
    %282 = arith.mulf %262, %272 : vector<8x128xf32>
    %283 = arith.addf %281, %282 : vector<8x128xf32>
    %284 = math.tanh %283 : vector<8x128xf32>
    %285 = arith.mulf %280, %284 : vector<8x128xf32>
    %c0_101 = arith.constant 0 : index
    %c0_102 = arith.constant 0 : index
    %286 = vector.load %arg4[%c0_101, %c0_102] : memref<8x128xf32, #tpu.memory_space<vmem>>, vector<8x128xf32>
    tpu.vector_store %arg4[%c0_101, %c0_102], %285 {strides = array<i32>} : memref<8x128xf32, #tpu.memory_space<vmem>>, vector<8x128xf32>,
    return
  }
  func.func @transform_0(%arg0: i32) -> (i32, i32, i32) {
    %c0_i32 = arith.constant 0 : i32
    %c0_i32_0 = arith.constant 0 : i32
    %c0_i32_1 = arith.constant 0 : i32
    return %arg0, %c0_i32, %c0_i32_0 : i32, i32, i32
  }
  func.func @transform_1(%arg0: i32) -> (i32, i32) {
    %c0_i32 = arith.constant 0 : i32
    %c0_i32_0 = arith.constant 0 : i32
    %c0_i32_1 = arith.constant 0 : i32
    return %c0_i32, %c0_i32_0 : i32, i32
  }
  func.func @transform_2(%arg0: i32) -> (i32, i32) {
    %c0_i32 = arith.constant 0 : i32
    %c0_i32_0 = arith.constant 0 : i32
    %c0_i32_1 = arith.constant 0 : i32
    return %c0_i32, %c0_i32_0 : i32, i32
  }
  func.func @transform_3(%arg0: i32) -> (i32, i32) {
    %c0_i32 = arith.constant 0 : i32
    %c0_i32_0 = arith.constant 0 : i32
    return %arg0, %c0_i32 : i32, i32
  }
}

module attributes {stable_mosaic.version = 11 : i64} {
  func.func @prev_cmd_lstm_kernel(%arg0: i32, %arg1: memref<1x64x1xi32, #tpu.memory_space<vmem>>, %arg2: memref<16x512xf32, #tpu.memory_space<vmem>>, %arg3: memref<128x512xf32, #tpu.memory_space<vmem>>, %arg4: memref<8x128xf32, #tpu.memory_space<vmem>>, %arg5: memref<64x512xf32, #tpu.memory_space<vmem>>) attributes {dimension_semantics = [#tpu.dimension_semantics<parallel>], iteration_bounds = array<i64: 2>, scalar_prefetch = 0 : i64, scratch_operands = 1 : i64, tpu.core_type = #tpu.core_type<tc>, window_params = [{transform_indices = @transform_0, window_bounds = array<i64: 1, 64, 1>}, {pipeline_mode = #tpu.pipeline_mode<synchronous>, transform_indices = @transform_1, window_bounds = array<i64: 16, 512>}, {pipeline_mode = #tpu.pipeline_mode<synchronous>, transform_indices = @transform_2, window_bounds = array<i64: 128, 512>}, {transform_indices = @transform_3, window_bounds = array<i64: 8, 128>}]} {
    %c0 = arith.constant 0 : index
    %c0_0 = arith.constant 0 : index
    %0 = vector.load %arg2[%c0, %c0_0] : memref<16x512xf32, #tpu.memory_space<vmem>>, vector<16x512xf32>
    %c0_1 = arith.constant 0 : index
    %c0_2 = arith.constant 0 : index
    %1 = vector.load %arg3[%c0_1, %c0_2] : memref<128x512xf32, #tpu.memory_space<vmem>>, vector<128x512xf32>
    %c0_3 = arith.constant 0 : index
    %c0_4 = arith.constant 0 : index
    %c0_5 = arith.constant 0 : index
    %2 = vector.load %arg1[%c0_3, %c0_4, %c0_5] : memref<1x64x1xi32, #tpu.memory_space<vmem>>, vector<1x64x1xi32>
    %3 = vector.shape_cast %2 : vector<1x64x1xi32> to vector<64x1xi32>
    %4 = tpu.iota {dimensions = array<i32: 1>} : vector<64x16xi32>
    %5 = vector.broadcast %3 : vector<64x1xi32> to vector<64x16xi32>
    %6 = arith.cmpi eq, %5, %4 : vector<64x16xi32>
    %cst = arith.constant 1.000000e+00 : f32
    %cst_6 = arith.constant 0.000000e+00 : f32
    %7 = vector.broadcast %cst : f32 to vector<64x16xf32>
    %8 = vector.broadcast %cst_6 : f32 to vector<64x16xf32>
    %9 = arith.select %6, %7, %8 : vector<64x16xi1>, vector<64x16xf32>
    %cst_7 = arith.constant dense<0.000000e+00> : vector<64x512xf32>
    %10 = tpu.matmul %9, %0, %cst_7 {dimension_numbers = #tpu.dot_dimension_numbers<[1], [0], [0], [1], [0, 0, 1, 1], [], []>} : vector<64x16xf32>, vector<16x512xf32>, vector<64x512xf32> -> vector<64x512xf32>
    %c0_8 = arith.constant 0 : index
    %c0_9 = arith.constant 0 : index
    %11 = vector.load %arg5[%c0_8, %c0_9] : memref<64x512xf32, #tpu.memory_space<vmem>>, vector<64x512xf32>
    tpu.vector_store %arg5[%c0_8, %c0_9], %10 {strides = array<i32>} : memref<64x512xf32, #tpu.memory_space<vmem>>, vector<64x512xf32>,
    %cst_10 = arith.constant 0.000000e+00 : f32
    %12 = vector.broadcast %cst_10 : f32 to vector<8x128xf32>
    %cst_11 = arith.constant 0.000000e+00 : f32
    %13 = vector.broadcast %cst_11 : f32 to vector<8x128xf32>
    %cst_12 = arith.constant dense<0.000000e+00> : vector<8x512xf32>
    %14 = tpu.matmul %12, %1, %cst_12 {dimension_numbers = #tpu.dot_dimension_numbers<[1], [0], [0], [1], [0, 0, 1, 1], [], []>} : vector<8x128xf32>, vector<128x512xf32>, vector<8x512xf32> -> vector<8x512xf32>
    %c0_13 = arith.constant 0 : index
    %c0_14 = arith.constant 0 : index
    %15 = vector.load %arg5[%c0_13, %c0_14] : memref<64x512xf32, #tpu.memory_space<vmem>>, vector<8x512xf32>
    %16 = arith.addf %15, %14 : vector<8x512xf32>
    %17 = vector.extract_strided_slice %16 {offsets = [0, 0], sizes = [8, 128], strides = [1, 1]} : vector<8x512xf32> to vector<8x128xf32>
    %cst_15 = arith.constant 0.000000e+00 : f32
    %18 = vector.broadcast %cst_15 : f32 to vector<8x128xf32>
    %19 = arith.subf %18, %17 : vector<8x128xf32>
    %20 = math.exp %19 : vector<8x128xf32>
    %cst_16 = arith.constant 1.000000e+00 : f32
    %21 = vector.broadcast %cst_16 : f32 to vector<8x128xf32>
    %22 = arith.addf %21, %20 : vector<8x128xf32>
    %cst_17 = arith.constant 1.000000e+00 : f32
    %23 = vector.broadcast %cst_17 : f32 to vector<8x128xf32>
    %24 = arith.divf %23, %22 : vector<8x128xf32>
    %25 = vector.extract_strided_slice %16 {offsets = [0, 128], sizes = [8, 128], strides = [1, 1]} : vector<8x512xf32> to vector<8x128xf32>
    %cst_18 = arith.constant 0.000000e+00 : f32
    %26 = vector.broadcast %cst_18 : f32 to vector<8x128xf32>
    %27 = arith.subf %26, %25 : vector<8x128xf32>
    %28 = math.exp %27 : vector<8x128xf32>
    %cst_19 = arith.constant 1.000000e+00 : f32
    %29 = vector.broadcast %cst_19 : f32 to vector<8x128xf32>
    %30 = arith.addf %29, %28 : vector<8x128xf32>
    %cst_20 = arith.constant 1.000000e+00 : f32
    %31 = vector.broadcast %cst_20 : f32 to vector<8x128xf32>
    %32 = arith.divf %31, %30 : vector<8x128xf32>
    %33 = vector.extract_strided_slice %16 {offsets = [0, 256], sizes = [8, 128], strides = [1, 1]} : vector<8x512xf32> to vector<8x128xf32>
    %34 = math.tanh %33 : vector<8x128xf32>
    %35 = vector.extract_strided_slice %16 {offsets = [0, 384], sizes = [8, 128], strides = [1, 1]} : vector<8x512xf32> to vector<8x128xf32>
    %cst_21 = arith.constant 0.000000e+00 : f32
    %36 = vector.broadcast %cst_21 : f32 to vector<8x128xf32>
    %37 = arith.subf %36, %35 : vector<8x128xf32>
    %38 = math.exp %37 : vector<8x128xf32>
    %cst_22 = arith.constant 1.000000e+00 : f32
    %39 = vector.broadcast %cst_22 : f32 to vector<8x128xf32>
    %40 = arith.addf %39, %38 : vector<8x128xf32>
    %cst_23 = arith.constant 1.000000e+00 : f32
    %41 = vector.broadcast %cst_23 : f32 to vector<8x128xf32>
    %42 = arith.divf %41, %40 : vector<8x128xf32>
    %43 = arith.mulf %32, %13 : vector<8x128xf32>
    %44 = arith.mulf %24, %34 : vector<8x128xf32>
    %45 = arith.addf %43, %44 : vector<8x128xf32>
    %46 = math.tanh %45 : vector<8x128xf32>
    %47 = arith.mulf %42, %46 : vector<8x128xf32>
    %cst_24 = arith.constant dense<0.000000e+00> : vector<8x512xf32>
    %48 = tpu.matmul %47, %1, %cst_24 {dimension_numbers = #tpu.dot_dimension_numbers<[1], [0], [0], [1], [0, 0, 1, 1], [], []>} : vector<8x128xf32>, vector<128x512xf32>, vector<8x512xf32> -> vector<8x512xf32>
    %c8 = arith.constant 8 : index
    %c0_25 = arith.constant 0 : index
    %49 = vector.load %arg5[%c8, %c0_25] : memref<64x512xf32, #tpu.memory_space<vmem>>, vector<8x512xf32>
    %50 = arith.addf %49, %48 : vector<8x512xf32>
    %51 = vector.extract_strided_slice %50 {offsets = [0, 0], sizes = [8, 128], strides = [1, 1]} : vector<8x512xf32> to vector<8x128xf32>
    %cst_26 = arith.constant 0.000000e+00 : f32
    %52 = vector.broadcast %cst_26 : f32 to vector<8x128xf32>
    %53 = arith.subf %52, %51 : vector<8x128xf32>
    %54 = math.exp %53 : vector<8x128xf32>
    %cst_27 = arith.constant 1.000000e+00 : f32
    %55 = vector.broadcast %cst_27 : f32 to vector<8x128xf32>
    %56 = arith.addf %55, %54 : vector<8x128xf32>
    %cst_28 = arith.constant 1.000000e+00 : f32
    %57 = vector.broadcast %cst_28 : f32 to vector<8x128xf32>
    %58 = arith.divf %57, %56 : vector<8x128xf32>
    %59 = vector.extract_strided_slice %50 {offsets = [0, 128], sizes = [8, 128], strides = [1, 1]} : vector<8x512xf32> to vector<8x128xf32>
    %cst_29 = arith.constant 0.000000e+00 : f32
    %60 = vector.broadcast %cst_29 : f32 to vector<8x128xf32>
    %61 = arith.subf %60, %59 : vector<8x128xf32>
    %62 = math.exp %61 : vector<8x128xf32>
    %cst_30 = arith.constant 1.000000e+00 : f32
    %63 = vector.broadcast %cst_30 : f32 to vector<8x128xf32>
    %64 = arith.addf %63, %62 : vector<8x128xf32>
    %cst_31 = arith.constant 1.000000e+00 : f32
    %65 = vector.broadcast %cst_31 : f32 to vector<8x128xf32>
    %66 = arith.divf %65, %64 : vector<8x128xf32>
    %67 = vector.extract_strided_slice %50 {offsets = [0, 256], sizes = [8, 128], strides = [1, 1]} : vector<8x512xf32> to vector<8x128xf32>
    %68 = math.tanh %67 : vector<8x128xf32>
    %69 = vector.extract_strided_slice %50 {offsets = [0, 384], sizes = [8, 128], strides = [1, 1]} : vector<8x512xf32> to vector<8x128xf32>
    %cst_32 = arith.constant 0.000000e+00 : f32
    %70 = vector.broadcast %cst_32 : f32 to vector<8x128xf32>
    %71 = arith.subf %70, %69 : vector<8x128xf32>
    %72 = math.exp %71 : vector<8x128xf32>
    %cst_33 = arith.constant 1.000000e+00 : f32
    %73 = vector.broadcast %cst_33 : f32 to vector<8x128xf32>
    %74 = arith.addf %73, %72 : vector<8x128xf32>
    %cst_34 = arith.constant 1.000000e+00 : f32
    %75 = vector.broadcast %cst_34 : f32 to vector<8x128xf32>
    %76 = arith.divf %75, %74 : vector<8x128xf32>
    %77 = arith.mulf %66, %45 : vector<8x128xf32>
    %78 = arith.mulf %58, %68 : vector<8x128xf32>
    %79 = arith.addf %77, %78 : vector<8x128xf32>
    %80 = math.tanh %79 : vector<8x128xf32>
    %81 = arith.mulf %76, %80 : vector<8x128xf32>
    %cst_35 = arith.constant dense<0.000000e+00> : vector<8x512xf32>
    %82 = tpu.matmul %81, %1, %cst_35 {dimension_numbers = #tpu.dot_dimension_numbers<[1], [0], [0], [1], [0, 0, 1, 1], [], []>} : vector<8x128xf32>, vector<128x512xf32>, vector<8x512xf32> -> vector<8x512xf32>
    %c16 = arith.constant 16 : index
    %c0_36 = arith.constant 0 : index
    %83 = vector.load %arg5[%c16, %c0_36] : memref<64x512xf32, #tpu.memory_space<vmem>>, vector<8x512xf32>
    %84 = arith.addf %83, %82 : vector<8x512xf32>
    %85 = vector.extract_strided_slice %84 {offsets = [0, 0], sizes = [8, 128], strides = [1, 1]} : vector<8x512xf32> to vector<8x128xf32>
    %cst_37 = arith.constant 0.000000e+00 : f32
    %86 = vector.broadcast %cst_37 : f32 to vector<8x128xf32>
    %87 = arith.subf %86, %85 : vector<8x128xf32>
    %88 = math.exp %87 : vector<8x128xf32>
    %cst_38 = arith.constant 1.000000e+00 : f32
    %89 = vector.broadcast %cst_38 : f32 to vector<8x128xf32>
    %90 = arith.addf %89, %88 : vector<8x128xf32>
    %cst_39 = arith.constant 1.000000e+00 : f32
    %91 = vector.broadcast %cst_39 : f32 to vector<8x128xf32>
    %92 = arith.divf %91, %90 : vector<8x128xf32>
    %93 = vector.extract_strided_slice %84 {offsets = [0, 128], sizes = [8, 128], strides = [1, 1]} : vector<8x512xf32> to vector<8x128xf32>
    %cst_40 = arith.constant 0.000000e+00 : f32
    %94 = vector.broadcast %cst_40 : f32 to vector<8x128xf32>
    %95 = arith.subf %94, %93 : vector<8x128xf32>
    %96 = math.exp %95 : vector<8x128xf32>
    %cst_41 = arith.constant 1.000000e+00 : f32
    %97 = vector.broadcast %cst_41 : f32 to vector<8x128xf32>
    %98 = arith.addf %97, %96 : vector<8x128xf32>
    %cst_42 = arith.constant 1.000000e+00 : f32
    %99 = vector.broadcast %cst_42 : f32 to vector<8x128xf32>
    %100 = arith.divf %99, %98 : vector<8x128xf32>
    %101 = vector.extract_strided_slice %84 {offsets = [0, 256], sizes = [8, 128], strides = [1, 1]} : vector<8x512xf32> to vector<8x128xf32>
    %102 = math.tanh %101 : vector<8x128xf32>
    %103 = vector.extract_strided_slice %84 {offsets = [0, 384], sizes = [8, 128], strides = [1, 1]} : vector<8x512xf32> to vector<8x128xf32>
    %cst_43 = arith.constant 0.000000e+00 : f32
    %104 = vector.broadcast %cst_43 : f32 to vector<8x128xf32>
    %105 = arith.subf %104, %103 : vector<8x128xf32>
    %106 = math.exp %105 : vector<8x128xf32>
    %cst_44 = arith.constant 1.000000e+00 : f32
    %107 = vector.broadcast %cst_44 : f32 to vector<8x128xf32>
    %108 = arith.addf %107, %106 : vector<8x128xf32>
    %cst_45 = arith.constant 1.000000e+00 : f32
    %109 = vector.broadcast %cst_45 : f32 to vector<8x128xf32>
    %110 = arith.divf %109, %108 : vector<8x128xf32>
    %111 = arith.mulf %100, %79 : vector<8x128xf32>
    %112 = arith.mulf %92, %102 : vector<8x128xf32>
    %113 = arith.addf %111, %112 : vector<8x128xf32>
    %114 = math.tanh %113 : vector<8x128xf32>
    %115 = arith.mulf %110, %114 : vector<8x128xf32>
    %cst_46 = arith.constant dense<0.000000e+00> : vector<8x512xf32>
    %116 = tpu.matmul %115, %1, %cst_46 {dimension_numbers = #tpu.dot_dimension_numbers<[1], [0], [0], [1], [0, 0, 1, 1], [], []>} : vector<8x128xf32>, vector<128x512xf32>, vector<8x512xf32> -> vector<8x512xf32>
    %c24 = arith.constant 24 : index
    %c0_47 = arith.constant 0 : index
    %117 = vector.load %arg5[%c24, %c0_47] : memref<64x512xf32, #tpu.memory_space<vmem>>, vector<8x512xf32>
    %118 = arith.addf %117, %116 : vector<8x512xf32>
    %119 = vector.extract_strided_slice %118 {offsets = [0, 0], sizes = [8, 128], strides = [1, 1]} : vector<8x512xf32> to vector<8x128xf32>
    %cst_48 = arith.constant 0.000000e+00 : f32
    %120 = vector.broadcast %cst_48 : f32 to vector<8x128xf32>
    %121 = arith.subf %120, %119 : vector<8x128xf32>
    %122 = math.exp %121 : vector<8x128xf32>
    %cst_49 = arith.constant 1.000000e+00 : f32
    %123 = vector.broadcast %cst_49 : f32 to vector<8x128xf32>
    %124 = arith.addf %123, %122 : vector<8x128xf32>
    %cst_50 = arith.constant 1.000000e+00 : f32
    %125 = vector.broadcast %cst_50 : f32 to vector<8x128xf32>
    %126 = arith.divf %125, %124 : vector<8x128xf32>
    %127 = vector.extract_strided_slice %118 {offsets = [0, 128], sizes = [8, 128], strides = [1, 1]} : vector<8x512xf32> to vector<8x128xf32>
    %cst_51 = arith.constant 0.000000e+00 : f32
    %128 = vector.broadcast %cst_51 : f32 to vector<8x128xf32>
    %129 = arith.subf %128, %127 : vector<8x128xf32>
    %130 = math.exp %129 : vector<8x128xf32>
    %cst_52 = arith.constant 1.000000e+00 : f32
    %131 = vector.broadcast %cst_52 : f32 to vector<8x128xf32>
    %132 = arith.addf %131, %130 : vector<8x128xf32>
    %cst_53 = arith.constant 1.000000e+00 : f32
    %133 = vector.broadcast %cst_53 : f32 to vector<8x128xf32>
    %134 = arith.divf %133, %132 : vector<8x128xf32>
    %135 = vector.extract_strided_slice %118 {offsets = [0, 256], sizes = [8, 128], strides = [1, 1]} : vector<8x512xf32> to vector<8x128xf32>
    %136 = math.tanh %135 : vector<8x128xf32>
    %137 = vector.extract_strided_slice %118 {offsets = [0, 384], sizes = [8, 128], strides = [1, 1]} : vector<8x512xf32> to vector<8x128xf32>
    %cst_54 = arith.constant 0.000000e+00 : f32
    %138 = vector.broadcast %cst_54 : f32 to vector<8x128xf32>
    %139 = arith.subf %138, %137 : vector<8x128xf32>
    %140 = math.exp %139 : vector<8x128xf32>
    %cst_55 = arith.constant 1.000000e+00 : f32
    %141 = vector.broadcast %cst_55 : f32 to vector<8x128xf32>
    %142 = arith.addf %141, %140 : vector<8x128xf32>
    %cst_56 = arith.constant 1.000000e+00 : f32
    %143 = vector.broadcast %cst_56 : f32 to vector<8x128xf32>
    %144 = arith.divf %143, %142 : vector<8x128xf32>
    %145 = arith.mulf %134, %113 : vector<8x128xf32>
    %146 = arith.mulf %126, %136 : vector<8x128xf32>
    %147 = arith.addf %145, %146 : vector<8x128xf32>
    %148 = math.tanh %147 : vector<8x128xf32>
    %149 = arith.mulf %144, %148 : vector<8x128xf32>
    %cst_57 = arith.constant dense<0.000000e+00> : vector<8x512xf32>
    %150 = tpu.matmul %149, %1, %cst_57 {dimension_numbers = #tpu.dot_dimension_numbers<[1], [0], [0], [1], [0, 0, 1, 1], [], []>} : vector<8x128xf32>, vector<128x512xf32>, vector<8x512xf32> -> vector<8x512xf32>
    %c32 = arith.constant 32 : index
    %c0_58 = arith.constant 0 : index
    %151 = vector.load %arg5[%c32, %c0_58] : memref<64x512xf32, #tpu.memory_space<vmem>>, vector<8x512xf32>
    %152 = arith.addf %151, %150 : vector<8x512xf32>
    %153 = vector.extract_strided_slice %152 {offsets = [0, 0], sizes = [8, 128], strides = [1, 1]} : vector<8x512xf32> to vector<8x128xf32>
    %cst_59 = arith.constant 0.000000e+00 : f32
    %154 = vector.broadcast %cst_59 : f32 to vector<8x128xf32>
    %155 = arith.subf %154, %153 : vector<8x128xf32>
    %156 = math.exp %155 : vector<8x128xf32>
    %cst_60 = arith.constant 1.000000e+00 : f32
    %157 = vector.broadcast %cst_60 : f32 to vector<8x128xf32>
    %158 = arith.addf %157, %156 : vector<8x128xf32>
    %cst_61 = arith.constant 1.000000e+00 : f32
    %159 = vector.broadcast %cst_61 : f32 to vector<8x128xf32>
    %160 = arith.divf %159, %158 : vector<8x128xf32>
    %161 = vector.extract_strided_slice %152 {offsets = [0, 128], sizes = [8, 128], strides = [1, 1]} : vector<8x512xf32> to vector<8x128xf32>
    %cst_62 = arith.constant 0.000000e+00 : f32
    %162 = vector.broadcast %cst_62 : f32 to vector<8x128xf32>
    %163 = arith.subf %162, %161 : vector<8x128xf32>
    %164 = math.exp %163 : vector<8x128xf32>
    %cst_63 = arith.constant 1.000000e+00 : f32
    %165 = vector.broadcast %cst_63 : f32 to vector<8x128xf32>
    %166 = arith.addf %165, %164 : vector<8x128xf32>
    %cst_64 = arith.constant 1.000000e+00 : f32
    %167 = vector.broadcast %cst_64 : f32 to vector<8x128xf32>
    %168 = arith.divf %167, %166 : vector<8x128xf32>
    %169 = vector.extract_strided_slice %152 {offsets = [0, 256], sizes = [8, 128], strides = [1, 1]} : vector<8x512xf32> to vector<8x128xf32>
    %170 = math.tanh %169 : vector<8x128xf32>
    %171 = vector.extract_strided_slice %152 {offsets = [0, 384], sizes = [8, 128], strides = [1, 1]} : vector<8x512xf32> to vector<8x128xf32>
    %cst_65 = arith.constant 0.000000e+00 : f32
    %172 = vector.broadcast %cst_65 : f32 to vector<8x128xf32>
    %173 = arith.subf %172, %171 : vector<8x128xf32>
    %174 = math.exp %173 : vector<8x128xf32>
    %cst_66 = arith.constant 1.000000e+00 : f32
    %175 = vector.broadcast %cst_66 : f32 to vector<8x128xf32>
    %176 = arith.addf %175, %174 : vector<8x128xf32>
    %cst_67 = arith.constant 1.000000e+00 : f32
    %177 = vector.broadcast %cst_67 : f32 to vector<8x128xf32>
    %178 = arith.divf %177, %176 : vector<8x128xf32>
    %179 = arith.mulf %168, %147 : vector<8x128xf32>
    %180 = arith.mulf %160, %170 : vector<8x128xf32>
    %181 = arith.addf %179, %180 : vector<8x128xf32>
    %182 = math.tanh %181 : vector<8x128xf32>
    %183 = arith.mulf %178, %182 : vector<8x128xf32>
    %cst_68 = arith.constant dense<0.000000e+00> : vector<8x512xf32>
    %184 = tpu.matmul %183, %1, %cst_68 {dimension_numbers = #tpu.dot_dimension_numbers<[1], [0], [0], [1], [0, 0, 1, 1], [], []>} : vector<8x128xf32>, vector<128x512xf32>, vector<8x512xf32> -> vector<8x512xf32>
    %c40 = arith.constant 40 : index
    %c0_69 = arith.constant 0 : index
    %185 = vector.load %arg5[%c40, %c0_69] : memref<64x512xf32, #tpu.memory_space<vmem>>, vector<8x512xf32>
    %186 = arith.addf %185, %184 : vector<8x512xf32>
    %187 = vector.extract_strided_slice %186 {offsets = [0, 0], sizes = [8, 128], strides = [1, 1]} : vector<8x512xf32> to vector<8x128xf32>
    %cst_70 = arith.constant 0.000000e+00 : f32
    %188 = vector.broadcast %cst_70 : f32 to vector<8x128xf32>
    %189 = arith.subf %188, %187 : vector<8x128xf32>
    %190 = math.exp %189 : vector<8x128xf32>
    %cst_71 = arith.constant 1.000000e+00 : f32
    %191 = vector.broadcast %cst_71 : f32 to vector<8x128xf32>
    %192 = arith.addf %191, %190 : vector<8x128xf32>
    %cst_72 = arith.constant 1.000000e+00 : f32
    %193 = vector.broadcast %cst_72 : f32 to vector<8x128xf32>
    %194 = arith.divf %193, %192 : vector<8x128xf32>
    %195 = vector.extract_strided_slice %186 {offsets = [0, 128], sizes = [8, 128], strides = [1, 1]} : vector<8x512xf32> to vector<8x128xf32>
    %cst_73 = arith.constant 0.000000e+00 : f32
    %196 = vector.broadcast %cst_73 : f32 to vector<8x128xf32>
    %197 = arith.subf %196, %195 : vector<8x128xf32>
    %198 = math.exp %197 : vector<8x128xf32>
    %cst_74 = arith.constant 1.000000e+00 : f32
    %199 = vector.broadcast %cst_74 : f32 to vector<8x128xf32>
    %200 = arith.addf %199, %198 : vector<8x128xf32>
    %cst_75 = arith.constant 1.000000e+00 : f32
    %201 = vector.broadcast %cst_75 : f32 to vector<8x128xf32>
    %202 = arith.divf %201, %200 : vector<8x128xf32>
    %203 = vector.extract_strided_slice %186 {offsets = [0, 256], sizes = [8, 128], strides = [1, 1]} : vector<8x512xf32> to vector<8x128xf32>
    %204 = math.tanh %203 : vector<8x128xf32>
    %205 = vector.extract_strided_slice %186 {offsets = [0, 384], sizes = [8, 128], strides = [1, 1]} : vector<8x512xf32> to vector<8x128xf32>
    %cst_76 = arith.constant 0.000000e+00 : f32
    %206 = vector.broadcast %cst_76 : f32 to vector<8x128xf32>
    %207 = arith.subf %206, %205 : vector<8x128xf32>
    %208 = math.exp %207 : vector<8x128xf32>
    %cst_77 = arith.constant 1.000000e+00 : f32
    %209 = vector.broadcast %cst_77 : f32 to vector<8x128xf32>
    %210 = arith.addf %209, %208 : vector<8x128xf32>
    %cst_78 = arith.constant 1.000000e+00 : f32
    %211 = vector.broadcast %cst_78 : f32 to vector<8x128xf32>
    %212 = arith.divf %211, %210 : vector<8x128xf32>
    %213 = arith.mulf %202, %181 : vector<8x128xf32>
    %214 = arith.mulf %194, %204 : vector<8x128xf32>
    %215 = arith.addf %213, %214 : vector<8x128xf32>
    %216 = math.tanh %215 : vector<8x128xf32>
    %217 = arith.mulf %212, %216 : vector<8x128xf32>
    %cst_79 = arith.constant dense<0.000000e+00> : vector<8x512xf32>
    %218 = tpu.matmul %217, %1, %cst_79 {dimension_numbers = #tpu.dot_dimension_numbers<[1], [0], [0], [1], [0, 0, 1, 1], [], []>} : vector<8x128xf32>, vector<128x512xf32>, vector<8x512xf32> -> vector<8x512xf32>
    %c48 = arith.constant 48 : index
    %c0_80 = arith.constant 0 : index
    %219 = vector.load %arg5[%c48, %c0_80] : memref<64x512xf32, #tpu.memory_space<vmem>>, vector<8x512xf32>
    %220 = arith.addf %219, %218 : vector<8x512xf32>
    %221 = vector.extract_strided_slice %220 {offsets = [0, 0], sizes = [8, 128], strides = [1, 1]} : vector<8x512xf32> to vector<8x128xf32>
    %cst_81 = arith.constant 0.000000e+00 : f32
    %222 = vector.broadcast %cst_81 : f32 to vector<8x128xf32>
    %223 = arith.subf %222, %221 : vector<8x128xf32>
    %224 = math.exp %223 : vector<8x128xf32>
    %cst_82 = arith.constant 1.000000e+00 : f32
    %225 = vector.broadcast %cst_82 : f32 to vector<8x128xf32>
    %226 = arith.addf %225, %224 : vector<8x128xf32>
    %cst_83 = arith.constant 1.000000e+00 : f32
    %227 = vector.broadcast %cst_83 : f32 to vector<8x128xf32>
    %228 = arith.divf %227, %226 : vector<8x128xf32>
    %229 = vector.extract_strided_slice %220 {offsets = [0, 128], sizes = [8, 128], strides = [1, 1]} : vector<8x512xf32> to vector<8x128xf32>
    %cst_84 = arith.constant 0.000000e+00 : f32
    %230 = vector.broadcast %cst_84 : f32 to vector<8x128xf32>
    %231 = arith.subf %230, %229 : vector<8x128xf32>
    %232 = math.exp %231 : vector<8x128xf32>
    %cst_85 = arith.constant 1.000000e+00 : f32
    %233 = vector.broadcast %cst_85 : f32 to vector<8x128xf32>
    %234 = arith.addf %233, %232 : vector<8x128xf32>
    %cst_86 = arith.constant 1.000000e+00 : f32
    %235 = vector.broadcast %cst_86 : f32 to vector<8x128xf32>
    %236 = arith.divf %235, %234 : vector<8x128xf32>
    %237 = vector.extract_strided_slice %220 {offsets = [0, 256], sizes = [8, 128], strides = [1, 1]} : vector<8x512xf32> to vector<8x128xf32>
    %238 = math.tanh %237 : vector<8x128xf32>
    %239 = vector.extract_strided_slice %220 {offsets = [0, 384], sizes = [8, 128], strides = [1, 1]} : vector<8x512xf32> to vector<8x128xf32>
    %cst_87 = arith.constant 0.000000e+00 : f32
    %240 = vector.broadcast %cst_87 : f32 to vector<8x128xf32>
    %241 = arith.subf %240, %239 : vector<8x128xf32>
    %242 = math.exp %241 : vector<8x128xf32>
    %cst_88 = arith.constant 1.000000e+00 : f32
    %243 = vector.broadcast %cst_88 : f32 to vector<8x128xf32>
    %244 = arith.addf %243, %242 : vector<8x128xf32>
    %cst_89 = arith.constant 1.000000e+00 : f32
    %245 = vector.broadcast %cst_89 : f32 to vector<8x128xf32>
    %246 = arith.divf %245, %244 : vector<8x128xf32>
    %247 = arith.mulf %236, %215 : vector<8x128xf32>
    %248 = arith.mulf %228, %238 : vector<8x128xf32>
    %249 = arith.addf %247, %248 : vector<8x128xf32>
    %250 = math.tanh %249 : vector<8x128xf32>
    %251 = arith.mulf %246, %250 : vector<8x128xf32>
    %cst_90 = arith.constant dense<0.000000e+00> : vector<8x512xf32>
    %252 = tpu.matmul %251, %1, %cst_90 {dimension_numbers = #tpu.dot_dimension_numbers<[1], [0], [0], [1], [0, 0, 1, 1], [], []>} : vector<8x128xf32>, vector<128x512xf32>, vector<8x512xf32> -> vector<8x512xf32>
    %c56 = arith.constant 56 : index
    %c0_91 = arith.constant 0 : index
    %253 = vector.load %arg5[%c56, %c0_91] : memref<64x512xf32, #tpu.memory_space<vmem>>, vector<8x512xf32>
    %254 = arith.addf %253, %252 : vector<8x512xf32>
    %255 = vector.extract_strided_slice %254 {offsets = [0, 0], sizes = [8, 128], strides = [1, 1]} : vector<8x512xf32> to vector<8x128xf32>
    %cst_92 = arith.constant 0.000000e+00 : f32
    %256 = vector.broadcast %cst_92 : f32 to vector<8x128xf32>
    %257 = arith.subf %256, %255 : vector<8x128xf32>
    %258 = math.exp %257 : vector<8x128xf32>
    %cst_93 = arith.constant 1.000000e+00 : f32
    %259 = vector.broadcast %cst_93 : f32 to vector<8x128xf32>
    %260 = arith.addf %259, %258 : vector<8x128xf32>
    %cst_94 = arith.constant 1.000000e+00 : f32
    %261 = vector.broadcast %cst_94 : f32 to vector<8x128xf32>
    %262 = arith.divf %261, %260 : vector<8x128xf32>
    %263 = vector.extract_strided_slice %254 {offsets = [0, 128], sizes = [8, 128], strides = [1, 1]} : vector<8x512xf32> to vector<8x128xf32>
    %cst_95 = arith.constant 0.000000e+00 : f32
    %264 = vector.broadcast %cst_95 : f32 to vector<8x128xf32>
    %265 = arith.subf %264, %263 : vector<8x128xf32>
    %266 = math.exp %265 : vector<8x128xf32>
    %cst_96 = arith.constant 1.000000e+00 : f32
    %267 = vector.broadcast %cst_96 : f32 to vector<8x128xf32>
    %268 = arith.addf %267, %266 : vector<8x128xf32>
    %cst_97 = arith.constant 1.000000e+00 : f32
    %269 = vector.broadcast %cst_97 : f32 to vector<8x128xf32>
    %270 = arith.divf %269, %268 : vector<8x128xf32>
    %271 = vector.extract_strided_slice %254 {offsets = [0, 256], sizes = [8, 128], strides = [1, 1]} : vector<8x512xf32> to vector<8x128xf32>
    %272 = math.tanh %271 : vector<8x128xf32>
    %273 = vector.extract_strided_slice %254 {offsets = [0, 384], sizes = [8, 128], strides = [1, 1]} : vector<8x512xf32> to vector<8x128xf32>
    %cst_98 = arith.constant 0.000000e+00 : f32
    %274 = vector.broadcast %cst_98 : f32 to vector<8x128xf32>
    %275 = arith.subf %274, %273 : vector<8x128xf32>
    %276 = math.exp %275 : vector<8x128xf32>
    %cst_99 = arith.constant 1.000000e+00 : f32
    %277 = vector.broadcast %cst_99 : f32 to vector<8x128xf32>
    %278 = arith.addf %277, %276 : vector<8x128xf32>
    %cst_100 = arith.constant 1.000000e+00 : f32
    %279 = vector.broadcast %cst_100 : f32 to vector<8x128xf32>
    %280 = arith.divf %279, %278 : vector<8x128xf32>
    %281 = arith.mulf %270, %249 : vector<8x128xf32>
    %282 = arith.mulf %262, %272 : vector<8x128xf32>
    %283 = arith.addf %281, %282 : vector<8x128xf32>
    %284 = math.tanh %283 : vector<8x128xf32>
    %285 = arith.mulf %280, %284 : vector<8x128xf32>
    %c0_101 = arith.constant 0 : index
    %c0_102 = arith.constant 0 : index
    %286 = vector.load %arg4[%c0_101, %c0_102] : memref<8x128xf32, #tpu.memory_space<vmem>>, vector<8x128xf32>
    tpu.vector_store %arg4[%c0_101, %c0_102], %285 {strides = array<i32>} : memref<8x128xf32, #tpu.memory_space<vmem>>, vector<8x128xf32>,
    return
  }
  func.func @transform_0(%arg0: i32) -> (i32, i32, i32) {
    %c0_i32 = arith.constant 0 : i32
    %c0_i32_0 = arith.constant 0 : i32
    %c0_i32_1 = arith.constant 0 : i32
    return %arg0, %c0_i32, %c0_i32_0 : i32, i32, i32
  }
  func.func @transform_1(%arg0: i32) -> (i32, i32) {
    %c0_i32 = arith.constant 0 : i32
    %c0_i32_0 = arith.constant 0 : i32
    %c0_i32_1 = arith.constant 0 : i32
    return %c0_i32, %c0_i32_0 : i32, i32
  }
  func.func @transform_2(%arg0: i32) -> (i32, i32) {
    %c0_i32 = arith.constant 0 : i32
    %c0_i32_0 = arith.constant 0 : i32
    %c0_i32_1 = arith.constant 0 : i32
    return %c0_i32, %c0_i32_0 : i32, i32
  }
  func.func @transform_3(%arg0: i32) -> (i32, i32) {
    %c0_i32 = arith.constant 0 : i32
    %c0_i32_0 = arith.constant 0 : i32
    return %arg0, %c0_i32 : i32, i32
  }
}

</mosaic_0001>

<bundles_post_ra>
// kernel: tpu_custom_call.1
= control target key start
LH: loop header
LB: loop body
LE: loop exit
PB: predicated region body
PF: predicated region fallthrough
CT: control target
= control target key end

     0   :  { %8 = vsyncpa [#allocation4], 0  ;;  %s3296_s0 = inlined_call_operand.vmem [shape: s32[2,64,1], index: 0, kind: input, shape index: {}]   ;;  %s3297_s1 = inlined_call_operand.vmem [shape: f32[16,512], index: 1, kind: input, shape index: {}]   ;;  %s3298_s2 = inlined_call_operand.hbm [shape: f32[128,512], index: 2, kind: input, shape index: {}]   ;;  %s3299_s3 = inlined_call_operand.hbm [shape: f32[16,128], index: 3, kind: output, shape index: {}]  }
   0x1   :  { %9 = vsyncpa [#allocation5], 0 }
   0x2   :  { %11 = vsyncpa [#allocation5 + $0x1], 0  ;;  %s2243_s12 = smov 0   ;;  %s2245_s13 = smov 0  }
   0x3   :  { %s2247_s14 = smov 0   ;;  %s2249_s15 = smov 0  }
   0x4 LB: > { %s2264_s16 = sadd.s32 4294967295, %s2216_s15   ;;  %s1825_s17 = sadd.s32 4294967294, %s2216_s15   ;;  %s2216_s15 = sphi %s2249_s15, %s3605_s15   ;;  %s2212_s14 = sphi %s2247_s14, %s3604_s14   ;;  %s2208_s13 = sphi %s2245_s13, %s3603_s13   ;;  %s2204_s12 = sphi %s2243_s12, %s3602_s12  }
   0x5   : > { %s2268_s18 = sadd.s32 1, %s2216_s15   ;;  %s92_s19 = sadd.s32 1, %s2212_s14 }
   0x6   : > { %s89_s20 = ssub.s32 %s2216_s15, %s2268_s18  ;;  %p102_p0 = scmp.ne.s32.totalorder %s2212_s14, %s2208_s13 }
   0x7   : > { %p90_p1 = scmp.eq.s32.totalorder %s89_s20, 0  ;;  %p103_p2 = scmp.eq.s32.totalorder %s2264_s16, 1 }
   0x8   : > { %p108_p3 = scmp.ne.s32.totalorder %s2208_s13, %s2204_s12  ;;  %p109_p4 = scmp.eq.s32.totalorder %s1825_s17, 1 }
   0x9   : > { %s2279_s21 = scalar_select %p90_p1, %s2212_s14, %s92_s19  }
   0xa   : > { %p2281_p5 = por %p103_p2, %p102_p0  ;;  %p2285_p6 = por %p109_p4, %p108_p3 }
   0xb   : > { %p1826_p7 = scmp.ge.s32.totalorder %s2216_s15, 1  ;;  %p116_p8 = scmp.lt.s32.totalorder %s2216_s15, 3 }
   0xc   : > { %p1885_p9 = scmp.eq.s32.totalorder %s2264_s16, 0  ;;  %s130_s26 = sshll.u32 %s3298_s2, 4  ;;  %s131_s26 = int_to_ptr.hbm [resolvable:$true] %s130_s26 }
   0xd   : > { %p117_p10 = pnand %p1826_p7, %p116_p8  ;;  %s2218_s27 = smov [#allocation3]  }
   0xe   : > { %s132_s28 = sshll.u32 %s2218_s27, 4  ;;  %s2219_s29 = smov 512   ;;  %s133_s28 = int_to_ptr.vmem [resolvable:$true] %s132_s28 }
   0xf   : > { %p1877_p11 = pneg %p117_p10  ;;  %s2220_s30 = smov 32  }
  0x10   : > { %156 = sbr.rel (%p117_p10) target bundleno = 1589 (0x635), region = 32 }
  0x11   : > { %p1878_p12 = pnand %p1885_p9, %p1877_p11 }
  0x13   : > { %1880 = dma.hbm_to_vmem [thread:$0]  (!%p1878_p12), %s131_s26, 8192, %s133_s28, [#allocation4], %s2219_s29, %s2219_s29, %s2220_s30  }
  0x15   : > { %2195 = dma.done.wait (%p1885_p9), [#allocation4], 8192  }
  0x16   : > { %2197 = vsyncadd (%p1885_p9), [#allocation4], 4294959104  ;;  %p181_p13 = scmp.lt.s32.totalorder %s2264_s16, 1  ;;  %v2221_v0 = vmov 0   ;;  %v190_v9 = vld [vmem:[%s3297_s1 + $0x20] sm:$0xff]  ;;  %v191_v10 = vld [vmem:[%s3297_s1 + $0x28] sm:$0xff]  ;;  %v266_v36 = vlaneseq }
  0x17   : > { %1926 = vset.pattern.permute.xlu1 %v2221_v0  ;;  %1925 = vset.pattern.permute.xlu0 %v2221_v0  ;;  %v192_v11 = vld [vmem:[%s3297_s1 + $0x30] sm:$0xff]  ;;  %v193_v12 = vld [vmem:[%s3297_s1 + $0x38] sm:$0xff]  ;;  %v186_v13 = vld [vmem:[%s3297_s1] sm:$0xff]  ;;  %vm308_vm0 = vcmask 130048   ;;  %v3306_v47 = vmov 0.0   ;;  %s178_s7 = sand.u32 1, %s2208_s13  }
  0x18   : > { %s182_s4 = scalar_select %p181_p13, %s2264_s16, 1  ;;  %1927 = vset.pattern.permute.xlu2 %v2221_v0  ;;  %347 = vmatpush.msra.mxu0 %v190_v9  ;;  %v187_v14 = vld [vmem:[%s3297_s1 + $0x8] sm:$0xff]  ;;  %v188_v15 = vld [vmem:[%s3297_s1 + $0x10] sm:$0xff]  ;;  %v189_v16 = vld [vmem:[%s3297_s1 + $0x18] sm:$0xff]  ;;  %v2393_v40 = vand.u32 127, %v266_v36 }
  0x19   : > { %388 = vmatpush.msra.mxu1 %v191_v10  ;;  %429 = vmatpush.msra.mxu2 %v192_v11  ;;  %v2330_v17 = vld [vmem:[#allocation3 + $0x1e0] sm:$0xff]  ;;  %v2332_v18 = vld [vmem:[#allocation3 + $0x1e8] sm:$0xff]  ;;  %v2342_v21 = vld [vmem:[#allocation3 + $0x1f8] sm:$0xff]  ;;  %s1867_s9 = sshll.u32 %s2264_s16, 3  ;;  %s1739_s16 = scalar_lea.sflag [#allocation5], %s178_s7 }
  0x1a   : > { %s1870_s5 = sshll.u32 %s182_s4, 6  ;;  %470 = vmatpush.msra.mxu3 %v193_v12  ;;  %348 = vmatpush.msra.mxu0 %v186_v13  ;;  %v2334_v19 = vld [vmem:[#allocation3 + $0x1c0] sm:$0xff]  ;;  %v2338_v20 = vld [vmem:[#allocation3 + $0x1c8] sm:$0xff]  ;;  %3405 = vst [vmem:[#allocation9_spill] sm:$0xff] %v2342_v21  ;;  %v2349_v24 = vld [vmem:[#allocation3 + $0x1d8] sm:$0xff]  ;;  %s1749_s17 = scalar_lea.hbm %s3299_s3, %s1867_s9 }
  0x1b   : > { %s185_s8 = scalar_lea.vmem %s3296_s0, %s1870_s5  ;;  %389 = vmatpush.msra.mxu1 %v187_v14  ;;  %430 = vmatpush.msra.mxu2 %v188_v15  ;;  %v2345_v22 = vld [vmem:[#allocation3 + $0x1a0] sm:$0xff]  ;;  %v2347_v23 = vld [vmem:[#allocation3 + $0x1a8] sm:$0xff]  ;;  %v2360_v27 = vld [vmem:[#allocation3 + $0x1b8] sm:$0xff]  ;;  %s1753_s24 = sshll.u32 %s1749_s17, 4  ;;  %s1754_s24 = int_to_ptr.hbm [resolvable:$true] %s1753_s24 }
  0x1c   : > { %v260_v1 = vld [vmem:[%s185_s8 + $0x10] sm:$0xff]  ;;  %v258_v2 = vld [vmem:[%s185_s8] sm:$0xff]  ;;  %v261_v4 = vld [vmem:[%s185_s8 + $0x18] sm:$0xff]  ;;  %471 = vmatpush.msra.mxu3 %v189_v16  ;;  %529 = vmatpush.msrb.mxu0 %v2330_v17  ;;  %s2164_s25 = sshra.s32 %s1754_s24, 4  ;;  %s2170_s29 = scalar_lea.hbm %s3299_s3, 16  ;;  %s2165_s25 = int_to_ptr.hbm [resolvable:$true] %s2164_s25 }
  0x1d   : > { %275 = vperm.xlu1 %1926, %v260_v1   ;;  %269 = vperm.xlu0 %1925, %v258_v2   ;;  %v262_v3 = vld [vmem:[%s185_s8 + $0x20] sm:$0xff]  ;;  %v259_v5 = vld [vmem:[%s185_s8 + $0x8] sm:$0xff]  ;;  %v265_v7 = vld [vmem:[%s185_s8 + $0x38] sm:$0xff]  ;;  %s2166_s26 = scalar_lea.hbm %s2165_s25, 8  ;;  %p2171_p3 = scmp.lt.s32.totalorder %s2165_s25, %s3299_s3 }
  0x1e   : > { %281 = vperm.xlu2 %1927, %v262_v3   ;;  %v263_v6 = vld [vmem:[%s185_s8 + $0x28] sm:$0xff]  ;;  %v264_v8 = vld [vmem:[%s185_s8 + $0x30] sm:$0xff]  ;;  %549 = vmatpush.msrb.mxu1 %v2332_v18  ;;  %v2353_v25 = vld [vmem:[#allocation3 + $0x180] sm:$0xff]  ;;  %s1831_s8 = sshll.u32 %s178_s7, 3  ;;  %p2167_p0 = scmp.ne.s32.totalorder %s2165_s25, %s2166_s26 }
  0x1f   : > { %530 = vmatpush.msrb.mxu0 %v2334_v19  ;;  %589 = vmatpush.msrb.mxu3 %v2342_v21  ;;  %v2355_v26 = vld [vmem:[#allocation3 + $0x188] sm:$0xff]  ;;  %v2363_v28 = vld [vmem:[#allocation3 + $0x160] sm:$0xff]  ;;  %v2367_v30 = vld [vmem:[#allocation3 + $0x1f0] sm:$0xff]  ;;  %s180_s19 = scalar_lea.vmem [#allocation6], %s1831_s8  ;;  %p2172_p4 = scmp.lt.s32.totalorder %s2170_s29, %s2166_s26 }
  0x20   : > { %550 = vmatpush.msrb.mxu1 %v2338_v20  ;;  %v2365_v29 = vld [vmem:[#allocation3 + $0x168] sm:$0xff]  ;;  %v2371_v31 = vld [vmem:[#allocation3 + $0x198] sm:$0xff]  ;;  %v2373_v32 = vld [vmem:[#allocation3 + $0x140] sm:$0xff]  ;;  %569 = vmatpush.msrb.mxu2 %v2367_v30  ;;  %s1751_s20 = sshll.u32 %s180_s19, 4  ;;  %p2168_p1 = pnand %p2167_p0, %p2281_p5  ;;  %s1752_s20 = int_to_ptr.vmem [resolvable:$true] %s1751_s20 }
  0x21   : > { %531 = vmatpush.msrb.mxu0 %v2345_v22  ;;  %590 = vmatpush.msrb.mxu3 %v2349_v24  ;;  %v2375_v33 = vld [vmem:[#allocation3 + $0x148] sm:$0xff]  ;;  %v2379_v34 = vld [vmem:[#allocation3 + $0x1d0] sm:$0xff]  ;;  %v2381_v35 = vld [vmem:[#allocation3 + $0x178] sm:$0xff]  ;;  %p2173_p7 = por %p2172_p4, %p2171_p3 }
  0x22   : > { %551 = vmatpush.msrb.mxu1 %v2347_v23  ;;  %570 = vmatpush.msrb.mxu2 %v2379_v34  ;;  %v2387_v37 = vld [vmem:[#allocation3 + $0x120] sm:$0xff]  ;;  %v2389_v38 = vld [vmem:[#allocation3 + $0x128] sm:$0xff]  ;;  %v2391_v39 = vld [vmem:[#allocation3 + $0x1b0] sm:$0xff]  ;;  %p2169_p2 = pneg %p2168_p1 }
  0x23   : > { %532 = vmatpush.msrb.mxu0 %v2353_v25  ;;  %591 = vmatpush.msrb.mxu3 %v2360_v27  ;;  %v2397_v41 = vld [vmem:[#allocation3 + $0x158] sm:$0xff]  ;;  %v2399_v42 = vld [vmem:[#allocation3 + $0x100] sm:$0xff]  ;;  %v2401_v43 = vld [vmem:[#allocation3 + $0x108] sm:$0xff] }
  0x24   : > { %552 = vmatpush.msrb.mxu1 %v2355_v26  ;;  %571 = vmatpush.msrb.mxu2 %v2391_v39  ;;  %v2405_v44 = vld [vmem:[#allocation3 + $0x190] sm:$0xff]  ;;  %v2407_v45 = vld [vmem:[#allocation3 + $0x138] sm:$0xff]  ;;  %v2419_v49 = vld [vmem:[#allocation3 + $0xe0] sm:$0xff]  ;;  %p2174_p8 = pnand %p2173_p7, %p2169_p2 }
  0x25   : > { %278 = vperm.xlu1 %1926, %v261_v4   ;;  %272 = vperm.xlu0 %1925, %v259_v5   ;;  %v2421_v50 = vld [vmem:[#allocation3 + $0xe8] sm:$0xff]  ;;  %v2423_v51 = vld [vmem:[#allocation3 + $0x170] sm:$0xff]  ;;  %v2427_v52 = vld [vmem:[#allocation3 + $0x118] sm:$0xff] }
  0x26   : > { %284 = vperm.xlu2 %1927, %v263_v6   ;;  %533 = vmatpush.msrb.mxu0 %v2363_v28  ;;  %v2429_v53 = vld [vmem:[#allocation3 + $0xc0] sm:$0xff]  ;;  %v2431_v54 = vld [vmem:[#allocation3 + $0xc8] sm:$0xff]  ;;  %v2435_v55 = vld [vmem:[#allocation3 + $0x150] sm:$0xff] }
  0x27   : > { %553 = vmatpush.msrb.mxu1 %v2365_v29  ;;  %592 = vmatpush.msrb.mxu3 %v2371_v31  ;;  %v2437_v56 = vld [vmem:[#allocation3 + $0xf8] sm:$0xff]  ;;  %v2449_v60 = vld [vmem:[#allocation3 + $0xa0] sm:$0xff]  ;;  %v2451_v61 = vld [vmem:[#allocation3 + $0xa8] sm:$0xff] }
  0x28   : > { %534 = vmatpush.msrb.mxu0 %v2373_v32  ;;  %572 = vmatpush.msrb.mxu2 %v2405_v44  ;;  %3406 = vst [vmem:[#allocation10_spill] sm:$0xff] %v2449_v60  ;;  %v2453_v62 = vld [vmem:[#allocation3 + $0x130] sm:$0xff]  ;;  %v2458_v63 = vld [vmem:[#allocation3 + $0xd8] sm:$0xff]  ;;  %v2460_v0 = vld [vmem:[#allocation3 + $0x80] sm:$0xff] }
  0x29   : > { %554 = vmatpush.msrb.mxu1 %v2375_v33  ;;  %593 = vmatpush.msrb.mxu3 %v2381_v35  ;;  %3407 = vst [vmem:[#allocation11_spill] sm:$0xff] %v2451_v61  ;;  %v2462_v1 = vld [vmem:[#allocation3 + $0x88] sm:$0xff]  ;;  %v2466_v2 = vld [vmem:[#allocation3 + $0x110] sm:$0xff]  ;;  %v2468_v3 = vld [vmem:[#allocation3 + $0xb8] sm:$0xff] }
  0x2a   : > { %535 = vmatpush.msrb.mxu0 %v2387_v37  ;;  %573 = vmatpush.msrb.mxu2 %v2423_v51  ;;  %3408 = vst [vmem:[#allocation12_spill] sm:$0xff] %v2458_v63  ;;  %v2479_v5 = vld [vmem:[#allocation3 + $0x60] sm:$0xff]  ;;  %v2481_v6 = vld [vmem:[#allocation3 + $0x68] sm:$0xff]  ;;  %v2489_v9 = vld [vmem:[#allocation3 + $0xd0] sm:$0xff] }
  0x2b   : > { %555 = vmatpush.msrb.mxu1 %v2389_v38  ;;  %594 = vmatpush.msrb.mxu3 %v2397_v41  ;;  %3409 = vst [vmem:[#allocation13_spill] sm:$0xff] %v2460_v0  ;;  %v2491_v10 = vld [vmem:[#allocation3 + $0x40] sm:$0xff]  ;;  %v2495_v12 = vld [vmem:[#allocation3 + $0x48] sm:$0xff]  ;;  %v2497_v13 = vld [vmem:[#allocation3 + $0x78] sm:$0xff] }
  0x2c   : > { %536 = vmatpush.msrb.mxu0 %v2399_v42  ;;  %574 = vmatpush.msrb.mxu2 %v2435_v55  ;;  %3410 = vst [vmem:[#allocation14_spill] sm:$0xff] %v2462_v1  ;;  %v2502_v14 = vld [vmem:[#allocation3 + $0xb0] sm:$0xff] }
  0x2d   : > { %290 = vperm.xlu1 %1926, %v265_v7   ;;  %287 = vperm.xlu0 %1925, %v264_v8   ;;  %3411 = vst [vmem:[#allocation15_spill] sm:$0xff] %v2468_v3  ;;  %v2483_v7 = vld [vmem:[#allocation3 + $0xf0] sm:$0xff]  ;;  %v2487_v8 = vld [vmem:[#allocation3 + $0x98] sm:$0xff] }
  0x2e   : > { %556 = vmatpush.msrb.mxu1 %v2401_v43  ;;  %595 = vmatpush.msrb.mxu3 %v2407_v45  ;;  %3412 = vst [vmem:[#allocation16_spill] sm:$0xff] %v2479_v5  ;;  %v2508_v36 = vld [vmem:[#allocation3 + $0x90] sm:$0xff] }
  0x2f   : > { %537 = vmatpush.msrb.mxu0 %v2419_v49  ;;  %575 = vmatpush.msrb.mxu2 %v2453_v62  ;;  %3413 = vst [vmem:[#allocation17_spill] sm:$0xff] %v2481_v6 }
  0x30   : > { %557 = vmatpush.msrb.mxu1 %v2421_v50  ;;  %596 = vmatpush.msrb.mxu3 %v2427_v52  ;;  %3414 = vst [vmem:[#allocation18_spill] sm:$0xff] %v2487_v8 }
  0x31   : > { %538 = vmatpush.msrb.mxu0 %v2429_v53  ;;  %576 = vmatpush.msrb.mxu2 %v2466_v2  ;;  %3415 = vst [vmem:[#allocation19_spill] sm:$0xff] %v2489_v9 }
  0x32   : > { %558 = vmatpush.msrb.mxu1 %v2431_v54  ;;  %597 = vmatpush.msrb.mxu3 %v2437_v56  ;;  %3416 = vst [vmem:[#allocation20_spill] sm:$0xff] %v2491_v10 }
  0x33   : > { %539 = vmatpush.msrb.mxu0 %v2449_v60  ;;  %577 = vmatpush.msrb.mxu2 %v2483_v7  ;;  %3417 = vst [vmem:[#allocation21_spill] sm:$0xff] %v2495_v12 }
  0x34   : > { %559 = vmatpush.msrb.mxu1 %v2451_v61  ;;  %598 = vmatpush.msrb.mxu3 %v2458_v63  ;;  %3418 = vst [vmem:[#allocation22_spill] sm:$0xff] %v2497_v13 }
  0x35   : > { %540 = vmatpush.msrb.mxu0 %v2460_v0  ;;  %3419 = vst [vmem:[#allocation23_spill] sm:$0xff] %v2502_v14  ;;  %578 = vmatpush.msrb.mxu2 %v2489_v9 }
  0x36   : > { %560 = vmatpush.msrb.mxu1 %v2462_v1  ;;  %599 = vmatpush.msrb.mxu3 %v2468_v3  ;;  %3420 = vst [vmem:[#allocation24_spill] sm:$0xff] %v2508_v36 }
  0x37   : > { %541 = vmatpush.msrb.mxu0 %v2479_v5  ;;  %579 = vmatpush.msrb.mxu2 %v2502_v14 }
  0x38   : > { %561 = vmatpush.msrb.mxu1 %v2481_v6  ;;  %600 = vmatpush.msrb.mxu3 %v2487_v8 }
  0x39   : > { %542 = vmatpush.msrb.mxu0 %v2491_v10  ;;  %580 = vmatpush.msrb.mxu2 %v2508_v36 }
  0x3a   : > { %562 = vmatpush.msrb.mxu1 %v2495_v12  ;;  %601 = vmatpush.msrb.mxu3 %v2497_v13 }
  0x78   : > { %v282_v16 = vpop.permute.xlu2 %281 }
  0x79   : > { %vm296_vm5 = vcmp.eq.s32.totalorder %v282_v16, %v2393_v40  ;;  %v2537_v16 = vld [vmem:[#allocation3 + $0x18] sm:$0xff] }
  0x7a   : > { %3429 = vst [vmem:[#allocation33_spill] sm:$0xff] %v2537_v16 }
  0x8f   : > { %v270_v46 = vpop.permute.xlu0 %269  ;;  %v276_v59 = vpop.permute.xlu1 %275 }
  0x90   : > { %vm292_vm1 = vcmp.eq.s32.totalorder %v270_v46, %v2393_v40  ;;  %vm294_vm3 = vcmp.eq.s32.totalorder %v276_v59, %v2393_v40  ;;  %v2514_v46 = vld [vmem:[#allocation3 + $0x20] sm:$0xff] }
  0x91   : > { %v300_v48 = vsel %vm292_vm1, 1.0, %v3306_v47  ;;  %v302_v4 = vsel %vm294_vm3, 1.0, %v3306_v47  ;;  %3421 = vst [vmem:[#allocation25_spill] sm:$0xff] %v2514_v46  ;;  %543 = vmatpush.msrb.mxu0 %v2514_v46  ;;  %v2525_v59 = vld [vmem:[#allocation3] sm:$0xff]  ;;  %v304_v46 = vsel %vm296_vm5, 1.0, %v3306_v47 }
  0x92   : > { %1834 = vmatmul.msk.f32.vlgmr.msra.gmra.mxu0 %vm308_vm0, %v300_v48  ;;  %1842 = vmatmul.msk.f32.vlgmr.msra.gmra.mxu1 %vm308_vm0, %v300_v48  ;;  %3425 = vst [vmem:[#allocation29_spill] sm:$0xff] %v2525_v59 }
  0x93   : > { %1850 = vmatmul.msk.f32.vlgmr.msra.gmra.mxu2 %vm308_vm0, %v300_v48  ;;  %1858 = vmatmul.msk.f32.vlgmr.msra.gmra.mxu3 %vm308_vm0, %v300_v48  ;;  %v2516_v48 = vld [vmem:[#allocation3 + $0x28] sm:$0xff] }
  0x94   : > { %3422 = vst [vmem:[#allocation26_spill] sm:$0xff] %v2516_v48  ;;  %563 = vmatpush.msrb.mxu1 %v2516_v48  ;;  %544 = vmatpush.msrb.mxu0 %v2525_v59  ;;  %v2544_v48 = vld [vmem:[#allocation3 + $0x30] sm:$0xff]  ;;  %v285_v59 = vpop.permute.xlu2 %284 }
  0x95   : > { %3430 = vst [vmem:[#allocation34_spill] sm:$0xff] %v2544_v48  ;;  %vm297_vm6 = vcmp.eq.s32.totalorder %v285_v59, %v2393_v40 }
  0x96   : > { %680 = vmatpush.msra.mxu0 %v2330_v17 }
  0x97   : > { %v273_v57 = vpop.permute.xlu0 %272  ;;  %v279_v11 = vpop.permute.xlu1 %278 }
  0x98   : > { %vm293_vm2 = vcmp.eq.s32.totalorder %v273_v57, %v2393_v40  ;;  %vm295_vm4 = vcmp.eq.s32.totalorder %v279_v11, %v2393_v40  ;;  %v2518_v57 = vld [vmem:[#allocation3 + $0x70] sm:$0xff]  ;;  %v2531_v11 = vld [vmem:[#allocation3 + $0x8] sm:$0xff]  ;;  %681 = vmatpush.msra.mxu0 %v2334_v19 }
  0x99   : > { %v301_v58 = vsel %vm293_vm2, 1.0, %v3306_v47  ;;  %v303_v15 = vsel %vm295_vm4, 1.0, %v3306_v47  ;;  %3423 = vst [vmem:[#allocation27_spill] sm:$0xff] %v2518_v57  ;;  %581 = vmatpush.msrb.mxu2 %v2518_v57  ;;  %564 = vmatpush.msrb.mxu1 %v2531_v11  ;;  %v2552_v47 = vld [vmem:[#allocation3 + $0x10] sm:$0xff] }
  0x9a   : > { %1835 = vmatmul.msk.f32.gmra.mxu0 %vm308_vm0, %v301_v58  ;;  %1843 = vmatmul.msk.f32.gmra.mxu1 %vm308_vm0, %v301_v58  ;;  %3427 = vst [vmem:[#allocation31_spill] sm:$0xff] %v2531_v11 }
  0x9b   : > { %1851 = vmatmul.msk.f32.gmra.mxu2 %vm308_vm0, %v301_v58  ;;  %1859 = vmatmul.msk.f32.gmra.mxu3 %vm308_vm0, %v301_v58  ;;  %v2523_v58 = vld [vmem:[#allocation3 + $0x58] sm:$0xff]  ;;  %3431 = vst [vmem:[#allocation35_spill] sm:$0xff] %v2552_v47 }
  0x9c   : > { %3424 = vst [vmem:[#allocation28_spill] sm:$0xff] %v2523_v58  ;;  %602 = vmatpush.msrb.mxu3 %v2523_v58  ;;  %700 = vmatpush.msra.mxu1 %v2332_v18 }
  0x9d   : > { %682 = vmatpush.msra.mxu0 %v2345_v22 }
  0x9e   : > { %701 = vmatpush.msra.mxu1 %v2338_v20 }
  0x9f   : > { %683 = vmatpush.msra.mxu0 %v2353_v25  ;;  %v288_v59 = vpop.permute.xlu0 %287 }
  0xa0   : > { %702 = vmatpush.msra.mxu1 %v2347_v23  ;;  %vm298_vm7 = vcmp.eq.s32.totalorder %v288_v59, %v2393_v40  ;;  %v291_v59 = vpop.permute.xlu1 %290 }
  0xa1   : > { %684 = vmatpush.msra.mxu0 %v2363_v28  ;;  %vm299_vm8 = vcmp.eq.s32.totalorder %v291_v59, %v2393_v40  ;;  %v3433_v40 = vld [vmem:[#allocation25_spill] sm:$0xff]  ;;  %v3434_v59 = vld [vmem:[#allocation26_spill] sm:$0xff] }
  0xa2   : > { %1836 = vmatmul.msk.f32.gmra.mxu0 %vm308_vm0, %v302_v4  ;;  %1844 = vmatmul.msk.f32.gmra.mxu1 %vm308_vm0, %v302_v4 }
  0xa3   : > { %1852 = vmatmul.msk.f32.gmra.mxu2 %vm308_vm0, %v302_v4  ;;  %1860 = vmatmul.msk.f32.gmra.mxu3 %vm308_vm0, %v302_v4  ;;  %v2529_v4 = vld [vmem:[#allocation3 + $0x50] sm:$0xff] }
  0xa4   : > { %3426 = vst [vmem:[#allocation30_spill] sm:$0xff] %v2529_v4  ;;  %582 = vmatpush.msrb.mxu2 %v2529_v4  ;;  %703 = vmatpush.msra.mxu1 %v2355_v26 }
  0xa5   : > { %685 = vmatpush.msra.mxu0 %v2373_v32 }
  0xa6   : > { %583 = vmatpush.msrb.mxu2 %v2544_v48  ;;  %704 = vmatpush.msra.mxu1 %v2365_v29 }
  0xa7   : > { %686 = vmatpush.msra.mxu0 %v2387_v37 }
  0xa8   : > { %584 = vmatpush.msrb.mxu2 %v2552_v47  ;;  %705 = vmatpush.msra.mxu1 %v2375_v33 }
  0xa9   : > { %687 = vmatpush.msra.mxu0 %v2399_v42 }
  0xaa   : > { %1837 = vmatmul.msk.f32.gmra.mxu0 %vm308_vm0, %v303_v15  ;;  %1845 = vmatmul.msk.f32.gmra.mxu1 %vm308_vm0, %v303_v15 }
  0xab   : > { %1853 = vmatmul.msk.f32.gmra.mxu2 %vm308_vm0, %v303_v15  ;;  %1861 = vmatmul.msk.f32.gmra.mxu3 %vm308_vm0, %v303_v15  ;;  %v2533_v15 = vld [vmem:[#allocation3 + $0x38] sm:$0xff] }
  0xac   : > { %3428 = vst [vmem:[#allocation32_spill] sm:$0xff] %v2533_v15  ;;  %603 = vmatpush.msrb.mxu3 %v2533_v15  ;;  %720 = vmatpush.msra.mxu2 %v2367_v30 }
  0xad   : > { %706 = vmatpush.msra.mxu1 %v2389_v38  ;;  %688 = vmatpush.msra.mxu0 %v2419_v49 }
  0xae   : > { %604 = vmatpush.msrb.mxu3 %v2537_v16  ;;  %721 = vmatpush.msra.mxu2 %v2379_v34 }
  0xaf   : > { %707 = vmatpush.msra.mxu1 %v2401_v43  ;;  %689 = vmatpush.msra.mxu0 %v2429_v53 }
  0xb0   : > { %740 = vmatpush.msra.mxu3 %v2342_v21  ;;  %722 = vmatpush.msra.mxu2 %v2391_v39 }
  0xb1   : > { %708 = vmatpush.msra.mxu1 %v2421_v50  ;;  %690 = vmatpush.msra.mxu0 %v2449_v60 }
  0xb2   : > { %1838 = vmatmul.msk.f32.gmra.mxu0 %vm308_vm0, %v304_v46  ;;  %1846 = vmatmul.msk.f32.gmra.mxu1 %vm308_vm0, %v304_v46 }
  0xb3   : > { %1854 = vmatmul.msk.f32.gmra.mxu2 %vm308_vm0, %v304_v46  ;;  %1862 = vmatmul.msk.f32.gmra.mxu3 %vm308_vm0, %v304_v46  ;;  %v3432_v46 = vmov 0.0  }
  0xb4   : > { %741 = vmatpush.msra.mxu3 %v2349_v24  ;;  %v305_v21 = vsel %vm297_vm6, 1.0, %v3432_v46  ;;  %723 = vmatpush.msra.mxu2 %v2405_v44 }
  0xb5   : > { %709 = vmatpush.msra.mxu1 %v2431_v54  ;;  %691 = vmatpush.msra.mxu0 %v2460_v0 }
  0xb6   : > { %742 = vmatpush.msra.mxu3 %v2360_v27  ;;  %724 = vmatpush.msra.mxu2 %v2423_v51 }
  0xb7   : > { %710 = vmatpush.msra.mxu1 %v2451_v61  ;;  %692 = vmatpush.msra.mxu0 %v2479_v5 }
  0xb8   : > { %743 = vmatpush.msra.mxu3 %v2371_v31  ;;  %725 = vmatpush.msra.mxu2 %v2435_v55 }
  0xb9   : > { %711 = vmatpush.msra.mxu1 %v2462_v1  ;;  %693 = vmatpush.msra.mxu0 %v2491_v10 }
  0xba   : > { %1839 = vmatmul.msk.f32.gmra.mxu0 %vm308_vm0, %v305_v21  ;;  %1847 = vmatmul.msk.f32.gmra.mxu1 %vm308_vm0, %v305_v21 }
  0xbb   : > { %1855 = vmatmul.msk.f32.gmra.mxu2 %vm308_vm0, %v305_v21  ;;  %1863 = vmatmul.msk.f32.gmra.mxu3 %vm308_vm0, %v305_v21  ;;  %v306_v21 = vsel %vm298_vm7, 1.0, %v3432_v46 }
  0xbc   : > { %744 = vmatpush.msra.mxu3 %v2381_v35  ;;  %726 = vmatpush.msra.mxu2 %v2453_v62 }
  0xbd   : > { %712 = vmatpush.msra.mxu1 %v2481_v6  ;;  %694 = vmatpush.msra.mxu0 %v3433_v40 }
  0xbe   : > { %745 = vmatpush.msra.mxu3 %v2397_v41  ;;  %727 = vmatpush.msra.mxu2 %v2466_v2 }
  0xbf   : > { %713 = vmatpush.msra.mxu1 %v2495_v12 }
  0xc0   : > { %746 = vmatpush.msra.mxu3 %v2407_v45  ;;  %728 = vmatpush.msra.mxu2 %v2483_v7 }
  0xc1   : > { %714 = vmatpush.msra.mxu1 %v3434_v59 }
  0xc2   : > { %1840 = vmatmul.msk.f32.gmra.mxu0 %vm308_vm0, %v306_v21  ;;  %1848 = vmatmul.msk.f32.gmra.mxu1 %vm308_vm0, %v306_v21 }
  0xc3   : > { %1856 = vmatmul.msk.f32.gmra.mxu2 %vm308_vm0, %v306_v21  ;;  %1864 = vmatmul.msk.f32.gmra.mxu3 %vm308_vm0, %v306_v21  ;;  %v307_v21 = vsel %vm299_vm8, 1.0, %v3432_v46 }
  0xc4   : > { %747 = vmatpush.msra.mxu3 %v2427_v52  ;;  %729 = vmatpush.msra.mxu2 %v2489_v9 }
  0xc5   : > { %715 = vmatpush.msra.mxu1 %v2531_v11 }
  0xc6   : > { %748 = vmatpush.msra.mxu3 %v2437_v56  ;;  %730 = vmatpush.msra.mxu2 %v2502_v14 }
  0xc8   : > { %749 = vmatpush.msra.mxu3 %v2458_v63  ;;  %731 = vmatpush.msra.mxu2 %v2508_v36 }
  0xca   : > { %1841 = vmatmul.msk.f32.gmra.mxu0 %vm308_vm0, %v307_v21  ;;  %1849 = vmatmul.msk.f32.gmra.mxu1 %vm308_vm0, %v307_v21 }
  0xcb   : > { %1857 = vmatmul.msk.f32.gmra.mxu2 %vm308_vm0, %v307_v21  ;;  %1865 = vmatmul.msk.f32.gmra.mxu3 %vm308_vm0, %v307_v21  ;;  %v3436_v21 = vld [vmem:[#allocation9_spill] sm:$0xff] }
  0xcc   : > { %750 = vmatpush.msra.mxu3 %v2468_v3  ;;  %732 = vmatpush.msra.mxu2 %v2518_v57 }
  0xce   : > { %751 = vmatpush.msra.mxu3 %v2487_v8  ;;  %733 = vmatpush.msra.mxu2 %v2529_v4 }
  0xd0   : > { %752 = vmatpush.msra.mxu3 %v2497_v13  ;;  %734 = vmatpush.msra.mxu2 %v2544_v48 }
  0xd2   : > { %545 = vmatmul.f32.vlgmr.msrb.gmra.mxu0 %v3432_v46  ;;  %565 = vmatmul.f32.vlgmr.msrb.gmra.mxu1 %v3432_v46 }
  0xd3   : > { %585 = vmatmul.f32.vlgmr.msrb.gmra.mxu2 %v3432_v46  ;;  %605 = vmatmul.f32.vlgmr.msrb.gmra.mxu3 %v3432_v46  ;;  %v3435_v46 = vld [vmem:[#allocation29_spill] sm:$0xff] }
  0xd4   : > { %753 = vmatpush.msra.mxu3 %v2523_v58  ;;  %695 = vmatpush.msra.mxu0 %v3435_v46 }
  0xd5   : > { %735 = vmatpush.msra.mxu2 %v2552_v47  ;;  %851 = vmatpush.msrb.mxu1 %v2332_v18 }
  0xd6   : > { %754 = vmatpush.msra.mxu3 %v2533_v15  ;;  %831 = vmatpush.msrb.mxu0 %v2330_v17 }
  0xd7   : > { %871 = vmatpush.msrb.mxu2 %v2367_v30  ;;  %852 = vmatpush.msrb.mxu1 %v2338_v20 }
  0xd8   : > { %755 = vmatpush.msra.mxu3 %v2537_v16  ;;  %832 = vmatpush.msrb.mxu0 %v2334_v19 }
  0xd9   : > { %872 = vmatpush.msrb.mxu2 %v2379_v34  ;;  %853 = vmatpush.msrb.mxu1 %v2347_v23 }
  0xda   : > { %891 = vmatpush.msrb.mxu3 %v3436_v21  ;;  %833 = vmatpush.msrb.mxu0 %v2345_v22 }
  0xdb   : > { %873 = vmatpush.msrb.mxu2 %v2391_v39  ;;  %854 = vmatpush.msrb.mxu1 %v2355_v26 }
  0xdc   : > { %892 = vmatpush.msrb.mxu3 %v2349_v24  ;;  %834 = vmatpush.msrb.mxu0 %v2353_v25 }
  0xdd   : > { %874 = vmatpush.msrb.mxu2 %v2405_v44  ;;  %855 = vmatpush.msrb.mxu1 %v2365_v29 }
  0xde   : > { %893 = vmatpush.msrb.mxu3 %v2360_v27  ;;  %835 = vmatpush.msrb.mxu0 %v2363_v28 }
  0xdf   : > { %875 = vmatpush.msrb.mxu2 %v2423_v51  ;;  %856 = vmatpush.msrb.mxu1 %v2375_v33 }
  0xe0   : > { %894 = vmatpush.msrb.mxu3 %v2371_v31  ;;  %836 = vmatpush.msrb.mxu0 %v2373_v32 }
  0xe1   : > { %876 = vmatpush.msrb.mxu2 %v2435_v55  ;;  %857 = vmatpush.msrb.mxu1 %v2389_v38 }
  0xe2   : > { %895 = vmatpush.msrb.mxu3 %v2381_v35  ;;  %837 = vmatpush.msrb.mxu0 %v2387_v37 }
  0xe3   : > { %877 = vmatpush.msrb.mxu2 %v2453_v62  ;;  %858 = vmatpush.msrb.mxu1 %v2401_v43 }
  0xe4   : > { %896 = vmatpush.msrb.mxu3 %v2397_v41  ;;  %838 = vmatpush.msrb.mxu0 %v2399_v42 }
  0xe5   : > { %878 = vmatpush.msrb.mxu2 %v2466_v2  ;;  %859 = vmatpush.msrb.mxu1 %v2421_v50 }
  0xe6   : > { %897 = vmatpush.msrb.mxu3 %v2407_v45  ;;  %839 = vmatpush.msrb.mxu0 %v2419_v49 }
  0xe7   : > { %879 = vmatpush.msrb.mxu2 %v2483_v7  ;;  %860 = vmatpush.msrb.mxu1 %v2431_v54 }
  0xe8   : > { %898 = vmatpush.msrb.mxu3 %v2427_v52  ;;  %840 = vmatpush.msrb.mxu0 %v2429_v53 }
  0xe9   : > { %880 = vmatpush.msrb.mxu2 %v2489_v9  ;;  %861 = vmatpush.msrb.mxu1 %v2451_v61 }
  0xea   : > { %899 = vmatpush.msrb.mxu3 %v2437_v56  ;;  %841 = vmatpush.msrb.mxu0 %v2449_v60 }
  0xeb   : > { %881 = vmatpush.msrb.mxu2 %v2502_v14  ;;  %862 = vmatpush.msrb.mxu1 %v2462_v1 }
  0xec   : > { %900 = vmatpush.msrb.mxu3 %v2458_v63  ;;  %842 = vmatpush.msrb.mxu0 %v2460_v0 }
  0xed   : > { %882 = vmatpush.msrb.mxu2 %v2508_v36  ;;  %863 = vmatpush.msrb.mxu1 %v2481_v6 }
  0xee   : > { %901 = vmatpush.msrb.mxu3 %v2468_v3  ;;  %843 = vmatpush.msrb.mxu0 %v2479_v5 }
  0xef   : > { %883 = vmatpush.msrb.mxu2 %v2518_v57  ;;  %864 = vmatpush.msrb.mxu1 %v2495_v12 }
  0xf0   : > { %902 = vmatpush.msrb.mxu3 %v2487_v8  ;;  %844 = vmatpush.msrb.mxu0 %v2491_v10 }
  0xf1   : > { %884 = vmatpush.msrb.mxu2 %v2529_v4  ;;  %865 = vmatpush.msrb.mxu1 %v3434_v59 }
  0xf2   : > { %903 = vmatpush.msrb.mxu3 %v2497_v13  ;;  %845 = vmatpush.msrb.mxu0 %v3433_v40 }
  0xf3   : > { %885 = vmatpush.msrb.mxu2 %v2544_v48  ;;  %866 = vmatpush.msrb.mxu1 %v2531_v11 }
  0xf4   : > { %904 = vmatpush.msrb.mxu3 %v2523_v58  ;;  %846 = vmatpush.msrb.mxu0 %v3435_v46 }
  0xf5   : > { %886 = vmatpush.msrb.mxu2 %v2552_v47 }
  0xf6   : > { %905 = vmatpush.msrb.mxu3 %v2533_v15 }
  0xf8   : > { %906 = vmatpush.msrb.mxu3 %v2537_v16 }
 0x10f   : > { %v350_v12 = vpop.f32.mrf.mxu0  ;;  %v391_v4 = vpop.f32.mrf.mxu1 }
 0x116   : > { %v432_v10 = vpop.f32.mrf.mxu2  ;;  %v473_v58 = vpop.f32.mrf.mxu3 }
 0x117   : > { %v2704_v13 = vpop.f32.mrf.mxu0  ;;  %v2706_v40 = vpop.f32.mrf.mxu1 }
 0x118   : > { %3437 = vst [vmem:[#allocation9_spill] sm:$0xff] %v2704_v13 }
 0x119   : > { %3438 = vst [vmem:[#allocation36_spill] sm:$0xff] %v2706_v40 }
 0x11e   : > { %v2708_v59 = vpop.f32.mrf.mxu2  ;;  %v2710_v48 = vpop.f32.mrf.mxu3 }
 0x11f   : > { %3439 = vst [vmem:[#allocation37_spill] sm:$0xff] %v2708_v59  ;;  %v2712_v15 = vpop.f32.mrf.mxu0  ;;  %v2714_v46 = vpop.f32.mrf.mxu1 }
 0x120   : > { %3440 = vst [vmem:[#allocation38_spill] sm:$0xff] %v2710_v48 }
 0x121   : > { %3441 = vst [vmem:[#allocation39_spill] sm:$0xff] %v2712_v15 }
 0x122   : > { %3442 = vst [vmem:[#allocation40_spill] sm:$0xff] %v2714_v46 }
 0x126   : > { %v2716_v11 = vpop.f32.mrf.mxu2  ;;  %v2718_v47 = vpop.f32.mrf.mxu3 }
 0x127   : > { %3443 = vst [vmem:[#allocation41_spill] sm:$0xff] %v2716_v11  ;;  %v2720_v16 = vpop.f32.mrf.mxu0  ;;  %v2722_v57 = vpop.f32.mrf.mxu1 }
 0x128   : > { %3444 = vst [vmem:[#allocation42_spill] sm:$0xff] %v2718_v47 }
 0x129   : > { %3445 = vst [vmem:[#allocation43_spill] sm:$0xff] %v2720_v16 }
 0x12a   : > { %3446 = vst [vmem:[#allocation44_spill] sm:$0xff] %v2722_v57 }
 0x12e   : > { %v2724_v6 = vpop.f32.mrf.mxu3  ;;  %v2730_v59 = vpop.f32.mrf.mxu2 }
 0x12f   : > { %3447 = vst [vmem:[#allocation45_spill] sm:$0xff] %v2724_v6  ;;  %v2726_v13 = vpop.f32.mrf.mxu0  ;;  %v2728_v40 = vpop.f32.mrf.mxu1 }
 0x130   : > { %3448 = vst [vmem:[#allocation46_spill] sm:$0xff] %v2726_v13 }
 0x131   : > { %3449 = vst [vmem:[#allocation47_spill] sm:$0xff] %v2728_v40 }
 0x132   : > { %3450 = vst [vmem:[#allocation48_spill] sm:$0xff] %v2730_v59 }
 0x136   : > { %v2732_v48 = vpop.f32.mrf.mxu3  ;;  %v2738_v11 = vpop.f32.mrf.mxu2 }
 0x137   : > { %3451 = vst [vmem:[#allocation49_spill] sm:$0xff] %v2732_v48  ;;  %v2734_v15 = vpop.f32.mrf.mxu0  ;;  %v2736_v46 = vpop.f32.mrf.mxu1 }
 0x138   : > { %3452 = vst [vmem:[#allocation50_spill] sm:$0xff] %v2734_v15 }
 0x139   : > { %3453 = vst [vmem:[#allocation51_spill] sm:$0xff] %v2736_v46 }
 0x13a   : > { %3454 = vst [vmem:[#allocation52_spill] sm:$0xff] %v2738_v11 }
 0x13e   : > { %v2740_v47 = vpop.f32.mrf.mxu3  ;;  %v2746_v6 = vpop.f32.mrf.mxu2 }
 0x13f   : > { %3455 = vst [vmem:[#allocation53_spill] sm:$0xff] %v2740_v47  ;;  %v2742_v16 = vpop.f32.mrf.mxu0  ;;  %v2744_v57 = vpop.f32.mrf.mxu1 }
 0x140   : > { %3456 = vst [vmem:[#allocation54_spill] sm:$0xff] %v2742_v16 }
 0x141   : > { %3457 = vst [vmem:[#allocation55_spill] sm:$0xff] %v2744_v57 }
 0x142   : > { %3458 = vst [vmem:[#allocation56_spill] sm:$0xff] %v2746_v6 }
 0x146   : > { %v2748_v13 = vpop.f32.mrf.mxu3  ;;  %v2754_v48 = vpop.f32.mrf.mxu2 }
 0x147   : > { %3459 = vst [vmem:[#allocation57_spill] sm:$0xff] %v2748_v13  ;;  %v2750_v40 = vpop.f32.mrf.mxu0  ;;  %v2752_v59 = vpop.f32.mrf.mxu1 }
 0x148   : > { %3460 = vst [vmem:[#allocation58_spill] sm:$0xff] %v2750_v40 }
 0x149   : > { %3461 = vst [vmem:[#allocation59_spill] sm:$0xff] %v2752_v59 }
 0x14a   : > { %3462 = vst [vmem:[#allocation60_spill] sm:$0xff] %v2754_v48 }
 0x14e   : > { %v2756_v15 = vpop.f32.mrf.mxu3  ;;  %v2758_v1 = vpop.f32.mrf.mxu2 }
 0x14f   : > { %3463 = vst [vmem:[#allocation61_spill] sm:$0xff] %v2756_v15  ;;  %v546_v46 = vpop.f32.mrf.mxu0  ;;  %v566_v11 = vpop.f32.mrf.mxu1 }
 0x150   : > { %v613_v5 = vadd.f32 %v546_v46, %v350_v12  ;;  %v614_v47 = vadd.f32 %v566_v11, %v391_v4  ;;  %3464 = vst [vmem:[#allocation62_spill] sm:$0xff] %v2758_v1 }
 0x152   : > { %v617_v8 = vsub.f32 0.0, %v613_v5  ;;  %v636_v16 = vsub.f32 0.0, %v614_v47 }
 0x154   : > { %v618_v36 = vmul.f32 1.442695, %v617_v8  ;;  %v637_v57 = vmul.f32 1.442695, %v636_v16 }
 0x156   : > { %1928 = vpow2.f32 %v618_v36  ;;  %v606_v6 = vpop.f32.mrf.mxu3  ;;  %v586_v12 = vpop.f32.mrf.mxu2 }
 0x157   : > { %1930 = vpow2.f32 %v637_v57  ;;  %v616_v13 = vadd.f32 %v606_v6, %v473_v58  ;;  %v615_v4 = vadd.f32 %v586_v12, %v432_v10 }
 0x159   : > { %v656_v40 = vsub.f32 0.0, %v616_v13 }
 0x15b   : > { %v657_v59 = vmul.f32 1.442695, %v656_v40 }
 0x15c   : > { %v1929_v0 = vpop.eup %1928 }
 0x15d   : > { %v1931_v48 = vpop.eup %1930  ;;  %v620_v3 = vadd.f32 1.0, %v1929_v0  ;;  %1932 = vpow2.f32 %v657_v59 }
 0x15e   : > { %v639_v15 = vadd.f32 1.0, %v1931_v48 }
 0x15f   : > { %1934 = vrcp.f32 %v620_v3  ;;  %v632_v13 = vand.u32 2147483648, %v620_v3  ;;  %v630_v0 = vand.u32 2147483647, %v620_v3  ;;  %vm626_vm11 = vweird.f32 %v620_v3 }
 0x160   : > { %1936 = vrcp.f32 %v639_v15  ;;  %v651_v16 = vand.u32 2147483648, %v639_v15  ;;  %v649_v59 = vand.u32 2147483647, %v639_v15  ;;  %vm645_vm12 = vweird.f32 %v639_v15 }
 0x161   : > { %v633_v10 = vor.u32 1.1754944e-38, %v632_v13  ;;  %vm631_vm14 = vcmp.eq.f32.partialorder %v630_v0, 8.507059e+37 }
 0x162   : > { %vm650_vm0 = vcmp.eq.f32.partialorder %v649_v59, 8.507059e+37 }
 0x163   : > { %v1933_v5 = vpop.eup %1932 }
 0x164   : > { %v659_v47 = vadd.f32 1.0, %v1933_v5 }
 0x165   : > { %v1935_v8 = vpop.eup %1934 }
 0x166   : > { %v1937_v36 = vpop.eup %1936  ;;  %v622_v11 = vmul.f32 %v1935_v8, %v620_v3  ;;  %1938 = vrcp.f32 %v659_v47  ;;  %vm627_vm9 = vweird.f32 %v1935_v8  ;;  %vm665_vm2 = vweird.f32 %v659_v47 }
 0x167   : > { %v641_v6 = vmul.f32 %v1937_v36, %v639_v15  ;;  %1940 = vtanh.f32 %v615_v4  ;;  %vm646_vm10 = vweird.f32 %v1937_v36  ;;  %vm628_vm13 = vmor %vm626_vm11, %vm627_vm9  ;;  %v671_v15 = vand.u32 2147483648, %v659_v47 }
 0x168   : > { %v623_v57 = vsub.f32 1.0, %v622_v11  ;;  %vm647_vm15 = vmor %vm645_vm12, %vm646_vm10  ;;  %v652_v11 = vor.u32 1.1754944e-38, %v651_v16 }
 0x169   : > { %v642_v58 = vsub.f32 1.0, %v641_v6  ;;  %v672_v13 = vor.u32 1.1754944e-38, %v671_v15 }
 0x16a   : > { %v624_v40 = vmul.f32 %v1935_v8, %v623_v57 }
 0x16b   : > { %v643_v48 = vmul.f32 %v1937_v36, %v642_v58 }
 0x16c   : > { %v1939_v46 = vpop.eup %1938  ;;  %v625_v1 = vadd.f32 %v1935_v8, %v624_v40 }
 0x16d   : > { %v644_v12 = vadd.f32 %v1937_v36, %v643_v48  ;;  %v661_v5 = vmul.f32 %v1939_v46, %v659_v47  ;;  %v1941_v4 = vpop.eup %1940  ;;  %vm666_vm1 = vweird.f32 %v1939_v46 }
 0x16e   : > { %v629_v14 = vsel %vm628_vm13, %v1935_v8, %v625_v1  ;;  %v669_v1 = vand.u32 2147483647, %v659_v47  ;;  %vm667_vm3 = vmor %vm665_vm2, %vm666_vm1 }
 0x16f   : > { %v634_v6 = vsel %vm631_vm14, %v633_v10, %v629_v14  ;;  %v648_v57 = vsel %vm647_vm15, %v1937_v36, %v644_v12  ;;  %v662_v61 = vsub.f32 1.0, %v661_v5 }
 0x170   : > { %v653_v58 = vsel %vm650_vm0, %v652_v11, %v648_v57  ;;  %v676_v60 = vmul.f32 %v1941_v4, %v634_v6  ;;  %vm670_vm4 = vcmp.eq.f32.partialorder %v669_v1, 8.507059e+37  ;;  %v3494_v6 = vld [vmem:[#allocation37_spill] sm:$0xff] }
 0x171   : > { %v675_v63 = vmul.f32 0.0, %v653_v58  ;;  %v663_v9 = vmul.f32 %v1939_v46, %v662_v61 }
 0x173   : > { %v2760_v40 = vadd.f32 %v676_v60, %v675_v63  ;;  %v664_v3 = vadd.f32 %v1939_v46, %v663_v9  ;;  %v3493_v9 = vld [vmem:[#allocation38_spill] sm:$0xff] }
 0x175   : > { %1942 = vtanh.f32 %v2760_v40  ;;  %v668_v8 = vsel %vm667_vm3, %v1939_v46, %v664_v3 }
 0x176   : > { %v673_v36 = vsel %vm670_vm4, %v672_v13, %v668_v8 }
 0x17b   : > { %v1943_v14 = vpop.eup %1942 }
 0x17c   : > { %v679_v16 = vmul.f32 %v1943_v14, %v673_v36 }
 0x17e   : > { %696 = vmatmul.f32.vlgmr.msra.gmra.mxu0 %v679_v16  ;;  %716 = vmatmul.f32.vlgmr.msra.gmra.mxu1 %v679_v16 }
 0x17f   : > { %736 = vmatmul.f32.vlgmr.msra.gmra.mxu2 %v679_v16  ;;  %756 = vmatmul.f32.vlgmr.msra.gmra.mxu3 %v679_v16 }
 0x180   : > { %982 = vmatpush.msra.mxu0 %v2330_v17  ;;  %1002 = vmatpush.msra.mxu1 %v2332_v18  ;;  %v3465_v17 = vld [vmem:[#allocation19_spill] sm:$0xff]  ;;  %v3466_v18 = vld [vmem:[#allocation12_spill] sm:$0xff] }
 0x181   : > { %1022 = vmatpush.msra.mxu2 %v2367_v30  ;;  %1042 = vmatpush.msra.mxu3 %v3436_v21  ;;  %v3477_v30 = vld [vmem:[#allocation27_spill] sm:$0xff] }
 0x182   : > { %983 = vmatpush.msra.mxu0 %v2334_v19  ;;  %1003 = vmatpush.msra.mxu1 %v2338_v20  ;;  %v3467_v19 = vld [vmem:[#allocation10_spill] sm:$0xff]  ;;  %v3468_v20 = vld [vmem:[#allocation11_spill] sm:$0xff] }
 0x183   : > { %1023 = vmatpush.msra.mxu2 %v2379_v34  ;;  %1043 = vmatpush.msra.mxu3 %v2349_v24  ;;  %v3471_v24 = vld [vmem:[#allocation13_spill] sm:$0xff]  ;;  %v3481_v34 = vld [vmem:[#allocation30_spill] sm:$0xff] }
 0x184   : > { %984 = vmatpush.msra.mxu0 %v2345_v22  ;;  %1004 = vmatpush.msra.mxu1 %v2347_v23  ;;  %v3469_v22 = vld [vmem:[#allocation23_spill] sm:$0xff] }
 0x185   : > { %1024 = vmatpush.msra.mxu2 %v2391_v39  ;;  %1044 = vmatpush.msra.mxu3 %v2360_v27  ;;  %v3470_v23 = vld [vmem:[#allocation15_spill] sm:$0xff]  ;;  %v3474_v27 = vld [vmem:[#allocation18_spill] sm:$0xff] }
 0x186   : > { %985 = vmatpush.msra.mxu0 %v2353_v25  ;;  %1005 = vmatpush.msra.mxu1 %v2355_v26  ;;  %v3472_v25 = vld [vmem:[#allocation14_spill] sm:$0xff]  ;;  %v3473_v26 = vld [vmem:[#allocation24_spill] sm:$0xff] }
 0x187   : > { %1025 = vmatpush.msra.mxu2 %v2405_v44  ;;  %1045 = vmatpush.msra.mxu3 %v2371_v31  ;;  %v3478_v31 = vld [vmem:[#allocation22_spill] sm:$0xff]  ;;  %v3489_v44 = vld [vmem:[#allocation35_spill] sm:$0xff] }
 0x188   : > { %986 = vmatpush.msra.mxu0 %v2363_v28  ;;  %1006 = vmatpush.msra.mxu1 %v2365_v29  ;;  %v3475_v28 = vld [vmem:[#allocation16_spill] sm:$0xff]  ;;  %v3476_v29 = vld [vmem:[#allocation17_spill] sm:$0xff]  ;;  %v3485_v39 = vld [vmem:[#allocation34_spill] sm:$0xff] }
 0x189   : > { %1026 = vmatpush.msra.mxu2 %v2423_v51  ;;  %1046 = vmatpush.msra.mxu3 %v2381_v35  ;;  %v3482_v35 = vld [vmem:[#allocation28_spill] sm:$0xff]  ;;  %v3491_v51 = vld [vmem:[#allocation9_spill] sm:$0xff] }
 0x18a   : > { %987 = vmatpush.msra.mxu0 %v2373_v32  ;;  %1007 = vmatpush.msra.mxu1 %v2375_v33  ;;  %v3479_v32 = vld [vmem:[#allocation20_spill] sm:$0xff]  ;;  %v3480_v33 = vld [vmem:[#allocation21_spill] sm:$0xff] }
 0x18b   : > { %1027 = vmatpush.msra.mxu2 %v2435_v55  ;;  %1047 = vmatpush.msra.mxu3 %v2397_v41  ;;  %v3486_v41 = vld [vmem:[#allocation32_spill] sm:$0xff] }
 0x18c   : > { %988 = vmatpush.msra.mxu0 %v2387_v37  ;;  %1008 = vmatpush.msra.mxu1 %v2389_v38  ;;  %v3483_v37 = vld [vmem:[#allocation25_spill] sm:$0xff]  ;;  %v3484_v38 = vld [vmem:[#allocation26_spill] sm:$0xff] }
 0x18d   : > { %1028 = vmatpush.msra.mxu2 %v2453_v62  ;;  %1048 = vmatpush.msra.mxu3 %v2407_v45  ;;  %v3490_v45 = vld [vmem:[#allocation33_spill] sm:$0xff] }
 0x18e   : > { %989 = vmatpush.msra.mxu0 %v2399_v42  ;;  %1009 = vmatpush.msra.mxu1 %v2401_v43  ;;  %v3487_v42 = vld [vmem:[#allocation29_spill] sm:$0xff]  ;;  %v3488_v43 = vld [vmem:[#allocation31_spill] sm:$0xff] }
 0x18f   : > { %1029 = vmatpush.msra.mxu2 %v2466_v2  ;;  %1049 = vmatpush.msra.mxu3 %v2427_v52 }
 0x190   : > { %990 = vmatpush.msra.mxu0 %v2419_v49  ;;  %1010 = vmatpush.msra.mxu1 %v2421_v50 }
 0x191   : > { %1030 = vmatpush.msra.mxu2 %v2483_v7  ;;  %1050 = vmatpush.msra.mxu3 %v2437_v56 }
 0x192   : > { %991 = vmatpush.msra.mxu0 %v2429_v53  ;;  %1011 = vmatpush.msra.mxu1 %v2431_v54  ;;  %v3492_v53 = vld [vmem:[#allocation36_spill] sm:$0xff] }
 0x193   : > { %1031 = vmatpush.msra.mxu2 %v3465_v17  ;;  %1051 = vmatpush.msra.mxu3 %v3466_v18 }
 0x194   : > { %992 = vmatpush.msra.mxu0 %v3467_v19  ;;  %1012 = vmatpush.msra.mxu1 %v3468_v20 }
 0x195   : > { %1032 = vmatpush.msra.mxu2 %v3469_v22  ;;  %1052 = vmatpush.msra.mxu3 %v3470_v23 }
 0x196   : > { %993 = vmatpush.msra.mxu0 %v3471_v24  ;;  %1013 = vmatpush.msra.mxu1 %v3472_v25 }
 0x197   : > { %1033 = vmatpush.msra.mxu2 %v3473_v26  ;;  %1053 = vmatpush.msra.mxu3 %v3474_v27 }
 0x198   : > { %994 = vmatpush.msra.mxu0 %v3475_v28  ;;  %1014 = vmatpush.msra.mxu1 %v3476_v29 }
 0x199   : > { %1034 = vmatpush.msra.mxu2 %v3477_v30  ;;  %1054 = vmatpush.msra.mxu3 %v3478_v31 }
 0x19a   : > { %995 = vmatpush.msra.mxu0 %v3479_v32  ;;  %1015 = vmatpush.msra.mxu1 %v3480_v33 }
 0x19b   : > { %1035 = vmatpush.msra.mxu2 %v3481_v34  ;;  %1055 = vmatpush.msra.mxu3 %v3482_v35 }
 0x19c   : > { %996 = vmatpush.msra.mxu0 %v3483_v37  ;;  %1016 = vmatpush.msra.mxu1 %v3484_v38 }
 0x19d   : > { %1036 = vmatpush.msra.mxu2 %v3485_v39  ;;  %1056 = vmatpush.msra.mxu3 %v3486_v41 }
 0x19e   : > { %997 = vmatpush.msra.mxu0 %v3487_v42  ;;  %1017 = vmatpush.msra.mxu1 %v3488_v43 }
 0x19f   : > { %1037 = vmatpush.msra.mxu2 %v3489_v44  ;;  %1057 = vmatpush.msra.mxu3 %v3490_v45 }
 0x1fb   : > { %v697_v49 = vpop.f32.mrf.mxu0  ;;  %v717_v50 = vpop.f32.mrf.mxu1 }
 0x1fc   : > { %v764_v52 = vadd.f32 %v697_v49, %v3491_v51  ;;  %v765_v54 = vadd.f32 %v717_v50, %v3492_v53 }
 0x1fe   : > { %v768_v55 = vsub.f32 0.0, %v764_v52  ;;  %v787_v56 = vsub.f32 0.0, %v765_v54 }
 0x200   : > { %v769_v60 = vmul.f32 1.442695, %v768_v55  ;;  %v788_v61 = vmul.f32 1.442695, %v787_v56 }
 0x202   : > { %1944 = vpow2.f32 %v769_v60  ;;  %v757_v63 = vpop.f32.mrf.mxu3  ;;  %v737_v12 = vpop.f32.mrf.mxu2 }
 0x203   : > { %1946 = vpow2.f32 %v788_v61  ;;  %v767_v21 = vadd.f32 %v757_v63, %v3493_v9  ;;  %v766_v57 = vadd.f32 %v737_v12, %v3494_v6  ;;  %v2841_v12 = vld [vmem:[#allocation3 + $0x1f0] sm:$0xff] }
 0x204   : > { %v2853_v6 = vld [vmem:[#allocation3 + $0x1d0] sm:$0xff] }
 0x205   : > { %v807_v47 = vsub.f32 0.0, %v767_v21 }
 0x207   : > { %v808_v0 = vmul.f32 1.442695, %v807_v47 }
 0x208   : > { %v1945_v48 = vpop.eup %1944 }
 0x209   : > { %v1947_v59 = vpop.eup %1946  ;;  %v771_v46 = vadd.f32 1.0, %v1945_v48  ;;  %1948 = vpow2.f32 %v808_v0 }
 0x20a   : > { %v790_v10 = vadd.f32 1.0, %v1947_v59 }
 0x20b   : > { %1950 = vrcp.f32 %v771_v46  ;;  %v783_v13 = vand.u32 2147483648, %v771_v46  ;;  %v781_v16 = vand.u32 2147483647, %v771_v46  ;;  %vm777_vm7 = vweird.f32 %v771_v46 }
 0x20c   : > { %1952 = vrcp.f32 %v790_v10  ;;  %v802_v14 = vand.u32 2147483648, %v790_v10  ;;  %v800_v19 = vand.u32 2147483647, %v790_v10  ;;  %vm796_vm8 = vweird.f32 %v790_v10 }
 0x20d   : > { %v784_v24 = vor.u32 1.1754944e-38, %v783_v13  ;;  %vm782_vm11 = vcmp.eq.f32.partialorder %v781_v16, 8.507059e+37  ;;  %v2874_v13 = vld [vmem:[#allocation3 + $0x188] sm:$0xff]  ;;  %v2883_v16 = vld [vmem:[#allocation3 + $0x160] sm:$0xff] }
 0x20e   : > { %v803_v29 = vor.u32 1.1754944e-38, %v802_v14  ;;  %vm801_vm12 = vcmp.eq.f32.partialorder %v800_v19, 8.507059e+37  ;;  %v2877_v14 = vld [vmem:[#allocation3 + $0x190] sm:$0xff] }
 0x20f   : > { %v1949_v5 = vpop.eup %1948  ;;  %v2889_v19 = vld [vmem:[#allocation3 + $0x170] sm:$0xff] }
 0x210   : > { %v810_v11 = vadd.f32 1.0, %v1949_v5  ;;  %v2844_v5 = vld [vmem:[#allocation3 + $0x1f8] sm:$0xff] }
 0x211   : > { %v1951_v4 = vpop.eup %1950 }
 0x212   : > { %v1953_v58 = vpop.eup %1952  ;;  %v773_v3 = vmul.f32 %v1951_v4, %v771_v46  ;;  %1954 = vrcp.f32 %v810_v11  ;;  %vm778_vm5 = vweird.f32 %v1951_v4  ;;  %v822_v9 = vand.u32 2147483648, %v810_v11 }
 0x213   : > { %v792_v15 = vmul.f32 %v1953_v58, %v790_v10  ;;  %1956 = vtanh.f32 %v766_v57  ;;  %vm797_vm6 = vweird.f32 %v1953_v58  ;;  %vm779_vm9 = vmor %vm777_vm7, %vm778_vm5  ;;  %vm816_vm14 = vweird.f32 %v810_v11  ;;  %v2838_v10 = vld [vmem:[#allocation3 + $0x1e8] sm:$0xff]  ;;  %v2856_v57 = vld [vmem:[#allocation3 + $0x1d8] sm:$0xff] }
 0x214   : > { %v774_v1 = vsub.f32 1.0, %v773_v3  ;;  %vm798_vm10 = vmor %vm796_vm8, %vm797_vm6  ;;  %v820_v21 = vand.u32 2147483647, %v810_v11  ;;  %v823_v0 = vor.u32 1.1754944e-38, %v822_v9  ;;  %v2862_v3 = vld [vmem:[#allocation3 + $0x1a8] sm:$0xff]  ;;  %v2954_v9 = vld [vmem:[#allocation3 + $0xb8] sm:$0xff] }
 0x215   : > { %v793_v8 = vsub.f32 1.0, %v792_v15  ;;  %v2865_v15 = vld [vmem:[#allocation3 + $0x1b0] sm:$0xff]  ;;  %3498 = vst [vmem:[#allocation11_spill] sm:$0xff] %v2954_v9 }
 0x216   : > { %v775_v36 = vmul.f32 %v1951_v4, %v774_v1  ;;  %vm821_vm0 = vcmp.eq.f32.partialorder %v820_v21, 8.507059e+37  ;;  %v2868_v1 = vld [vmem:[#allocation3 + $0x1b8] sm:$0xff]  ;;  %v2957_v21 = vld [vmem:[#allocation3 + $0x80] sm:$0xff] }
 0x217   : > { %v794_v18 = vmul.f32 %v1953_v58, %v793_v8  ;;  %v2871_v8 = vld [vmem:[#allocation3 + $0x180] sm:$0xff]  ;;  %3499 = vst [vmem:[#allocation23_spill] sm:$0xff] %v2957_v21 }
 0x218   : > { %v1955_v20 = vpop.eup %1954  ;;  %v776_v23 = vadd.f32 %v1951_v4, %v775_v36  ;;  %v2880_v36 = vld [vmem:[#allocation3 + $0x198] sm:$0xff] }
 0x219   : > { %v795_v25 = vadd.f32 %v1953_v58, %v794_v18  ;;  %v812_v28 = vmul.f32 %v1955_v20, %v810_v11  ;;  %v1957_v50 = vpop.eup %1956  ;;  %vm817_vm13 = vweird.f32 %v1955_v20  ;;  %v2847_v11 = vld [vmem:[#allocation3 + $0x1c0] sm:$0xff]  ;;  %v2886_v18 = vld [vmem:[#allocation3 + $0x168] sm:$0xff] }
 0x21a   : > { %v780_v49 = vsel %vm779_vm9, %v1951_v4, %v776_v23  ;;  %vm818_vm15 = vmor %vm816_vm14, %vm817_vm13  ;;  %v2850_v4 = vld [vmem:[#allocation3 + $0x1c8] sm:$0xff]  ;;  %v2895_v23 = vld [vmem:[#allocation3 + $0x140] sm:$0xff] }
 0x21b   : > { %v785_v51 = vsel %vm782_vm11, %v784_v24, %v780_v49  ;;  %v799_v52 = vsel %vm798_vm10, %v1953_v58, %v795_v25  ;;  %v813_v53 = vsub.f32 1.0, %v812_v28  ;;  %v2859_v58 = vld [vmem:[#allocation3 + $0x1a0] sm:$0xff]  ;;  %v2898_v24 = vld [vmem:[#allocation3 + $0x148] sm:$0xff]  ;;  %v2901_v25 = vld [vmem:[#allocation3 + $0x150] sm:$0xff] }
 0x21c   : > { %v804_v54 = vsel %vm801_vm12, %v803_v29, %v799_v52  ;;  %v827_v55 = vmul.f32 %v1957_v50, %v785_v51  ;;  %v2904_v28 = vld [vmem:[#allocation3 + $0x158] sm:$0xff]  ;;  %v2907_v29 = vld [vmem:[#allocation3 + $0x120] sm:$0xff]  ;;  %v2910_v49 = vld [vmem:[#allocation3 + $0x128] sm:$0xff] }
 0x21d   : > { %v826_v56 = vmul.f32 %v804_v54, %v2760_v40  ;;  %v814_v60 = vmul.f32 %v1955_v20, %v813_v53  ;;  %v2835_v40 = vld [vmem:[#allocation3 + $0x1e0] sm:$0xff]  ;;  %v2914_v50 = vld [vmem:[#allocation3 + $0x138] sm:$0xff]  ;;  %v2920_v52 = vld [vmem:[#allocation3 + $0x108] sm:$0xff] }
 0x21e   : > { %v2917_v51 = vld [vmem:[#allocation3 + $0x100] sm:$0xff]  ;;  %v2924_v53 = vld [vmem:[#allocation3 + $0x118] sm:$0xff] }
 0x21f   : > { %v2832_v61 = vadd.f32 %v827_v55, %v826_v56  ;;  %v815_v63 = vadd.f32 %v1955_v20, %v814_v60  ;;  %v2927_v54 = vld [vmem:[#allocation3 + $0xe0] sm:$0xff]  ;;  %v2934_v55 = vld [vmem:[#allocation3 + $0xf8] sm:$0xff] }
 0x220   : > { %v2937_v56 = vld [vmem:[#allocation3 + $0xc0] sm:$0xff]  ;;  %v2944_v60 = vld [vmem:[#allocation3 + $0xd8] sm:$0xff] }
 0x221   : > { %1958 = vtanh.f32 %v2832_v61  ;;  %v819_v47 = vsel %vm818_vm15, %v1955_v20, %v815_v63  ;;  %v2892_v20 = vld [vmem:[#allocation3 + $0x178] sm:$0xff]  ;;  %3495 = vst [vmem:[#allocation19_spill] sm:$0xff] %v2944_v60  ;;  %v2947_v63 = vld [vmem:[#allocation3 + $0xa0] sm:$0xff] }
 0x222   : > { %v824_v59 = vsel %vm821_vm0, %v823_v0, %v819_v47  ;;  %3496 = vst [vmem:[#allocation12_spill] sm:$0xff] %v2947_v63  ;;  %v2965_v47 = vld [vmem:[#allocation3 + $0x60] sm:$0xff] }
 0x223   : > { %3501 = vst [vmem:[#allocation13_spill] sm:$0xff] %v2965_v47 }
 0x227   : > { %v1959_v48 = vpop.eup %1958 }
 0x228   : > { %v830_v46 = vmul.f32 %v1959_v48, %v824_v59 }
 0x22a   : > { %847 = vmatmul.f32.vlgmr.msrb.gmra.mxu0 %v830_v46  ;;  %867 = vmatmul.f32.vlgmr.msrb.gmra.mxu1 %v830_v46 }
 0x22b   : > { %887 = vmatmul.f32.vlgmr.msrb.gmra.mxu2 %v830_v46  ;;  %907 = vmatmul.f32.vlgmr.msrb.gmra.mxu3 %v830_v46 }
 0x22c   : > { %1133 = vmatpush.msrb.mxu0 %v2835_v40  ;;  %1153 = vmatpush.msrb.mxu1 %v2838_v10 }
 0x22d   : > { %1173 = vmatpush.msrb.mxu2 %v2841_v12  ;;  %1193 = vmatpush.msrb.mxu3 %v2844_v5 }
 0x22e   : > { %1134 = vmatpush.msrb.mxu0 %v2847_v11  ;;  %1154 = vmatpush.msrb.mxu1 %v2850_v4 }
 0x22f   : > { %1174 = vmatpush.msrb.mxu2 %v2853_v6  ;;  %1194 = vmatpush.msrb.mxu3 %v2856_v57 }
 0x230   : > { %1135 = vmatpush.msrb.mxu0 %v2859_v58  ;;  %1155 = vmatpush.msrb.mxu1 %v2862_v3 }
 0x231   : > { %1175 = vmatpush.msrb.mxu2 %v2865_v15  ;;  %1195 = vmatpush.msrb.mxu3 %v2868_v1 }
 0x232   : > { %1136 = vmatpush.msrb.mxu0 %v2871_v8  ;;  %1156 = vmatpush.msrb.mxu1 %v2874_v13 }
 0x233   : > { %1176 = vmatpush.msrb.mxu2 %v2877_v14  ;;  %1196 = vmatpush.msrb.mxu3 %v2880_v36 }
 0x234   : > { %1137 = vmatpush.msrb.mxu0 %v2883_v16  ;;  %1157 = vmatpush.msrb.mxu1 %v2886_v18 }
 0x235   : > { %1177 = vmatpush.msrb.mxu2 %v2889_v19  ;;  %1197 = vmatpush.msrb.mxu3 %v2892_v20 }
 0x236   : > { %1138 = vmatpush.msrb.mxu0 %v2895_v23  ;;  %1158 = vmatpush.msrb.mxu1 %v2898_v24 }
 0x237   : > { %1178 = vmatpush.msrb.mxu2 %v2901_v25  ;;  %1198 = vmatpush.msrb.mxu3 %v2904_v28 }
 0x238   : > { %1139 = vmatpush.msrb.mxu0 %v2907_v29  ;;  %1159 = vmatpush.msrb.mxu1 %v2910_v49 }
 0x239   : > { %1179 = vmatpush.msrb.mxu2 %v2453_v62  ;;  %1199 = vmatpush.msrb.mxu3 %v2914_v50  ;;  %v2930_v62 = vld [vmem:[#allocation3 + $0xe8] sm:$0xff] }
 0x23a   : > { %1140 = vmatpush.msrb.mxu0 %v2917_v51  ;;  %1160 = vmatpush.msrb.mxu1 %v2920_v52 }
 0x23b   : > { %1180 = vmatpush.msrb.mxu2 %v2466_v2  ;;  %1200 = vmatpush.msrb.mxu3 %v2924_v53  ;;  %v2940_v2 = vld [vmem:[#allocation3 + $0xc8] sm:$0xff] }
 0x23c   : > { %1141 = vmatpush.msrb.mxu0 %v2927_v54  ;;  %1161 = vmatpush.msrb.mxu1 %v2930_v62 }
 0x23d   : > { %1181 = vmatpush.msrb.mxu2 %v2483_v7  ;;  %1201 = vmatpush.msrb.mxu3 %v2934_v55  ;;  %v2950_v7 = vld [vmem:[#allocation3 + $0xa8] sm:$0xff] }
 0x23e   : > { %1142 = vmatpush.msrb.mxu0 %v2937_v56  ;;  %1162 = vmatpush.msrb.mxu1 %v2940_v2  ;;  %3497 = vst [vmem:[#allocation10_spill] sm:$0xff] %v2950_v7 }
 0x23f   : > { %1182 = vmatpush.msrb.mxu2 %v3465_v17  ;;  %1202 = vmatpush.msrb.mxu3 %v2944_v60  ;;  %v2960_v17 = vld [vmem:[#allocation3 + $0x88] sm:$0xff] }
 0x240   : > { %1143 = vmatpush.msrb.mxu0 %v2947_v63  ;;  %1163 = vmatpush.msrb.mxu1 %v2950_v7  ;;  %3500 = vst [vmem:[#allocation15_spill] sm:$0xff] %v2960_v17 }
 0x241   : > { %1183 = vmatpush.msrb.mxu2 %v3469_v22  ;;  %1203 = vmatpush.msrb.mxu3 %v2954_v9  ;;  %v2968_v22 = vld [vmem:[#allocation3 + $0x68] sm:$0xff] }
 0x242   : > { %1144 = vmatpush.msrb.mxu0 %v2957_v21  ;;  %1164 = vmatpush.msrb.mxu1 %v2960_v17  ;;  %3502 = vst [vmem:[#allocation14_spill] sm:$0xff] %v2968_v22 }
 0x243   : > { %1184 = vmatpush.msrb.mxu2 %v3473_v26  ;;  %1204 = vmatpush.msrb.mxu3 %v3474_v27 }
 0x244   : > { %1145 = vmatpush.msrb.mxu0 %v2965_v47  ;;  %1165 = vmatpush.msrb.mxu1 %v2968_v22 }
 0x245   : > { %1185 = vmatpush.msrb.mxu2 %v3477_v30  ;;  %1205 = vmatpush.msrb.mxu3 %v3478_v31  ;;  %v3503_v30 = vld [vmem:[#allocation39_spill] sm:$0xff] }
 0x246   : > { %1146 = vmatpush.msrb.mxu0 %v3479_v32  ;;  %1166 = vmatpush.msrb.mxu1 %v3480_v33  ;;  %v3504_v32 = vld [vmem:[#allocation40_spill] sm:$0xff] }
 0x247   : > { %1186 = vmatpush.msrb.mxu2 %v3481_v34  ;;  %1206 = vmatpush.msrb.mxu3 %v3482_v35 }
 0x248   : > { %1147 = vmatpush.msrb.mxu0 %v3483_v37  ;;  %1167 = vmatpush.msrb.mxu1 %v3484_v38 }
 0x249   : > { %1187 = vmatpush.msrb.mxu2 %v3485_v39  ;;  %1207 = vmatpush.msrb.mxu3 %v3486_v41  ;;  %v3505_v41 = vld [vmem:[#allocation42_spill] sm:$0xff] }
 0x24a   : > { %1148 = vmatpush.msrb.mxu0 %v3487_v42  ;;  %1168 = vmatpush.msrb.mxu1 %v3488_v43 }
 0x24b   : > { %1188 = vmatpush.msrb.mxu2 %v3489_v44  ;;  %1208 = vmatpush.msrb.mxu3 %v3490_v45 }
 0x2a7   : > { %v848_v26 = vpop.f32.mrf.mxu0  ;;  %v868_v27 = vpop.f32.mrf.mxu1 }
 0x2a8   : > { %v915_v31 = vadd.f32 %v848_v26, %v3503_v30  ;;  %v916_v33 = vadd.f32 %v868_v27, %v3504_v32 }
 0x2aa   : > { %v919_v34 = vsub.f32 0.0, %v915_v31  ;;  %v938_v35 = vsub.f32 0.0, %v916_v33  ;;  %v3506_v31 = vld [vmem:[#allocation41_spill] sm:$0xff] }
 0x2ac   : > { %v920_v37 = vmul.f32 1.442695, %v919_v34  ;;  %v939_v38 = vmul.f32 1.442695, %v938_v35 }
 0x2ae   : > { %1960 = vpow2.f32 %v920_v37  ;;  %v908_v39 = vpop.f32.mrf.mxu3  ;;  %v888_v46 = vpop.f32.mrf.mxu2 }
 0x2af   : > { %1962 = vpow2.f32 %v939_v38  ;;  %v918_v42 = vadd.f32 %v908_v39, %v3505_v41  ;;  %v917_v32 = vadd.f32 %v888_v46, %v3506_v31 }
 0x2b1   : > { %v958_v43 = vsub.f32 0.0, %v918_v42 }
 0x2b3   : > { %v959_v0 = vmul.f32 1.442695, %v958_v43 }
 0x2b4   : > { %v1961_v44 = vpop.eup %1960 }
 0x2b5   : > { %v1963_v48 = vpop.eup %1962  ;;  %v922_v45 = vadd.f32 1.0, %v1961_v44  ;;  %1964 = vpow2.f32 %v959_v0 }
 0x2b6   : > { %v941_v59 = vadd.f32 1.0, %v1963_v48 }
 0x2b7   : > { %1966 = vrcp.f32 %v922_v45  ;;  %v934_v39 = vand.u32 2147483648, %v922_v45  ;;  %v932_v43 = vand.u32 2147483647, %v922_v45  ;;  %vm928_vm3 = vweird.f32 %v922_v45 }
 0x2b8   : > { %1968 = vrcp.f32 %v941_v59  ;;  %v953_v41 = vand.u32 2147483648, %v941_v59  ;;  %v951_v44 = vand.u32 2147483647, %v941_v59  ;;  %vm947_vm4 = vweird.f32 %v941_v59 }
 0x2b9   : > { %v935_v46 = vor.u32 1.1754944e-38, %v934_v39  ;;  %vm933_vm7 = vcmp.eq.f32.partialorder %v932_v43, 8.507059e+37 }
 0x2ba   : > { %vm952_vm8 = vcmp.eq.f32.partialorder %v951_v44, 8.507059e+37  ;;  %v3510_v44 = vld [vmem:[#allocation23_spill] sm:$0xff] }
 0x2bb   : > { %v1965_v26 = vpop.eup %1964 }
 0x2bc   : > { %v961_v27 = vadd.f32 1.0, %v1965_v26 }
 0x2bd   : > { %v1967_v30 = vpop.eup %1966 }
 0x2be   : > { %v1969_v33 = vpop.eup %1968  ;;  %v924_v34 = vmul.f32 %v1967_v30, %v922_v45  ;;  %1970 = vrcp.f32 %v961_v27  ;;  %vm929_vm1 = vweird.f32 %v1967_v30  ;;  %v973_v39 = vand.u32 2147483648, %v961_v27 }
 0x2bf   : > { %v943_v35 = vmul.f32 %v1969_v33, %v941_v59  ;;  %1972 = vtanh.f32 %v917_v32  ;;  %vm948_vm2 = vweird.f32 %v1969_v33  ;;  %vm930_vm5 = vmor %vm928_vm3, %vm929_vm1  ;;  %vm967_vm10 = vweird.f32 %v961_v27 }
 0x2c0   : > { %v925_v37 = vsub.f32 1.0, %v924_v34  ;;  %vm949_vm6 = vmor %vm947_vm4, %vm948_vm2  ;;  %v954_v34 = vor.u32 1.1754944e-38, %v953_v41  ;;  %v974_v43 = vor.u32 1.1754944e-38, %v973_v39  ;;  %v3075_v39 = vld [vmem:[#allocation3 + $0x20] sm:$0xff] }
 0x2c1   : > { %v944_v38 = vsub.f32 1.0, %v943_v35  ;;  %3522 = vst [vmem:[#allocation25_spill] sm:$0xff] %v3075_v39 }
 0x2c2   : > { %v926_v42 = vmul.f32 %v1967_v30, %v925_v37 }
 0x2c3   : > { %v945_v0 = vmul.f32 %v1969_v33, %v944_v38 }
 0x2c4   : > { %v1971_v48 = vpop.eup %1970  ;;  %v927_v26 = vadd.f32 %v1967_v30, %v926_v42 }
 0x2c5   : > { %v946_v31 = vadd.f32 %v1969_v33, %v945_v0  ;;  %v963_v22 = vmul.f32 %v1971_v48, %v961_v27  ;;  %v1973_v32 = vpop.eup %1972  ;;  %vm968_vm9 = vweird.f32 %v1971_v48 }
 0x2c6   : > { %v931_v35 = vsel %vm930_vm5, %v1967_v30, %v927_v26  ;;  %v971_v30 = vand.u32 2147483647, %v961_v27  ;;  %vm969_vm11 = vmor %vm967_vm10, %vm968_vm9  ;;  %v3509_v27 = vld [vmem:[#allocation11_spill] sm:$0xff]  ;;  %v3049_v26 = vld [vmem:[#allocation3 + $0x90] sm:$0xff] }
 0x2c7   : > { %v936_v47 = vsel %vm933_vm7, %v935_v46, %v931_v35  ;;  %v950_v37 = vsel %vm949_vm6, %v1969_v33, %v946_v31  ;;  %v964_v17 = vsub.f32 1.0, %v963_v22  ;;  %3512 = vst [vmem:[#allocation16_spill] sm:$0xff] %v3049_v26  ;;  %v3052_v46 = vld [vmem:[#allocation3 + $0x98] sm:$0xff]  ;;  %v3514_v31 = vld [vmem:[#allocation13_spill] sm:$0xff] }
 0x2c8   : > { %v955_v38 = vsel %vm952_vm8, %v954_v34, %v950_v37  ;;  %v978_v21 = vmul.f32 %v1973_v32, %v936_v47  ;;  %vm972_vm12 = vcmp.eq.f32.partialorder %v971_v30, 8.507059e+37  ;;  %v3043_v47 = vld [vmem:[#allocation3 + $0xb0] sm:$0xff]  ;;  %3513 = vst [vmem:[#allocation17_spill] sm:$0xff] %v3052_v46  ;;  %v3515_v34 = vld [vmem:[#allocation14_spill] sm:$0xff]  ;;  %v3063_v37 = vld [vmem:[#allocation3 + $0x40] sm:$0xff] }
 0x2c9   : > { %v977_v9 = vmul.f32 %v955_v38, %v2832_v61  ;;  %v965_v42 = vmul.f32 %v1971_v48, %v964_v17  ;;  %v3019_v61 = vld [vmem:[#allocation3 + $0x130] sm:$0xff]  ;;  %3508 = vst [vmem:[#allocation18_spill] sm:$0xff] %v3043_v47  ;;  %v3060_v32 = vld [vmem:[#allocation3 + $0x78] sm:$0xff]  ;;  %v3066_v38 = vld [vmem:[#allocation3 + $0x48] sm:$0xff] }
 0x2ca   : > { %v3037_v17 = vld [vmem:[#allocation3 + $0xd0] sm:$0xff]  ;;  %3517 = vst [vmem:[#allocation22_spill] sm:$0xff] %v3060_v32  ;;  %v3078_v30 = vld [vmem:[#allocation3 + $0x28] sm:$0xff] }
 0x2cb   : > { %v2990_v45 = vadd.f32 %v978_v21, %v977_v9  ;;  %v966_v59 = vadd.f32 %v1971_v48, %v965_v42  ;;  %v3025_v9 = vld [vmem:[#allocation3 + $0x110] sm:$0xff]  ;;  %3507 = vst [vmem:[#allocation24_spill] sm:$0xff] %v3037_v17 }
 0x2cc   : > { %v3031_v21 = vld [vmem:[#allocation3 + $0xf0] sm:$0xff]  ;;  %3518 = vst [vmem:[#allocation20_spill] sm:$0xff] %v3063_v37 }
 0x2cd   : > { %1974 = vtanh.f32 %v2990_v45  ;;  %v970_v41 = vsel %vm969_vm11, %v1971_v48, %v966_v59  ;;  %v3511_v48 = vld [vmem:[#allocation15_spill] sm:$0xff]  ;;  %v3057_v35 = vld [vmem:[#allocation3 + $0x70] sm:$0xff]  ;;  %3519 = vst [vmem:[#allocation21_spill] sm:$0xff] %v3066_v38  ;;  %v3072_v59 = vld [vmem:[#allocation3 + $0x58] sm:$0xff] }
 0x2ce   : > { %v975_v22 = vsel %vm972_vm12, %v974_v43, %v970_v41  ;;  %3516 = vst [vmem:[#allocation27_spill] sm:$0xff] %v3057_v35  ;;  %v3069_v42 = vld [vmem:[#allocation3 + $0x50] sm:$0xff]  ;;  %v3084_v43 = vld [vmem:[#allocation3 + $0x38] sm:$0xff] }
 0x2cf   : > { %3520 = vst [vmem:[#allocation30_spill] sm:$0xff] %v3069_v42  ;;  %v3081_v41 = vld [vmem:[#allocation3 + $0x30] sm:$0xff] }
 0x2d0   : > { %3521 = vst [vmem:[#allocation28_spill] sm:$0xff] %v3072_v59 }
 0x2d1   : > { %3523 = vst [vmem:[#allocation26_spill] sm:$0xff] %v3078_v30 }
 0x2d2   : > { %3524 = vst [vmem:[#allocation34_spill] sm:$0xff] %v3081_v41 }
 0x2d3   : > { %v1975_v33 = vpop.eup %1974  ;;  %3525 = vst [vmem:[#allocation32_spill] sm:$0xff] %v3084_v43 }
 0x2d4   : > { %v981_v0 = vmul.f32 %v1975_v33, %v975_v22  ;;  %v3087_v33 = vld [vmem:[#allocation3] sm:$0xff]  ;;  %v3090_v22 = vld [vmem:[#allocation3 + $0x8] sm:$0xff] }
 0x2d5   : > { %3526 = vst [vmem:[#allocation29_spill] sm:$0xff] %v3087_v33 }
 0x2d6   : > { %998 = vmatmul.f32.vlgmr.msra.gmra.mxu0 %v981_v0  ;;  %1018 = vmatmul.f32.vlgmr.msra.gmra.mxu1 %v981_v0  ;;  %3527 = vst [vmem:[#allocation31_spill] sm:$0xff] %v3090_v22 }
 0x2d7   : > { %1038 = vmatmul.f32.vlgmr.msra.gmra.mxu2 %v981_v0  ;;  %1058 = vmatmul.f32.vlgmr.msra.gmra.mxu3 %v981_v0  ;;  %v3093_v0 = vld [vmem:[#allocation3 + $0x10] sm:$0xff] }
 0x2d8   : > { %1284 = vmatpush.msra.mxu0 %v2835_v40  ;;  %1304 = vmatpush.msra.mxu1 %v2838_v10  ;;  %3528 = vst [vmem:[#allocation35_spill] sm:$0xff] %v3093_v0 }
 0x2d9   : > { %1324 = vmatpush.msra.mxu2 %v2841_v12  ;;  %1344 = vmatpush.msra.mxu3 %v2844_v5 }
 0x2da   : > { %1285 = vmatpush.msra.mxu0 %v2847_v11  ;;  %1305 = vmatpush.msra.mxu1 %v2850_v4 }
 0x2db   : > { %1325 = vmatpush.msra.mxu2 %v2853_v6  ;;  %1345 = vmatpush.msra.mxu3 %v2856_v57 }
 0x2dc   : > { %1286 = vmatpush.msra.mxu0 %v2859_v58  ;;  %1306 = vmatpush.msra.mxu1 %v2862_v3 }
 0x2dd   : > { %1326 = vmatpush.msra.mxu2 %v2865_v15  ;;  %1346 = vmatpush.msra.mxu3 %v2868_v1 }
 0x2de   : > { %1287 = vmatpush.msra.mxu0 %v2871_v8  ;;  %1307 = vmatpush.msra.mxu1 %v2874_v13 }
 0x2df   : > { %1327 = vmatpush.msra.mxu2 %v2877_v14  ;;  %1347 = vmatpush.msra.mxu3 %v2880_v36 }
 0x2e0   : > { %1288 = vmatpush.msra.mxu0 %v2883_v16  ;;  %1308 = vmatpush.msra.mxu1 %v2886_v18 }
 0x2e1   : > { %1328 = vmatpush.msra.mxu2 %v2889_v19  ;;  %1348 = vmatpush.msra.mxu3 %v2892_v20 }
 0x2e2   : > { %1289 = vmatpush.msra.mxu0 %v2895_v23  ;;  %1309 = vmatpush.msra.mxu1 %v2898_v24 }
 0x2e3   : > { %1329 = vmatpush.msra.mxu2 %v2901_v25  ;;  %1349 = vmatpush.msra.mxu3 %v2904_v28 }
 0x2e4   : > { %1290 = vmatpush.msra.mxu0 %v2907_v29  ;;  %1310 = vmatpush.msra.mxu1 %v2910_v49 }
 0x2e5   : > { %1330 = vmatpush.msra.mxu2 %v3019_v61  ;;  %1350 = vmatpush.msra.mxu3 %v2914_v50 }
 0x2e6   : > { %1291 = vmatpush.msra.mxu0 %v2917_v51  ;;  %1311 = vmatpush.msra.mxu1 %v2920_v52 }
 0x2e7   : > { %1331 = vmatpush.msra.mxu2 %v3025_v9  ;;  %1351 = vmatpush.msra.mxu3 %v2924_v53 }
 0x2e8   : > { %1292 = vmatpush.msra.mxu0 %v2927_v54  ;;  %1312 = vmatpush.msra.mxu1 %v2930_v62 }
 0x2e9   : > { %1332 = vmatpush.msra.mxu2 %v3031_v21  ;;  %1352 = vmatpush.msra.mxu3 %v2934_v55 }
 0x2ea   : > { %1293 = vmatpush.msra.mxu0 %v2937_v56  ;;  %1313 = vmatpush.msra.mxu1 %v2940_v2 }
 0x2eb   : > { %1333 = vmatpush.msra.mxu2 %v3037_v17  ;;  %1353 = vmatpush.msra.mxu3 %v2944_v60 }
 0x2ec   : > { %1294 = vmatpush.msra.mxu0 %v2947_v63  ;;  %1314 = vmatpush.msra.mxu1 %v2950_v7 }
 0x2ed   : > { %1334 = vmatpush.msra.mxu2 %v3043_v47  ;;  %1354 = vmatpush.msra.mxu3 %v3509_v27 }
 0x2ee   : > { %1295 = vmatpush.msra.mxu0 %v3510_v44  ;;  %1315 = vmatpush.msra.mxu1 %v3511_v48 }
 0x2ef   : > { %1335 = vmatpush.msra.mxu2 %v3049_v26  ;;  %1355 = vmatpush.msra.mxu3 %v3052_v46 }
 0x2f0   : > { %1296 = vmatpush.msra.mxu0 %v3514_v31  ;;  %1316 = vmatpush.msra.mxu1 %v3515_v34  ;;  %v3532_v34 = vld [vmem:[#allocation45_spill] sm:$0xff] }
 0x2f1   : > { %1336 = vmatpush.msra.mxu2 %v3057_v35  ;;  %1356 = vmatpush.msra.mxu3 %v3060_v32 }
 0x2f2   : > { %1297 = vmatpush.msra.mxu0 %v3063_v37  ;;  %1317 = vmatpush.msra.mxu1 %v3066_v38 }
 0x2f3   : > { %1337 = vmatpush.msra.mxu2 %v3069_v42  ;;  %1357 = vmatpush.msra.mxu3 %v3072_v59  ;;  %v3530_v59 = vld [vmem:[#allocation43_spill] sm:$0xff]  ;;  %v3531_v42 = vld [vmem:[#allocation44_spill] sm:$0xff] }
 0x2f4   : > { %1298 = vmatpush.msra.mxu0 %v3075_v39  ;;  %1318 = vmatpush.msra.mxu1 %v3078_v30  ;;  %v3096_v30 = vld [vmem:[#allocation3 + $0x18] sm:$0xff] }
 0x2f5   : > { %1338 = vmatpush.msra.mxu2 %v3081_v41  ;;  %1358 = vmatpush.msra.mxu3 %v3084_v43  ;;  %3529 = vst [vmem:[#allocation33_spill] sm:$0xff] %v3096_v30 }
 0x2f6   : > { %1299 = vmatpush.msra.mxu0 %v3087_v33  ;;  %1319 = vmatpush.msra.mxu1 %v3090_v22 }
 0x2f7   : > { %1339 = vmatpush.msra.mxu2 %v3093_v0  ;;  %1359 = vmatpush.msra.mxu3 %v3096_v30 }
 0x353   : > { %v999_v41 = vpop.f32.mrf.mxu0  ;;  %v1019_v39 = vpop.f32.mrf.mxu1 }
 0x354   : > { %v1066_v43 = vadd.f32 %v999_v41, %v3530_v59  ;;  %v1067_v38 = vadd.f32 %v1019_v39, %v3531_v42 }
 0x356   : > { %v1070_v37 = vsub.f32 0.0, %v1066_v43  ;;  %v1089_v33 = vsub.f32 0.0, %v1067_v38 }
 0x358   : > { %v1071_v32 = vmul.f32 1.442695, %v1070_v37  ;;  %v1090_v35 = vmul.f32 1.442695, %v1089_v33  ;;  %v3533_v37 = vld [vmem:[#allocation48_spill] sm:$0xff] }
 0x35a   : > { %1976 = vpow2.f32 %v1071_v32  ;;  %v1059_v22 = vpop.f32.mrf.mxu3  ;;  %v1039_v59 = vpop.f32.mrf.mxu2 }
 0x35b   : > { %1978 = vpow2.f32 %v1090_v35  ;;  %v1069_v31 = vadd.f32 %v1059_v22, %v3532_v34  ;;  %v1068_v41 = vadd.f32 %v1039_v59, %v3533_v37 }
 0x35d   : > { %v1109_v0 = vsub.f32 0.0, %v1069_v31 }
 0x35f   : > { %v1110_v46 = vmul.f32 1.442695, %v1109_v0 }
 0x360   : > { %v1977_v26 = vpop.eup %1976 }
 0x361   : > { %v1979_v48 = vpop.eup %1978  ;;  %v1073_v30 = vadd.f32 1.0, %v1977_v26  ;;  %1980 = vpow2.f32 %v1110_v46 }
 0x362   : > { %v1092_v44 = vadd.f32 1.0, %v1979_v48 }
 0x363   : > { %1982 = vrcp.f32 %v1073_v30  ;;  %v1085_v33 = vand.u32 2147483648, %v1073_v30  ;;  %v1083_v48 = vand.u32 2147483647, %v1073_v30  ;;  %vm1079_vm15 = vweird.f32 %v1073_v30 }
 0x364   : > { %1984 = vrcp.f32 %v1092_v44  ;;  %v1104_v22 = vand.u32 2147483648, %v1092_v44  ;;  %v1102_v0 = vand.u32 2147483647, %v1092_v44  ;;  %vm1098_vm0 = vweird.f32 %v1092_v44 }
 0x365   : > { %v1086_v59 = vor.u32 1.1754944e-38, %v1085_v33  ;;  %vm1084_vm3 = vcmp.eq.f32.partialorder %v1083_v48, 8.507059e+37 }
 0x366   : > { %vm1103_vm4 = vcmp.eq.f32.partialorder %v1102_v0, 8.507059e+37  ;;  %v3541_v0 = vld [vmem:[#allocation15_spill] sm:$0xff] }
 0x367   : > { %v1981_v42 = vpop.eup %1980 }
 0x368   : > { %v1112_v39 = vadd.f32 1.0, %v1981_v42 }
 0x369   : > { %v1983_v38 = vpop.eup %1982 }
 0x36a   : > { %v1985_v32 = vpop.eup %1984  ;;  %v1075_v43 = vmul.f32 %v1983_v38, %v1073_v30  ;;  %1986 = vrcp.f32 %v1112_v39  ;;  %vm1080_vm13 = vweird.f32 %v1983_v38  ;;  %v1124_v33 = vand.u32 2147483648, %v1112_v39 }
 0x36b   : > { %v1094_v35 = vmul.f32 %v1985_v32, %v1092_v44  ;;  %1988 = vtanh.f32 %v1068_v41  ;;  %vm1099_vm14 = vweird.f32 %v1985_v32  ;;  %vm1081_vm1 = vmor %vm1079_vm15, %vm1080_vm13  ;;  %vm1118_vm6 = vweird.f32 %v1112_v39 }
 0x36c   : > { %v1076_v34 = vsub.f32 1.0, %v1075_v43  ;;  %vm1100_vm2 = vmor %vm1098_vm0, %vm1099_vm14  ;;  %v1105_v43 = vor.u32 1.1754944e-38, %v1104_v22  ;;  %v1125_v48 = vor.u32 1.1754944e-38, %v1124_v33  ;;  %v3552_v33 = vld [vmem:[#allocation25_spill] sm:$0xff] }
 0x36d   : > { %v1095_v31 = vsub.f32 1.0, %v1094_v35 }
 0x36e   : > { %v1077_v26 = vmul.f32 %v1983_v38, %v1076_v34 }
 0x36f   : > { %v1096_v46 = vmul.f32 %v1985_v32, %v1095_v31 }
 0x370   : > { %v1987_v27 = vpop.eup %1986  ;;  %v1078_v42 = vadd.f32 %v1983_v38, %v1077_v26 }
 0x371   : > { %v1097_v37 = vadd.f32 %v1985_v32, %v1096_v46  ;;  %v1114_v47 = vmul.f32 %v1987_v27, %v1112_v39  ;;  %v1989_v41 = vpop.eup %1988  ;;  %vm1119_vm5 = vweird.f32 %v1987_v27 }
 0x372   : > { %v1082_v35 = vsel %vm1081_vm1, %v1983_v38, %v1078_v42  ;;  %v1122_v38 = vand.u32 2147483647, %v1112_v39  ;;  %vm1120_vm7 = vmor %vm1118_vm6, %vm1119_vm5  ;;  %v3540_v39 = vld [vmem:[#allocation23_spill] sm:$0xff]  ;;  %v3542_v42 = vld [vmem:[#allocation16_spill] sm:$0xff] }
 0x373   : > { %v1087_v7 = vsel %vm1084_vm3, %v1086_v59, %v1082_v35  ;;  %v1101_v34 = vsel %vm1100_vm2, %v1985_v32, %v1097_v37  ;;  %v1115_v63 = vsub.f32 1.0, %v1114_v47  ;;  %v3543_v59 = vld [vmem:[#allocation17_spill] sm:$0xff]  ;;  %v3546_v35 = vld [vmem:[#allocation27_spill] sm:$0xff] }
 0x374   : > { %v1106_v31 = vsel %vm1103_vm4, %v1105_v43, %v1101_v34  ;;  %v1129_v60 = vmul.f32 %v1989_v41, %v1087_v7  ;;  %vm1123_vm8 = vcmp.eq.f32.partialorder %v1122_v38, 8.507059e+37  ;;  %v3536_v7 = vld [vmem:[#allocation12_spill] sm:$0xff]  ;;  %v3544_v37 = vld [vmem:[#allocation13_spill] sm:$0xff]  ;;  %v3545_v43 = vld [vmem:[#allocation14_spill] sm:$0xff] }
 0x375   : > { %v1128_v17 = vmul.f32 %v1106_v31, %v2990_v45  ;;  %v1116_v26 = vmul.f32 %v1987_v27, %v1115_v63  ;;  %v3535_v63 = vld [vmem:[#allocation19_spill] sm:$0xff]  ;;  %v3537_v45 = vld [vmem:[#allocation10_spill] sm:$0xff]  ;;  %v3548_v34 = vld [vmem:[#allocation20_spill] sm:$0xff] }
 0x376   : > { %v3547_v41 = vld [vmem:[#allocation22_spill] sm:$0xff]  ;;  %v3549_v31 = vld [vmem:[#allocation21_spill] sm:$0xff] }
 0x377   : > { %v3104_v30 = vadd.f32 %v1129_v60, %v1128_v17  ;;  %v1117_v44 = vadd.f32 %v1987_v27, %v1116_v26  ;;  %v3534_v60 = vld [vmem:[#allocation24_spill] sm:$0xff]  ;;  %v3538_v17 = vld [vmem:[#allocation18_spill] sm:$0xff] }
 0x378   : > { %v3550_v26 = vld [vmem:[#allocation30_spill] sm:$0xff] }
 0x379   : > { %1990 = vtanh.f32 %v3104_v30  ;;  %v1121_v22 = vsel %vm1120_vm7, %v1987_v27, %v1117_v44  ;;  %v3539_v27 = vld [vmem:[#allocation11_spill] sm:$0xff]  ;;  %v3551_v44 = vld [vmem:[#allocation28_spill] sm:$0xff]  ;;  %v3553_v38 = vld [vmem:[#allocation26_spill] sm:$0xff] }
 0x37a   : > { %v1126_v47 = vsel %vm1123_vm8, %v1125_v48, %v1121_v22  ;;  %v3554_v22 = vld [vmem:[#allocation34_spill] sm:$0xff]  ;;  %v3555_v48 = vld [vmem:[#allocation32_spill] sm:$0xff] }
 0x37f   : > { %v1991_v32 = vpop.eup %1990 }
 0x380   : > { %v1132_v46 = vmul.f32 %v1991_v32, %v1126_v47  ;;  %v3556_v32 = vld [vmem:[#allocation29_spill] sm:$0xff]  ;;  %v3557_v47 = vld [vmem:[#allocation31_spill] sm:$0xff] }
 0x382   : > { %1149 = vmatmul.f32.vlgmr.msrb.gmra.mxu0 %v1132_v46  ;;  %1169 = vmatmul.f32.vlgmr.msrb.gmra.mxu1 %v1132_v46 }
 0x383   : > { %1189 = vmatmul.f32.vlgmr.msrb.gmra.mxu2 %v1132_v46  ;;  %1209 = vmatmul.f32.vlgmr.msrb.gmra.mxu3 %v1132_v46  ;;  %v3558_v46 = vld [vmem:[#allocation35_spill] sm:$0xff] }
 0x384   : > { %1435 = vmatpush.msrb.mxu0 %v2835_v40  ;;  %1455 = vmatpush.msrb.mxu1 %v2838_v10 }
 0x385   : > { %1475 = vmatpush.msrb.mxu2 %v2841_v12  ;;  %1495 = vmatpush.msrb.mxu3 %v2844_v5 }
 0x386   : > { %1436 = vmatpush.msrb.mxu0 %v2847_v11  ;;  %1456 = vmatpush.msrb.mxu1 %v2850_v4 }
 0x387   : > { %1476 = vmatpush.msrb.mxu2 %v2853_v6  ;;  %1496 = vmatpush.msrb.mxu3 %v2856_v57 }
 0x388   : > { %1437 = vmatpush.msrb.mxu0 %v2859_v58  ;;  %1457 = vmatpush.msrb.mxu1 %v2862_v3 }
 0x389   : > { %1477 = vmatpush.msrb.mxu2 %v2865_v15  ;;  %1497 = vmatpush.msrb.mxu3 %v2868_v1 }
 0x38a   : > { %1438 = vmatpush.msrb.mxu0 %v2871_v8  ;;  %1458 = vmatpush.msrb.mxu1 %v2874_v13 }
 0x38b   : > { %1478 = vmatpush.msrb.mxu2 %v2877_v14  ;;  %1498 = vmatpush.msrb.mxu3 %v2880_v36 }
 0x38c   : > { %1439 = vmatpush.msrb.mxu0 %v2883_v16  ;;  %1459 = vmatpush.msrb.mxu1 %v2886_v18 }
 0x38d   : > { %1479 = vmatpush.msrb.mxu2 %v2889_v19  ;;  %1499 = vmatpush.msrb.mxu3 %v2892_v20 }
 0x38e   : > { %1440 = vmatpush.msrb.mxu0 %v2895_v23  ;;  %1460 = vmatpush.msrb.mxu1 %v2898_v24 }
 0x38f   : > { %1480 = vmatpush.msrb.mxu2 %v2901_v25  ;;  %1500 = vmatpush.msrb.mxu3 %v2904_v28 }
 0x390   : > { %1441 = vmatpush.msrb.mxu0 %v2907_v29  ;;  %1461 = vmatpush.msrb.mxu1 %v2910_v49 }
 0x391   : > { %1481 = vmatpush.msrb.mxu2 %v3019_v61  ;;  %1501 = vmatpush.msrb.mxu3 %v2914_v50 }
 0x392   : > { %1442 = vmatpush.msrb.mxu0 %v2917_v51  ;;  %1462 = vmatpush.msrb.mxu1 %v2920_v52 }
 0x393   : > { %1482 = vmatpush.msrb.mxu2 %v3025_v9  ;;  %1502 = vmatpush.msrb.mxu3 %v2924_v53 }
 0x394   : > { %1443 = vmatpush.msrb.mxu0 %v2927_v54  ;;  %1463 = vmatpush.msrb.mxu1 %v2930_v62 }
 0x395   : > { %1483 = vmatpush.msrb.mxu2 %v3031_v21  ;;  %1503 = vmatpush.msrb.mxu3 %v2934_v55 }
 0x396   : > { %1444 = vmatpush.msrb.mxu0 %v2937_v56  ;;  %1464 = vmatpush.msrb.mxu1 %v2940_v2 }
 0x397   : > { %1484 = vmatpush.msrb.mxu2 %v3534_v60  ;;  %1504 = vmatpush.msrb.mxu3 %v3535_v63 }
 0x398   : > { %1445 = vmatpush.msrb.mxu0 %v3536_v7  ;;  %1465 = vmatpush.msrb.mxu1 %v3537_v45 }
 0x399   : > { %1485 = vmatpush.msrb.mxu2 %v3538_v17  ;;  %1505 = vmatpush.msrb.mxu3 %v3539_v27 }
 0x39a   : > { %1446 = vmatpush.msrb.mxu0 %v3540_v39  ;;  %1466 = vmatpush.msrb.mxu1 %v3541_v0 }
 0x39b   : > { %1486 = vmatpush.msrb.mxu2 %v3542_v42  ;;  %1506 = vmatpush.msrb.mxu3 %v3543_v59 }
 0x39c   : > { %1447 = vmatpush.msrb.mxu0 %v3544_v37  ;;  %1467 = vmatpush.msrb.mxu1 %v3545_v43 }
 0x39d   : > { %1487 = vmatpush.msrb.mxu2 %v3546_v35  ;;  %1507 = vmatpush.msrb.mxu3 %v3547_v41  ;;  %v3560_v41 = vld [vmem:[#allocation46_spill] sm:$0xff]  ;;  %v3561_v35 = vld [vmem:[#allocation47_spill] sm:$0xff] }
 0x39e   : > { %1448 = vmatpush.msrb.mxu0 %v3548_v34  ;;  %1468 = vmatpush.msrb.mxu1 %v3549_v31  ;;  %v3559_v34 = vld [vmem:[#allocation33_spill] sm:$0xff] }
 0x39f   : > { %1488 = vmatpush.msrb.mxu2 %v3550_v26  ;;  %1508 = vmatpush.msrb.mxu3 %v3551_v44 }
 0x3a0   : > { %1449 = vmatpush.msrb.mxu0 %v3552_v33  ;;  %1469 = vmatpush.msrb.mxu1 %v3553_v38 }
 0x3a1   : > { %1489 = vmatpush.msrb.mxu2 %v3554_v22  ;;  %1509 = vmatpush.msrb.mxu3 %v3555_v48 }
 0x3a2   : > { %1450 = vmatpush.msrb.mxu0 %v3556_v32  ;;  %1470 = vmatpush.msrb.mxu1 %v3557_v47  ;;  %v3562_v32 = vld [vmem:[#allocation49_spill] sm:$0xff] }
 0x3a3   : > { %1490 = vmatpush.msrb.mxu2 %v3558_v46  ;;  %1510 = vmatpush.msrb.mxu3 %v3559_v34 }
 0x3ff   : > { %v1150_v31 = vpop.f32.mrf.mxu0  ;;  %v1170_v26 = vpop.f32.mrf.mxu1 }
 0x400   : > { %v1217_v44 = vadd.f32 %v1150_v31, %v3560_v41  ;;  %v1218_v33 = vadd.f32 %v1170_v26, %v3561_v35 }
 0x402   : > { %v1221_v43 = vsub.f32 0.0, %v1217_v44  ;;  %v1240_v38 = vsub.f32 0.0, %v1218_v33 }
 0x404   : > { %v1222_v37 = vmul.f32 1.442695, %v1221_v43  ;;  %v1241_v22 = vmul.f32 1.442695, %v1240_v38  ;;  %v3563_v43 = vld [vmem:[#allocation52_spill] sm:$0xff] }
 0x406   : > { %1992 = vpow2.f32 %v1222_v37  ;;  %v1210_v48 = vpop.f32.mrf.mxu3  ;;  %v1190_v41 = vpop.f32.mrf.mxu2 }
 0x407   : > { %1994 = vpow2.f32 %v1241_v22  ;;  %v1220_v59 = vadd.f32 %v1210_v48, %v3562_v32  ;;  %v1219_v44 = vadd.f32 %v1190_v41, %v3563_v43 }
 0x409   : > { %v1260_v47 = vsub.f32 0.0, %v1220_v59 }
 0x40b   : > { %v1261_v42 = vmul.f32 1.442695, %v1260_v47 }
 0x40c   : > { %v1993_v46 = vpop.eup %1992 }
 0x40d   : > { %v1995_v0 = vpop.eup %1994  ;;  %v1224_v34 = vadd.f32 1.0, %v1993_v46  ;;  %1996 = vpow2.f32 %v1261_v42 }
 0x40e   : > { %v1243_v39 = vadd.f32 1.0, %v1995_v0 }
 0x40f   : > { %1998 = vrcp.f32 %v1224_v34  ;;  %v1236_v48 = vand.u32 2147483648, %v1224_v34  ;;  %v1234_v0 = vand.u32 2147483647, %v1224_v34  ;;  %vm1230_vm11 = vweird.f32 %v1224_v34 }
 0x410   : > { %2000 = vrcp.f32 %v1243_v39  ;;  %v1255_v32 = vand.u32 2147483648, %v1243_v39  ;;  %v1253_v46 = vand.u32 2147483647, %v1243_v39  ;;  %vm1249_vm12 = vweird.f32 %v1243_v39 }
 0x411   : > { %v1237_v41 = vor.u32 1.1754944e-38, %v1236_v48  ;;  %vm1235_vm15 = vcmp.eq.f32.partialorder %v1234_v0, 8.507059e+37 }
 0x412   : > { %vm1254_vm0 = vcmp.eq.f32.partialorder %v1253_v46, 8.507059e+37 }
 0x413   : > { %v1997_v35 = vpop.eup %1996 }
 0x414   : > { %v1263_v31 = vadd.f32 1.0, %v1997_v35 }
 0x415   : > { %v1999_v26 = vpop.eup %1998 }
 0x416   : > { %v2001_v37 = vpop.eup %2000  ;;  %v1226_v33 = vmul.f32 %v1999_v26, %v1224_v34  ;;  %2002 = vrcp.f32 %v1263_v31  ;;  %vm1231_vm9 = vweird.f32 %v1999_v26  ;;  %v1275_v48 = vand.u32 2147483648, %v1263_v31 }
 0x417   : > { %v1245_v38 = vmul.f32 %v2001_v37, %v1243_v39  ;;  %2004 = vtanh.f32 %v1219_v44  ;;  %vm1250_vm10 = vweird.f32 %v2001_v37  ;;  %vm1232_vm13 = vmor %vm1230_vm11, %vm1231_vm9  ;;  %vm1269_vm2 = vweird.f32 %v1263_v31 }
 0x418   : > { %v1227_v22 = vsub.f32 1.0, %v1226_v33  ;;  %vm1251_vm14 = vmor %vm1249_vm12, %vm1250_vm10  ;;  %v1256_v33 = vor.u32 1.1754944e-38, %v1255_v32  ;;  %v1276_v0 = vor.u32 1.1754944e-38, %v1275_v48 }
 0x419   : > { %v1246_v59 = vsub.f32 1.0, %v1245_v38 }
 0x41a   : > { %v1228_v47 = vmul.f32 %v1999_v26, %v1227_v22 }
 0x41b   : > { %v1247_v42 = vmul.f32 %v2001_v37, %v1246_v59 }
 0x41c   : > { %v2003_v27 = vpop.eup %2002  ;;  %v1229_v35 = vadd.f32 %v1999_v26, %v1228_v47 }
 0x41d   : > { %v1248_v43 = vadd.f32 %v2001_v37, %v1247_v42  ;;  %v1265_v17 = vmul.f32 %v2003_v27, %v1263_v31  ;;  %v2005_v44 = vpop.eup %2004  ;;  %vm1270_vm1 = vweird.f32 %v2003_v27 }
 0x41e   : > { %v1233_v38 = vsel %vm1232_vm13, %v1999_v26, %v1229_v35  ;;  %v1273_v26 = vand.u32 2147483647, %v1263_v31  ;;  %vm1271_vm3 = vmor %vm1269_vm2, %vm1270_vm1 }
 0x41f   : > { %v1238_v45 = vsel %vm1235_vm15, %v1237_v41, %v1233_v38  ;;  %v1252_v22 = vsel %vm1251_vm14, %v2001_v37, %v1248_v43  ;;  %v1266_v7 = vsub.f32 1.0, %v1265_v17 }
 0x420   : > { %v1257_v59 = vsel %vm1254_vm0, %v1256_v33, %v1252_v22  ;;  %v1280_v63 = vmul.f32 %v2005_v44, %v1238_v45  ;;  %vm1274_vm4 = vcmp.eq.f32.partialorder %v1273_v26, 8.507059e+37  ;;  %v3593_v33 = vld [vmem:[#allocation56_spill] sm:$0xff] }
 0x421   : > { %v1279_v60 = vmul.f32 %v1257_v59, %v3104_v30  ;;  %v1267_v47 = vmul.f32 %v2003_v27, %v1266_v7 }
 0x423   : > { %v3176_v34 = vadd.f32 %v1280_v63, %v1279_v60  ;;  %v1268_v39 = vadd.f32 %v2003_v27, %v1267_v47 }
 0x425   : > { %2006 = vtanh.f32 %v3176_v34  ;;  %v1272_v32 = vsel %vm1271_vm3, %v2003_v27, %v1268_v39 }
 0x426   : > { %v1277_v17 = vsel %vm1274_vm4, %v1276_v0, %v1272_v32 }
 0x42b   : > { %v2007_v37 = vpop.eup %2006 }
 0x42c   : > { %v1283_v42 = vmul.f32 %v2007_v37, %v1277_v17 }
 0x42e   : > { %1300 = vmatmul.f32.vlgmr.msra.gmra.mxu0 %v1283_v42  ;;  %1320 = vmatmul.f32.vlgmr.msra.gmra.mxu1 %v1283_v42 }
 0x42f   : > { %1340 = vmatmul.f32.vlgmr.msra.gmra.mxu2 %v1283_v42  ;;  %1360 = vmatmul.f32.vlgmr.msra.gmra.mxu3 %v1283_v42 }
 0x430   : > { %1586 = vmatpush.msra.mxu0 %v2835_v40  ;;  %1606 = vmatpush.msra.mxu1 %v2838_v10  ;;  %v3564_v40 = vld [vmem:[#allocation24_spill] sm:$0xff]  ;;  %v3565_v10 = vld [vmem:[#allocation19_spill] sm:$0xff] }
 0x431   : > { %1626 = vmatpush.msra.mxu2 %v2841_v12  ;;  %1646 = vmatpush.msra.mxu3 %v2844_v5  ;;  %v3566_v12 = vld [vmem:[#allocation12_spill] sm:$0xff]  ;;  %v3567_v5 = vld [vmem:[#allocation10_spill] sm:$0xff] }
 0x432   : > { %1587 = vmatpush.msra.mxu0 %v2847_v11  ;;  %1607 = vmatpush.msra.mxu1 %v2850_v4  ;;  %v3568_v11 = vld [vmem:[#allocation18_spill] sm:$0xff]  ;;  %v3569_v4 = vld [vmem:[#allocation11_spill] sm:$0xff] }
 0x433   : > { %1627 = vmatpush.msra.mxu2 %v2853_v6  ;;  %1647 = vmatpush.msra.mxu3 %v2856_v57  ;;  %v3570_v6 = vld [vmem:[#allocation23_spill] sm:$0xff] }
 0x434   : > { %1588 = vmatpush.msra.mxu0 %v2859_v58  ;;  %1608 = vmatpush.msra.mxu1 %v2862_v3  ;;  %v3571_v57 = vld [vmem:[#allocation15_spill] sm:$0xff]  ;;  %v3572_v58 = vld [vmem:[#allocation16_spill] sm:$0xff]  ;;  %v3573_v3 = vld [vmem:[#allocation17_spill] sm:$0xff] }
 0x435   : > { %1628 = vmatpush.msra.mxu2 %v2865_v15  ;;  %1648 = vmatpush.msra.mxu3 %v2868_v1  ;;  %v3574_v15 = vld [vmem:[#allocation13_spill] sm:$0xff]  ;;  %v3575_v1 = vld [vmem:[#allocation14_spill] sm:$0xff] }
 0x436   : > { %1589 = vmatpush.msra.mxu0 %v2871_v8  ;;  %1609 = vmatpush.msra.mxu1 %v2874_v13  ;;  %v3576_v8 = vld [vmem:[#allocation27_spill] sm:$0xff]  ;;  %v3577_v13 = vld [vmem:[#allocation22_spill] sm:$0xff] }
 0x437   : > { %1629 = vmatpush.msra.mxu2 %v2877_v14  ;;  %1649 = vmatpush.msra.mxu3 %v2880_v36  ;;  %v3578_v14 = vld [vmem:[#allocation20_spill] sm:$0xff]  ;;  %v3579_v36 = vld [vmem:[#allocation21_spill] sm:$0xff] }
 0x438   : > { %1590 = vmatpush.msra.mxu0 %v2883_v16  ;;  %1610 = vmatpush.msra.mxu1 %v2886_v18  ;;  %v3580_v16 = vld [vmem:[#allocation30_spill] sm:$0xff]  ;;  %v3581_v18 = vld [vmem:[#allocation28_spill] sm:$0xff] }
 0x439   : > { %1630 = vmatpush.msra.mxu2 %v2889_v19  ;;  %1650 = vmatpush.msra.mxu3 %v2892_v20  ;;  %v3582_v19 = vld [vmem:[#allocation25_spill] sm:$0xff]  ;;  %v3583_v20 = vld [vmem:[#allocation26_spill] sm:$0xff] }
 0x43a   : > { %1591 = vmatpush.msra.mxu0 %v2895_v23  ;;  %1611 = vmatpush.msra.mxu1 %v2898_v24  ;;  %v3584_v23 = vld [vmem:[#allocation34_spill] sm:$0xff]  ;;  %v3585_v24 = vld [vmem:[#allocation32_spill] sm:$0xff] }
 0x43b   : > { %1631 = vmatpush.msra.mxu2 %v2901_v25  ;;  %1651 = vmatpush.msra.mxu3 %v2904_v28  ;;  %v3586_v25 = vld [vmem:[#allocation29_spill] sm:$0xff]  ;;  %v3587_v28 = vld [vmem:[#allocation31_spill] sm:$0xff] }
 0x43c   : > { %1592 = vmatpush.msra.mxu0 %v2907_v29  ;;  %1612 = vmatpush.msra.mxu1 %v2910_v49  ;;  %v3588_v29 = vld [vmem:[#allocation35_spill] sm:$0xff]  ;;  %v3589_v49 = vld [vmem:[#allocation33_spill] sm:$0xff] }
 0x43d   : > { %1632 = vmatpush.msra.mxu2 %v3019_v61  ;;  %1652 = vmatpush.msra.mxu3 %v2914_v50 }
 0x43e   : > { %1593 = vmatpush.msra.mxu0 %v2917_v51  ;;  %1613 = vmatpush.msra.mxu1 %v2920_v52  ;;  %v3590_v52 = vld [vmem:[#allocation50_spill] sm:$0xff] }
 0x43f   : > { %1633 = vmatpush.msra.mxu2 %v3025_v9  ;;  %1653 = vmatpush.msra.mxu3 %v2924_v53 }
 0x440   : > { %1594 = vmatpush.msra.mxu0 %v2927_v54  ;;  %1614 = vmatpush.msra.mxu1 %v2930_v62  ;;  %v3591_v54 = vld [vmem:[#allocation51_spill] sm:$0xff] }
 0x441   : > { %1634 = vmatpush.msra.mxu2 %v3031_v21  ;;  %1654 = vmatpush.msra.mxu3 %v2934_v55  ;;  %v3592_v21 = vld [vmem:[#allocation53_spill] sm:$0xff] }
 0x442   : > { %1595 = vmatpush.msra.mxu0 %v2937_v56  ;;  %1615 = vmatpush.msra.mxu1 %v2940_v2 }
 0x443   : > { %1635 = vmatpush.msra.mxu2 %v3564_v40  ;;  %1655 = vmatpush.msra.mxu3 %v3565_v10 }
 0x444   : > { %1596 = vmatpush.msra.mxu0 %v3566_v12  ;;  %1616 = vmatpush.msra.mxu1 %v3567_v5 }
 0x445   : > { %1636 = vmatpush.msra.mxu2 %v3568_v11  ;;  %1656 = vmatpush.msra.mxu3 %v3569_v4 }
 0x446   : > { %1597 = vmatpush.msra.mxu0 %v3570_v6  ;;  %1617 = vmatpush.msra.mxu1 %v3571_v57 }
 0x447   : > { %1637 = vmatpush.msra.mxu2 %v3572_v58  ;;  %1657 = vmatpush.msra.mxu3 %v3573_v3 }
 0x448   : > { %1598 = vmatpush.msra.mxu0 %v3574_v15  ;;  %1618 = vmatpush.msra.mxu1 %v3575_v1 }
 0x449   : > { %1638 = vmatpush.msra.mxu2 %v3576_v8  ;;  %1658 = vmatpush.msra.mxu3 %v3577_v13 }
 0x44a   : > { %1599 = vmatpush.msra.mxu0 %v3578_v14  ;;  %1619 = vmatpush.msra.mxu1 %v3579_v36 }
 0x44b   : > { %1639 = vmatpush.msra.mxu2 %v3580_v16  ;;  %1659 = vmatpush.msra.mxu3 %v3581_v18 }
 0x44c   : > { %1600 = vmatpush.msra.mxu0 %v3582_v19  ;;  %1620 = vmatpush.msra.mxu1 %v3583_v20 }
 0x44d   : > { %1640 = vmatpush.msra.mxu2 %v3584_v23  ;;  %1660 = vmatpush.msra.mxu3 %v3585_v24 }
 0x44e   : > { %1601 = vmatpush.msra.mxu0 %v3586_v25  ;;  %1621 = vmatpush.msra.mxu1 %v3587_v28 }
 0x44f   : > { %1641 = vmatpush.msra.mxu2 %v3588_v29  ;;  %1661 = vmatpush.msra.mxu3 %v3589_v49  ;;  %v3594_v29 = vld [vmem:[#allocation54_spill] sm:$0xff] }
 0x4ab   : > { %v1301_v50 = vpop.f32.mrf.mxu0  ;;  %v1321_v51 = vpop.f32.mrf.mxu1 }
 0x4ac   : > { %v1368_v53 = vadd.f32 %v1301_v50, %v3590_v52  ;;  %v1369_v62 = vadd.f32 %v1321_v51, %v3591_v54  ;;  %v3595_v50 = vld [vmem:[#allocation55_spill] sm:$0xff] }
 0x4ae   : > { %v1372_v55 = vsub.f32 0.0, %v1368_v53  ;;  %v1391_v56 = vsub.f32 0.0, %v1369_v62 }
 0x4b0   : > { %v1373_v2 = vmul.f32 1.442695, %v1372_v55  ;;  %v1392_v61 = vmul.f32 1.442695, %v1391_v56  ;;  %v3596_v56 = vld [vmem:[#allocation57_spill] sm:$0xff] }
 0x4b2   : > { %2008 = vpow2.f32 %v1373_v2  ;;  %v1361_v9 = vpop.f32.mrf.mxu3  ;;  %v1341_v46 = vpop.f32.mrf.mxu2 }
 0x4b3   : > { %2010 = vpow2.f32 %v1392_v61  ;;  %v1371_v30 = vadd.f32 %v1361_v9, %v3592_v21  ;;  %v1370_v38 = vadd.f32 %v1341_v46, %v3593_v33  ;;  %v3597_v46 = vld [vmem:[#allocation60_spill] sm:$0xff] }
 0x4b5   : > { %v1411_v60 = vsub.f32 0.0, %v1371_v30 }
 0x4b7   : > { %v1412_v63 = vmul.f32 1.442695, %v1411_v60 }
 0x4b8   : > { %v2009_v7 = vpop.eup %2008 }
 0x4b9   : > { %v2011_v45 = vpop.eup %2010  ;;  %v1375_v27 = vadd.f32 1.0, %v2009_v7  ;;  %2012 = vpow2.f32 %v1412_v63 }
 0x4ba   : > { %v1394_v31 = vadd.f32 1.0, %v2011_v45 }
 0x4bb   : > { %2014 = vrcp.f32 %v1375_v27  ;;  %v1387_v48 = vand.u32 2147483648, %v1375_v27  ;;  %v1385_v0 = vand.u32 2147483647, %v1375_v27  ;;  %vm1381_vm7 = vweird.f32 %v1375_v27 }
 0x4bc   : > { %2016 = vrcp.f32 %v1394_v31  ;;  %v1406_v26 = vand.u32 2147483648, %v1394_v31  ;;  %v1404_v17 = vand.u32 2147483647, %v1394_v31  ;;  %vm1400_vm8 = vweird.f32 %v1394_v31 }
 0x4bd   : > { %v1388_v10 = vor.u32 1.1754944e-38, %v1387_v48  ;;  %vm1386_vm11 = vcmp.eq.f32.partialorder %v1385_v0, 8.507059e+37 }
 0x4be   : > { %v1407_v11 = vor.u32 1.1754944e-38, %v1406_v26  ;;  %vm1405_vm12 = vcmp.eq.f32.partialorder %v1404_v17, 8.507059e+37 }
 0x4bf   : > { %v2013_v35 = vpop.eup %2012 }
 0x4c0   : > { %v1414_v41 = vadd.f32 1.0, %v2013_v35 }
 0x4c1   : > { %v2015_v43 = vpop.eup %2014 }
 0x4c2   : > { %v2017_v44 = vpop.eup %2016  ;;  %v1377_v22 = vmul.f32 %v2015_v43, %v1375_v27  ;;  %2018 = vrcp.f32 %v1414_v41  ;;  %vm1382_vm5 = vweird.f32 %v2015_v43  ;;  %v1426_v16 = vand.u32 2147483648, %v1414_v41 }
 0x4c3   : > { %v1396_v59 = vmul.f32 %v2017_v44, %v1394_v31  ;;  %2020 = vtanh.f32 %v1370_v38  ;;  %vm1401_vm6 = vweird.f32 %v2017_v44  ;;  %vm1383_vm9 = vmor %vm1381_vm7, %vm1382_vm5  ;;  %vm1420_vm14 = vweird.f32 %v1414_v41 }
 0x4c4   : > { %v1378_v47 = vsub.f32 1.0, %v1377_v22  ;;  %vm1402_vm10 = vmor %vm1400_vm8, %vm1401_vm6  ;;  %v1424_v18 = vand.u32 2147483647, %v1414_v41  ;;  %v1427_v20 = vor.u32 1.1754944e-38, %v1426_v16 }
 0x4c5   : > { %v1397_v39 = vsub.f32 1.0, %v1396_v59 }
 0x4c6   : > { %v1379_v32 = vmul.f32 %v2015_v43, %v1378_v47  ;;  %vm1425_vm0 = vcmp.eq.f32.partialorder %v1424_v18, 8.507059e+37 }
 0x4c7   : > { %v1398_v37 = vmul.f32 %v2017_v44, %v1397_v39 }
 0x4c8   : > { %v2019_v42 = vpop.eup %2018  ;;  %v1380_v40 = vadd.f32 %v2015_v43, %v1379_v32 }
 0x4c9   : > { %v1399_v12 = vadd.f32 %v2017_v44, %v1398_v37  ;;  %v1416_v5 = vmul.f32 %v2019_v42, %v1414_v41  ;;  %v2021_v6 = vpop.eup %2020  ;;  %vm1421_vm13 = vweird.f32 %v2019_v42 }
 0x4ca   : > { %v1384_v4 = vsel %vm1383_vm9, %v2015_v43, %v1380_v40  ;;  %vm1422_vm15 = vmor %vm1420_vm14, %vm1421_vm13 }
 0x4cb   : > { %v1389_v57 = vsel %vm1386_vm11, %v1388_v10, %v1384_v4  ;;  %v1403_v58 = vsel %vm1402_vm10, %v2017_v44, %v1399_v12  ;;  %v1417_v3 = vsub.f32 1.0, %v1416_v5 }
 0x4cc   : > { %v1408_v15 = vsel %vm1405_vm12, %v1407_v11, %v1403_v58  ;;  %v1431_v1 = vmul.f32 %v2021_v6, %v1389_v57 }
 0x4cd   : > { %v1430_v8 = vmul.f32 %v1408_v15, %v3176_v34  ;;  %v1418_v13 = vmul.f32 %v2019_v42, %v1417_v3 }
 0x4cf   : > { %v3248_v14 = vadd.f32 %v1431_v1, %v1430_v8  ;;  %v1419_v36 = vadd.f32 %v2019_v42, %v1418_v13 }
 0x4d1   : > { %2022 = vtanh.f32 %v3248_v14  ;;  %v1423_v19 = vsel %vm1422_vm15, %v2019_v42, %v1419_v36 }
 0x4d2   : > { %v1428_v24 = vsel %vm1425_vm0, %v1427_v20, %v1423_v19 }
 0x4d7   : > { %v2023_v23 = vpop.eup %2022 }
 0x4d8   : > { %v1434_v25 = vmul.f32 %v2023_v23, %v1428_v24  ;;  %v3598_v24 = vld [vmem:[#allocation58_spill] sm:$0xff] }
 0x4da   : > { %1451 = vmatmul.f32.vlgmr.msrb.gmra.mxu0 %v1434_v25  ;;  %1471 = vmatmul.f32.vlgmr.msrb.gmra.mxu1 %v1434_v25 }
 0x4db   : > { %1491 = vmatmul.f32.vlgmr.msrb.gmra.mxu2 %v1434_v25  ;;  %1511 = vmatmul.f32.vlgmr.msrb.gmra.mxu3 %v1434_v25 }
 0x557   : > { %v1452_v34 = vpop.f32.mrf.mxu0  ;;  %v1472_v28 = vpop.f32.mrf.mxu1 }
 0x558   : > { %v1519_v49 = vadd.f32 %v1452_v34, %v3594_v29  ;;  %v1520_v51 = vadd.f32 %v1472_v28, %v3595_v50  ;;  %v3599_v34 = vld [vmem:[#allocation59_spill] sm:$0xff] }
 0x55a   : > { %v1523_v52 = vsub.f32 0.0, %v1519_v49  ;;  %v1542_v53 = vsub.f32 0.0, %v1520_v51 }
 0x55c   : > { %v1524_v54 = vmul.f32 1.442695, %v1523_v52  ;;  %v1543_v62 = vmul.f32 1.442695, %v1542_v53  ;;  %v3600_v53 = vld [vmem:[#allocation61_spill] sm:$0xff] }
 0x55e   : > { %2024 = vpow2.f32 %v1524_v54  ;;  %v1512_v55 = vpop.f32.mrf.mxu3  ;;  %v1492_v7 = vpop.f32.mrf.mxu2 }
 0x55f   : > { %2026 = vpow2.f32 %v1543_v62  ;;  %v1522_v2 = vadd.f32 %v1512_v55, %v3596_v56  ;;  %v1521_v35 = vadd.f32 %v1492_v7, %v3597_v46  ;;  %v3601_v7 = vld [vmem:[#allocation62_spill] sm:$0xff] }
 0x561   : > { %v1562_v61 = vsub.f32 0.0, %v1522_v2 }
 0x563   : > { %v1563_v9 = vmul.f32 1.442695, %v1562_v61 }
 0x564   : > { %v2025_v21 = vpop.eup %2024 }
 0x565   : > { %v2027_v30 = vpop.eup %2026  ;;  %v1526_v60 = vadd.f32 1.0, %v2025_v21  ;;  %2028 = vpow2.f32 %v1563_v9 }
 0x566   : > { %v1545_v63 = vadd.f32 1.0, %v2027_v30 }
 0x567   : > { %2030 = vrcp.f32 %v1526_v60  ;;  %v1538_v22 = vand.u32 2147483648, %v1526_v60  ;;  %v1536_v39 = vand.u32 2147483647, %v1526_v60  ;;  %vm1532_vm3 = vweird.f32 %v1526_v60 }
 0x568   : > { %2032 = vrcp.f32 %v1545_v63  ;;  %v1557_v59 = vand.u32 2147483648, %v1545_v63  ;;  %v1555_v26 = vand.u32 2147483647, %v1545_v63  ;;  %vm1551_vm4 = vweird.f32 %v1545_v63 }
 0x569   : > { %v1539_v37 = vor.u32 1.1754944e-38, %v1538_v22  ;;  %vm1537_vm7 = vcmp.eq.f32.partialorder %v1536_v39, 8.507059e+37 }
 0x56a   : > { %v1558_v40 = vor.u32 1.1754944e-38, %v1557_v59  ;;  %vm1556_vm8 = vcmp.eq.f32.partialorder %v1555_v26, 8.507059e+37 }
 0x56b   : > { %v2029_v45 = vpop.eup %2028 }
 0x56c   : > { %v1565_v27 = vadd.f32 1.0, %v2029_v45 }
 0x56d   : > { %v2031_v31 = vpop.eup %2030 }
 0x56e   : > { %v2033_v41 = vpop.eup %2032  ;;  %v1528_v43 = vmul.f32 %v2031_v31, %v1526_v60  ;;  %2034 = vrcp.f32 %v1565_v27  ;;  %vm1533_vm1 = vweird.f32 %v2031_v31  ;;  %v1577_v8 = vand.u32 2147483648, %v1565_v27 }
 0x56f   : > { %v1547_v33 = vmul.f32 %v2033_v41, %v1545_v63  ;;  %2036 = vtanh.f32 %v1521_v35  ;;  %vm1552_vm2 = vweird.f32 %v2033_v41  ;;  %vm1534_vm5 = vmor %vm1532_vm3, %vm1533_vm1  ;;  %vm1571_vm10 = vweird.f32 %v1565_v27 }
 0x570   : > { %v1529_v38 = vsub.f32 1.0, %v1528_v43  ;;  %vm1553_vm6 = vmor %vm1551_vm4, %vm1552_vm2  ;;  %v1575_v13 = vand.u32 2147483647, %v1565_v27  ;;  %v1578_v16 = vor.u32 1.1754944e-38, %v1577_v8 }
 0x571   : > { %v1548_v44 = vsub.f32 1.0, %v1547_v33 }
 0x572   : > { %v1530_v47 = vmul.f32 %v2031_v31, %v1529_v38  ;;  %vm1576_vm12 = vcmp.eq.f32.partialorder %v1575_v13, 8.507059e+37 }
 0x573   : > { %v1549_v48 = vmul.f32 %v2033_v41, %v1548_v44 }
 0x574   : > { %v2035_v32 = vpop.eup %2034  ;;  %v1531_v0 = vadd.f32 %v2031_v31, %v1530_v47 }
 0x575   : > { %v1550_v17 = vadd.f32 %v2033_v41, %v1549_v48  ;;  %v1567_v42 = vmul.f32 %v2035_v32, %v1565_v27  ;;  %v2037_v12 = vpop.eup %2036  ;;  %vm1572_vm9 = vweird.f32 %v2035_v32 }
 0x576   : > { %v1535_v10 = vsel %vm1534_vm5, %v2031_v31, %v1531_v0  ;;  %vm1573_vm11 = vmor %vm1571_vm10, %vm1572_vm9 }
 0x577   : > { %v1540_v5 = vsel %vm1537_vm7, %v1539_v37, %v1535_v10  ;;  %v1554_v11 = vsel %vm1553_vm6, %v2033_v41, %v1550_v17  ;;  %v1568_v4 = vsub.f32 1.0, %v1567_v42 }
 0x578   : > { %v1559_v6 = vsel %vm1556_vm8, %v1558_v40, %v1554_v11  ;;  %v1582_v57 = vmul.f32 %v2037_v12, %v1540_v5 }
 0x579   : > { %v1581_v58 = vmul.f32 %v1559_v6, %v3248_v14  ;;  %v1569_v3 = vmul.f32 %v2035_v32, %v1568_v4 }
 0x57b   : > { %v3256_v15 = vadd.f32 %v1582_v57, %v1581_v58  ;;  %v1570_v1 = vadd.f32 %v2035_v32, %v1569_v3 }
 0x57d   : > { %2038 = vtanh.f32 %v3256_v15  ;;  %v1574_v36 = vsel %vm1573_vm11, %v2035_v32, %v1570_v1 }
 0x57e   : > { %v1579_v19 = vsel %vm1576_vm12, %v1578_v16, %v1574_v36 }
 0x583   : > { %v2039_v18 = vpop.eup %2038 }
 0x584   : > { %v1585_v20 = vmul.f32 %v2039_v18, %v1579_v19 }
 0x586   : > { %1602 = vmatmul.f32.vlgmr.msra.gmra.mxu0 %v1585_v20  ;;  %1622 = vmatmul.f32.vlgmr.msra.gmra.mxu1 %v1585_v20 }
 0x587   : > { %1642 = vmatmul.f32.vlgmr.msra.gmra.mxu2 %v1585_v20  ;;  %1662 = vmatmul.f32.vlgmr.msra.gmra.mxu3 %v1585_v20 }
 0x603   : > { %v1603_v14 = vpop.f32.mrf.mxu0  ;;  %v1623_v23 = vpop.f32.mrf.mxu1 }
 0x604   : > { %v1670_v25 = vadd.f32 %v1603_v14, %v3598_v24  ;;  %v1671_v28 = vadd.f32 %v1623_v23, %v3599_v34 }
 0x606   : > { %v1674_v29 = vsub.f32 0.0, %v1670_v25  ;;  %v1693_v49 = vsub.f32 0.0, %v1671_v28 }
 0x608   : > { %v1675_v50 = vmul.f32 1.442695, %v1674_v29  ;;  %v1694_v51 = vmul.f32 1.442695, %v1693_v49 }
 0x60a   : > { %2040 = vpow2.f32 %v1675_v50  ;;  %v1663_v52 = vpop.f32.mrf.mxu3  ;;  %v1643_v21 = vpop.f32.mrf.mxu2 }
 0x60b   : > { %2042 = vpow2.f32 %v1694_v51  ;;  %v1673_v54 = vadd.f32 %v1663_v52, %v3600_v53  ;;  %v1672_v45 = vadd.f32 %v1643_v21, %v3601_v7 }
 0x60d   : > { %v1713_v62 = vsub.f32 0.0, %v1673_v54 }
 0x60f   : > { %v1714_v55 = vmul.f32 1.442695, %v1713_v62 }
 0x610   : > { %v2041_v56 = vpop.eup %2040 }
 0x611   : > { %v2043_v2 = vpop.eup %2042  ;;  %v1677_v61 = vadd.f32 1.0, %v2041_v56  ;;  %2044 = vpow2.f32 %v1714_v55 }
 0x612   : > { %v1696_v9 = vadd.f32 1.0, %v2043_v2 }
 0x613   : > { %2046 = vrcp.f32 %v1677_v61  ;;  %v1689_v43 = vand.u32 2147483648, %v1677_v61  ;;  %v1687_v44 = vand.u32 2147483647, %v1677_v61  ;;  %vm1683_vm15 = vweird.f32 %v1677_v61 }
 0x614   : > { %2048 = vrcp.f32 %v1696_v9  ;;  %v1708_v33 = vand.u32 2147483648, %v1696_v9  ;;  %v1706_v59 = vand.u32 2147483647, %v1696_v9  ;;  %vm1702_vm0 = vweird.f32 %v1696_v9 }
 0x615   : > { %v1690_v48 = vor.u32 1.1754944e-38, %v1689_v43  ;;  %vm1688_vm3 = vcmp.eq.f32.partialorder %v1687_v44, 8.507059e+37 }
 0x616   : > { %v1709_v0 = vor.u32 1.1754944e-38, %v1708_v33  ;;  %vm1707_vm4 = vcmp.eq.f32.partialorder %v1706_v59, 8.507059e+37 }
 0x617   : > { %v2045_v30 = vpop.eup %2044 }
 0x618   : > { %v1716_v60 = vadd.f32 1.0, %v2045_v30 }
 0x619   : > { %v2047_v63 = vpop.eup %2046 }
 0x61a   : > { %v2049_v27 = vpop.eup %2048  ;;  %v1679_v31 = vmul.f32 %v2047_v63, %v1677_v61  ;;  %2050 = vrcp.f32 %v1716_v60  ;;  %vm1684_vm13 = vweird.f32 %v2047_v63  ;;  %v1728_v58 = vand.u32 2147483648, %v1716_v60 }
 0x61b   : > { %v1698_v46 = vmul.f32 %v2049_v27, %v1696_v9  ;;  %2052 = vtanh.f32 %v1672_v45  ;;  %vm1703_vm14 = vweird.f32 %v2049_v27  ;;  %vm1685_vm1 = vmor %vm1683_vm15, %vm1684_vm13  ;;  %vm1722_vm6 = vweird.f32 %v1716_v60 }
 0x61c   : > { %v1680_v35 = vsub.f32 1.0, %v1679_v31  ;;  %vm1704_vm2 = vmor %vm1702_vm0, %vm1703_vm14  ;;  %v1726_v3 = vand.u32 2147483647, %v1716_v60  ;;  %v1729_v8 = vor.u32 1.1754944e-38, %v1728_v58 }
 0x61d   : > { %v1699_v41 = vsub.f32 1.0, %v1698_v46 }
 0x61e   : > { %v1681_v38 = vmul.f32 %v2047_v63, %v1680_v35  ;;  %vm1727_vm8 = vcmp.eq.f32.partialorder %v1726_v3, 8.507059e+37 }
 0x61f   : > { %v1700_v22 = vmul.f32 %v2049_v27, %v1699_v41 }
 0x620   : > { %v2051_v47 = vpop.eup %2050  ;;  %v1682_v39 = vadd.f32 %v2047_v63, %v1681_v38 }
 0x621   : > { %v1701_v26 = vadd.f32 %v2049_v27, %v1700_v22  ;;  %v1718_v32 = vmul.f32 %v2051_v47, %v1716_v60  ;;  %v2053_v17 = vpop.eup %2052  ;;  %vm1723_vm5 = vweird.f32 %v2051_v47 }
 0x622   : > { %v1686_v37 = vsel %vm1685_vm1, %v2047_v63, %v1682_v39  ;;  %vm1724_vm7 = vmor %vm1722_vm6, %vm1723_vm5 }
 0x623   : > { %v1691_v42 = vsel %vm1688_vm3, %v1690_v48, %v1686_v37  ;;  %v1705_v40 = vsel %vm1704_vm2, %v2049_v27, %v1701_v26  ;;  %v1719_v10 = vsub.f32 1.0, %v1718_v32 }
 0x624   : > { %v1710_v12 = vsel %vm1707_vm4, %v1709_v0, %v1705_v40  ;;  %v1733_v5 = vmul.f32 %v2053_v17, %v1691_v42 }
 0x625   : > { %v1732_v11 = vmul.f32 %v1710_v12, %v3256_v15  ;;  %v1720_v4 = vmul.f32 %v2051_v47, %v1719_v10 }
 0x627   : > { %v1734_v6 = vadd.f32 %v1733_v5, %v1732_v11  ;;  %v1721_v57 = vadd.f32 %v2051_v47, %v1720_v4 }
 0x629   : > { %2054 = vtanh.f32 %v1734_v6  ;;  %v1725_v1 = vsel %vm1724_vm7, %v2051_v47, %v1721_v57 }
 0x62a   : > { %v1730_v13 = vsel %vm1727_vm8, %v1729_v8, %v1725_v1 }
 0x62f   : > { %v2055_v15 = vpop.eup %2054 }
 0x630   : > { %v1736_v36 = vmul.f32 %v2055_v15, %v1730_v13 }
 0x632   : > { %1737 = vst [vmem:[%s180_s19] sm:$0xff] %v1736_v36 }
 0x633   : > { %2177 = shalt.err (!%p2174_p8)
}
 0x634   : > { %1875 = dma.vmem_to_hbm [thread:$0]  (%p2281_p5), %s1752_s20, 128, %s1754_s24, %s1739_s16  }
 0x635 PF: > { %p1887_p9 = scmp.ge.s32.totalorder %s2216_s15, 2  ;;  %s1765_s5 = sand.u32 1, %s2204_s12  }
 0x636   : > { %s1766_s6 = scalar_lea.sflag [#allocation5], %s1765_s5 }
 0x637   : > { %p1882_p10 = pnand %p1887_p9, %p2285_p6 }
 0x639   : > { %p1883_p11 = pneg %p1882_p10 }
 0x63b   : > { %2199 = dma.done.wait (%p1883_p11), %s1766_s6, 128  }
 0x63c   : > { %2201 = vsyncadd (%p1883_p11), %s1766_s6, 4294967168  ;;  %p14_p12 = scmp.ge.s32.totalorder %s2268_s18, 4   ;;  %s3602_s12 = smov %s2208_s13 }
 0x63d   : > { %s3603_s13 = smov %s2212_s14  ;;  %s3604_s14 = smov %s2279_s21 }
 0x63e   : > { %s3605_s15 = smov %s2268_s18  ;;  %16 = sbr.rel (!%p14_p12) target bundleno = 4 (0x4), region = 72 }
 0x643   :  { %1772 = vsyncpa [#allocation4], 1 }
 0x644   :  { %1774 = vsyncpa [#allocation4 + $0x1], 1 }
 0x645   :  { %1775 = vsyncpa [#allocation5], 1 }
 0x646   :  { %1777 = vsyncpa [#allocation5 + $0x1], 1 }

// kernel: tpu_custom_call.1
= control target key start
LH: loop header
LB: loop body
LE: loop exit
PB: predicated region body
PF: predicated region fallthrough
CT: control target
= control target key end

     0   :  { %8 = vsyncpa [#allocation4], 0  ;;  %s3296_s0 = inlined_call_operand.vmem [shape: s32[2,64,1], index: 0, kind: input, shape index: {}]   ;;  %s3297_s1 = inlined_call_operand.vmem [shape: f32[16,512], index: 1, kind: input, shape index: {}]   ;;  %s3298_s2 = inlined_call_operand.hbm [shape: f32[128,512], index: 2, kind: input, shape index: {}]   ;;  %s3299_s3 = inlined_call_operand.hbm [shape: f32[16,128], index: 3, kind: output, shape index: {}]  }
   0x1   :  { %9 = vsyncpa [#allocation5], 0 }
   0x2   :  { %11 = vsyncpa [#allocation5 + $0x1], 0  ;;  %s2243_s12 = smov 0   ;;  %s2245_s13 = smov 0  }
   0x3   :  { %s2247_s14 = smov 0   ;;  %s2249_s15 = smov 0  }
   0x4 LB: > { %s2264_s16 = sadd.s32 4294967295, %s2216_s15   ;;  %s1825_s17 = sadd.s32 4294967294, %s2216_s15   ;;  %s2216_s15 = sphi %s2249_s15, %s3605_s15   ;;  %s2212_s14 = sphi %s2247_s14, %s3604_s14   ;;  %s2208_s13 = sphi %s2245_s13, %s3603_s13   ;;  %s2204_s12 = sphi %s2243_s12, %s3602_s12  }
   0x5   : > { %s2268_s18 = sadd.s32 1, %s2216_s15   ;;  %s92_s19 = sadd.s32 1, %s2212_s14 }
   0x6   : > { %s89_s20 = ssub.s32 %s2216_s15, %s2268_s18  ;;  %p102_p0 = scmp.ne.s32.totalorder %s2212_s14, %s2208_s13 }
   0x7   : > { %p90_p1 = scmp.eq.s32.totalorder %s89_s20, 0  ;;  %p103_p2 = scmp.eq.s32.totalorder %s2264_s16, 1 }
   0x8   : > { %p108_p3 = scmp.ne.s32.totalorder %s2208_s13, %s2204_s12  ;;  %p109_p4 = scmp.eq.s32.totalorder %s1825_s17, 1 }
   0x9   : > { %s2279_s21 = scalar_select %p90_p1, %s2212_s14, %s92_s19  }
   0xa   : > { %p2281_p5 = por %p103_p2, %p102_p0  ;;  %p2285_p6 = por %p109_p4, %p108_p3 }
   0xb   : > { %p1826_p7 = scmp.ge.s32.totalorder %s2216_s15, 1  ;;  %p116_p8 = scmp.lt.s32.totalorder %s2216_s15, 3 }
   0xc   : > { %p1885_p9 = scmp.eq.s32.totalorder %s2264_s16, 0  ;;  %s130_s26 = sshll.u32 %s3298_s2, 4  ;;  %s131_s26 = int_to_ptr.hbm [resolvable:$true] %s130_s26 }
   0xd   : > { %p117_p10 = pnand %p1826_p7, %p116_p8  ;;  %s2218_s27 = smov [#allocation3]  }
   0xe   : > { %s132_s28 = sshll.u32 %s2218_s27, 4  ;;  %s2219_s29 = smov 512   ;;  %s133_s28 = int_to_ptr.vmem [resolvable:$true] %s132_s28 }
   0xf   : > { %p1877_p11 = pneg %p117_p10  ;;  %s2220_s30 = smov 32  }
  0x10   : > { %156 = sbr.rel (%p117_p10) target bundleno = 1589 (0x635), region = 32 }
  0x11   : > { %p1878_p12 = pnand %p1885_p9, %p1877_p11 }
  0x13   : > { %1880 = dma.hbm_to_vmem [thread:$0]  (!%p1878_p12), %s131_s26, 8192, %s133_s28, [#allocation4], %s2219_s29, %s2219_s29, %s2220_s30  }
  0x15   : > { %2195 = dma.done.wait (%p1885_p9), [#allocation4], 8192  }
  0x16   : > { %2197 = vsyncadd (%p1885_p9), [#allocation4], 4294959104  ;;  %p181_p13 = scmp.lt.s32.totalorder %s2264_s16, 1  ;;  %v2221_v0 = vmov 0   ;;  %v190_v9 = vld [vmem:[%s3297_s1 + $0x20] sm:$0xff]  ;;  %v191_v10 = vld [vmem:[%s3297_s1 + $0x28] sm:$0xff]  ;;  %v266_v36 = vlaneseq }
  0x17   : > { %1926 = vset.pattern.permute.xlu1 %v2221_v0  ;;  %1925 = vset.pattern.permute.xlu0 %v2221_v0  ;;  %v192_v11 = vld [vmem:[%s3297_s1 + $0x30] sm:$0xff]  ;;  %v193_v12 = vld [vmem:[%s3297_s1 + $0x38] sm:$0xff]  ;;  %v186_v13 = vld [vmem:[%s3297_s1] sm:$0xff]  ;;  %vm308_vm0 = vcmask 130048   ;;  %v3306_v47 = vmov 0.0   ;;  %s178_s7 = sand.u32 1, %s2208_s13  }
  0x18   : > { %s182_s4 = scalar_select %p181_p13, %s2264_s16, 1  ;;  %1927 = vset.pattern.permute.xlu2 %v2221_v0  ;;  %347 = vmatpush.msra.mxu0 %v190_v9  ;;  %v187_v14 = vld [vmem:[%s3297_s1 + $0x8] sm:$0xff]  ;;  %v188_v15 = vld [vmem:[%s3297_s1 + $0x10] sm:$0xff]  ;;  %v189_v16 = vld [vmem:[%s3297_s1 + $0x18] sm:$0xff]  ;;  %v2393_v40 = vand.u32 127, %v266_v36 }
  0x19   : > { %388 = vmatpush.msra.mxu1 %v191_v10  ;;  %429 = vmatpush.msra.mxu2 %v192_v11  ;;  %v2330_v17 = vld [vmem:[#allocation3 + $0x1e0] sm:$0xff]  ;;  %v2332_v18 = vld [vmem:[#allocation3 + $0x1e8] sm:$0xff]  ;;  %v2342_v21 = vld [vmem:[#allocation3 + $0x1f8] sm:$0xff]  ;;  %s1867_s9 = sshll.u32 %s2264_s16, 3  ;;  %s1739_s16 = scalar_lea.sflag [#allocation5], %s178_s7 }
  0x1a   : > { %s1870_s5 = sshll.u32 %s182_s4, 6  ;;  %470 = vmatpush.msra.mxu3 %v193_v12  ;;  %348 = vmatpush.msra.mxu0 %v186_v13  ;;  %v2334_v19 = vld [vmem:[#allocation3 + $0x1c0] sm:$0xff]  ;;  %v2338_v20 = vld [vmem:[#allocation3 + $0x1c8] sm:$0xff]  ;;  %3405 = vst [vmem:[#allocation9_spill] sm:$0xff] %v2342_v21  ;;  %v2349_v24 = vld [vmem:[#allocation3 + $0x1d8] sm:$0xff]  ;;  %s1749_s17 = scalar_lea.hbm %s3299_s3, %s1867_s9 }
  0x1b   : > { %s185_s8 = scalar_lea.vmem %s3296_s0, %s1870_s5  ;;  %389 = vmatpush.msra.mxu1 %v187_v14  ;;  %430 = vmatpush.msra.mxu2 %v188_v15  ;;  %v2345_v22 = vld [vmem:[#allocation3 + $0x1a0] sm:$0xff]  ;;  %v2347_v23 = vld [vmem:[#allocation3 + $0x1a8] sm:$0xff]  ;;  %v2360_v27 = vld [vmem:[#allocation3 + $0x1b8] sm:$0xff]  ;;  %s1753_s24 = sshll.u32 %s1749_s17, 4  ;;  %s1754_s24 = int_to_ptr.hbm [resolvable:$true] %s1753_s24 }
  0x1c   : > { %v260_v1 = vld [vmem:[%s185_s8 + $0x10] sm:$0xff]  ;;  %v258_v2 = vld [vmem:[%s185_s8] sm:$0xff]  ;;  %v261_v4 = vld [vmem:[%s185_s8 + $0x18] sm:$0xff]  ;;  %471 = vmatpush.msra.mxu3 %v189_v16  ;;  %529 = vmatpush.msrb.mxu0 %v2330_v17  ;;  %s2164_s25 = sshra.s32 %s1754_s24, 4  ;;  %s2170_s29 = scalar_lea.hbm %s3299_s3, 16  ;;  %s2165_s25 = int_to_ptr.hbm [resolvable:$true] %s2164_s25 }
  0x1d   : > { %275 = vperm.xlu1 %1926, %v260_v1   ;;  %269 = vperm.xlu0 %1925, %v258_v2   ;;  %v262_v3 = vld [vmem:[%s185_s8 + $0x20] sm:$0xff]  ;;  %v259_v5 = vld [vmem:[%s185_s8 + $0x8] sm:$0xff]  ;;  %v265_v7 = vld [vmem:[%s185_s8 + $0x38] sm:$0xff]  ;;  %s2166_s26 = scalar_lea.hbm %s2165_s25, 8  ;;  %p2171_p3 = scmp.lt.s32.totalorder %s2165_s25, %s3299_s3 }
  0x1e   : > { %281 = vperm.xlu2 %1927, %v262_v3   ;;  %v263_v6 = vld [vmem:[%s185_s8 + $0x28] sm:$0xff]  ;;  %v264_v8 = vld [vmem:[%s185_s8 + $0x30] sm:$0xff]  ;;  %549 = vmatpush.msrb.mxu1 %v2332_v18  ;;  %v2353_v25 = vld [vmem:[#allocation3 + $0x180] sm:$0xff]  ;;  %s1831_s8 = sshll.u32 %s178_s7, 3  ;;  %p2167_p0 = scmp.ne.s32.totalorder %s2165_s25, %s2166_s26 }
  0x1f   : > { %530 = vmatpush.msrb.mxu0 %v2334_v19  ;;  %589 = vmatpush.msrb.mxu3 %v2342_v21  ;;  %v2355_v26 = vld [vmem:[#allocation3 + $0x188] sm:$0xff]  ;;  %v2363_v28 = vld [vmem:[#allocation3 + $0x160] sm:$0xff]  ;;  %v2367_v30 = vld [vmem:[#allocation3 + $0x1f0] sm:$0xff]  ;;  %s180_s19 = scalar_lea.vmem [#allocation6], %s1831_s8  ;;  %p2172_p4 = scmp.lt.s32.totalorder %s2170_s29, %s2166_s26 }
  0x20   : > { %550 = vmatpush.msrb.mxu1 %v2338_v20  ;;  %v2365_v29 = vld [vmem:[#allocation3 + $0x168] sm:$0xff]  ;;  %v2371_v31 = vld [vmem:[#allocation3 + $0x198] sm:$0xff]  ;;  %v2373_v32 = vld [vmem:[#allocation3 + $0x140] sm:$0xff]  ;;  %569 = vmatpush.msrb.mxu2 %v2367_v30  ;;  %s1751_s20 = sshll.u32 %s180_s19, 4  ;;  %p2168_p1 = pnand %p2167_p0, %p2281_p5  ;;  %s1752_s20 = int_to_ptr.vmem [resolvable:$true] %s1751_s20 }
  0x21   : > { %531 = vmatpush.msrb.mxu0 %v2345_v22  ;;  %590 = vmatpush.msrb.mxu3 %v2349_v24  ;;  %v2375_v33 = vld [vmem:[#allocation3 + $0x148] sm:$0xff]  ;;  %v2379_v34 = vld [vmem:[#allocation3 + $0x1d0] sm:$0xff]  ;;  %v2381_v35 = vld [vmem:[#allocation3 + $0x178] sm:$0xff]  ;;  %p2173_p7 = por %p2172_p4, %p2171_p3 }
  0x22   : > { %551 = vmatpush.msrb.mxu1 %v2347_v23  ;;  %570 = vmatpush.msrb.mxu2 %v2379_v34  ;;  %v2387_v37 = vld [vmem:[#allocation3 + $0x120] sm:$0xff]  ;;  %v2389_v38 = vld [vmem:[#allocation3 + $0x128] sm:$0xff]  ;;  %v2391_v39 = vld [vmem:[#allocation3 + $0x1b0] sm:$0xff]  ;;  %p2169_p2 = pneg %p2168_p1 }
  0x23   : > { %532 = vmatpush.msrb.mxu0 %v2353_v25  ;;  %591 = vmatpush.msrb.mxu3 %v2360_v27  ;;  %v2397_v41 = vld [vmem:[#allocation3 + $0x158] sm:$0xff]  ;;  %v2399_v42 = vld [vmem:[#allocation3 + $0x100] sm:$0xff]  ;;  %v2401_v43 = vld [vmem:[#allocation3 + $0x108] sm:$0xff] }
  0x24   : > { %552 = vmatpush.msrb.mxu1 %v2355_v26  ;;  %571 = vmatpush.msrb.mxu2 %v2391_v39  ;;  %v2405_v44 = vld [vmem:[#allocation3 + $0x190] sm:$0xff]  ;;  %v2407_v45 = vld [vmem:[#allocation3 + $0x138] sm:$0xff]  ;;  %v2419_v49 = vld [vmem:[#allocation3 + $0xe0] sm:$0xff]  ;;  %p2174_p8 = pnand %p2173_p7, %p2169_p2 }
  0x25   : > { %278 = vperm.xlu1 %1926, %v261_v4   ;;  %272 = vperm.xlu0 %1925, %v259_v5   ;;  %v2421_v50 = vld [vmem:[#allocation3 + $0xe8] sm:$0xff]  ;;  %v2423_v51 = vld [vmem:[#allocation3 + $0x170] sm:$0xff]  ;;  %v2427_v52 = vld [vmem:[#allocation3 + $0x118] sm:$0xff] }
  0x26   : > { %284 = vperm.xlu2 %1927, %v263_v6   ;;  %533 = vmatpush.msrb.mxu0 %v2363_v28  ;;  %v2429_v53 = vld [vmem:[#allocation3 + $0xc0] sm:$0xff]  ;;  %v2431_v54 = vld [vmem:[#allocation3 + $0xc8] sm:$0xff]  ;;  %v2435_v55 = vld [vmem:[#allocation3 + $0x150] sm:$0xff] }
  0x27   : > { %553 = vmatpush.msrb.mxu1 %v2365_v29  ;;  %592 = vmatpush.msrb.mxu3 %v2371_v31  ;;  %v2437_v56 = vld [vmem:[#allocation3 + $0xf8] sm:$0xff]  ;;  %v2449_v60 = vld [vmem:[#allocation3 + $0xa0] sm:$0xff]  ;;  %v2451_v61 = vld [vmem:[#allocation3 + $0xa8] sm:$0xff] }
  0x28   : > { %534 = vmatpush.msrb.mxu0 %v2373_v32  ;;  %572 = vmatpush.msrb.mxu2 %v2405_v44  ;;  %3406 = vst [vmem:[#allocation10_spill] sm:$0xff] %v2449_v60  ;;  %v2453_v62 = vld [vmem:[#allocation3 + $0x130] sm:$0xff]  ;;  %v2458_v63 = vld [vmem:[#allocation3 + $0xd8] sm:$0xff]  ;;  %v2460_v0 = vld [vmem:[#allocation3 + $0x80] sm:$0xff] }
  0x29   : > { %554 = vmatpush.msrb.mxu1 %v2375_v33  ;;  %593 = vmatpush.msrb.mxu3 %v2381_v35  ;;  %3407 = vst [vmem:[#allocation11_spill] sm:$0xff] %v2451_v61  ;;  %v2462_v1 = vld [vmem:[#allocation3 + $0x88] sm:$0xff]  ;;  %v2466_v2 = vld [vmem:[#allocation3 + $0x110] sm:$0xff]  ;;  %v2468_v3 = vld [vmem:[#allocation3 + $0xb8] sm:$0xff] }
  0x2a   : > { %535 = vmatpush.msrb.mxu0 %v2387_v37  ;;  %573 = vmatpush.msrb.mxu2 %v2423_v51  ;;  %3408 = vst [vmem:[#allocation12_spill] sm:$0xff] %v2458_v63  ;;  %v2479_v5 = vld [vmem:[#allocation3 + $0x60] sm:$0xff]  ;;  %v2481_v6 = vld [vmem:[#allocation3 + $0x68] sm:$0xff]  ;;  %v2489_v9 = vld [vmem:[#allocation3 + $0xd0] sm:$0xff] }
  0x2b   : > { %555 = vmatpush.msrb.mxu1 %v2389_v38  ;;  %594 = vmatpush.msrb.mxu3 %v2397_v41  ;;  %3409 = vst [vmem:[#allocation13_spill] sm:$0xff] %v2460_v0  ;;  %v2491_v10 = vld [vmem:[#allocation3 + $0x40] sm:$0xff]  ;;  %v2495_v12 = vld [vmem:[#allocation3 + $0x48] sm:$0xff]  ;;  %v2497_v13 = vld [vmem:[#allocation3 + $0x78] sm:$0xff] }
  0x2c   : > { %536 = vmatpush.msrb.mxu0 %v2399_v42  ;;  %574 = vmatpush.msrb.mxu2 %v2435_v55  ;;  %3410 = vst [vmem:[#allocation14_spill] sm:$0xff] %v2462_v1  ;;  %v2502_v14 = vld [vmem:[#allocation3 + $0xb0] sm:$0xff] }
  0x2d   : > { %290 = vperm.xlu1 %1926, %v265_v7   ;;  %287 = vperm.xlu0 %1925, %v264_v8   ;;  %3411 = vst [vmem:[#allocation15_spill] sm:$0xff] %v2468_v3  ;;  %v2483_v7 = vld [vmem:[#allocation3 + $0xf0] sm:$0xff]  ;;  %v2487_v8 = vld [vmem:[#allocation3 + $0x98] sm:$0xff] }
  0x2e   : > { %556 = vmatpush.msrb.mxu1 %v2401_v43  ;;  %595 = vmatpush.msrb.mxu3 %v2407_v45  ;;  %3412 = vst [vmem:[#allocation16_spill] sm:$0xff] %v2479_v5  ;;  %v2508_v36 = vld [vmem:[#allocation3 + $0x90] sm:$0xff] }
  0x2f   : > { %537 = vmatpush.msrb.mxu0 %v2419_v49  ;;  %575 = vmatpush.msrb.mxu2 %v2453_v62  ;;  %3413 = vst [vmem:[#allocation17_spill] sm:$0xff] %v2481_v6 }
  0x30   : > { %557 = vmatpush.msrb.mxu1 %v2421_v50  ;;  %596 = vmatpush.msrb.mxu3 %v2427_v52  ;;  %3414 = vst [vmem:[#allocation18_spill] sm:$0xff] %v2487_v8 }
  0x31   : > { %538 = vmatpush.msrb.mxu0 %v2429_v53  ;;  %576 = vmatpush.msrb.mxu2 %v2466_v2  ;;  %3415 = vst [vmem:[#allocation19_spill] sm:$0xff] %v2489_v9 }
  0x32   : > { %558 = vmatpush.msrb.mxu1 %v2431_v54  ;;  %597 = vmatpush.msrb.mxu3 %v2437_v56  ;;  %3416 = vst [vmem:[#allocation20_spill] sm:$0xff] %v2491_v10 }
  0x33   : > { %539 = vmatpush.msrb.mxu0 %v2449_v60  ;;  %577 = vmatpush.msrb.mxu2 %v2483_v7  ;;  %3417 = vst [vmem:[#allocation21_spill] sm:$0xff] %v2495_v12 }
  0x34   : > { %559 = vmatpush.msrb.mxu1 %v2451_v61  ;;  %598 = vmatpush.msrb.mxu3 %v2458_v63  ;;  %3418 = vst [vmem:[#allocation22_spill] sm:$0xff] %v2497_v13 }
  0x35   : > { %540 = vmatpush.msrb.mxu0 %v2460_v0  ;;  %3419 = vst [vmem:[#allocation23_spill] sm:$0xff] %v2502_v14  ;;  %578 = vmatpush.msrb.mxu2 %v2489_v9 }
  0x36   : > { %560 = vmatpush.msrb.mxu1 %v2462_v1  ;;  %599 = vmatpush.msrb.mxu3 %v2468_v3  ;;  %3420 = vst [vmem:[#allocation24_spill] sm:$0xff] %v2508_v36 }
  0x37   : > { %541 = vmatpush.msrb.mxu0 %v2479_v5  ;;  %579 = vmatpush.msrb.mxu2 %v2502_v14 }
  0x38   : > { %561 = vmatpush.msrb.mxu1 %v2481_v6  ;;  %600 = vmatpush.msrb.mxu3 %v2487_v8 }
  0x39   : > { %542 = vmatpush.msrb.mxu0 %v2491_v10  ;;  %580 = vmatpush.msrb.mxu2 %v2508_v36 }
  0x3a   : > { %562 = vmatpush.msrb.mxu1 %v2495_v12  ;;  %601 = vmatpush.msrb.mxu3 %v2497_v13 }
  0x78   : > { %v282_v16 = vpop.permute.xlu2 %281 }
  0x79   : > { %vm296_vm5 = vcmp.eq.s32.totalorder %v282_v16, %v2393_v40  ;;  %v2537_v16 = vld [vmem:[#allocation3 + $0x18] sm:$0xff] }
  0x7a   : > { %3429 = vst [vmem:[#allocation33_spill] sm:$0xff] %v2537_v16 }
  0x8f   : > { %v270_v46 = vpop.permute.xlu0 %269  ;;  %v276_v59 = vpop.permute.xlu1 %275 }
  0x90   : > { %vm292_vm1 = vcmp.eq.s32.totalorder %v270_v46, %v2393_v40  ;;  %vm294_vm3 = vcmp.eq.s32.totalorder %v276_v59, %v2393_v40  ;;  %v2514_v46 = vld [vmem:[#allocation3 + $0x20] sm:$0xff] }
  0x91   : > { %v300_v48 = vsel %vm292_vm1, 1.0, %v3306_v47  ;;  %v302_v4 = vsel %vm294_vm3, 1.0, %v3306_v47  ;;  %3421 = vst [vmem:[#allocation25_spill] sm:$0xff] %v2514_v46  ;;  %543 = vmatpush.msrb.mxu0 %v2514_v46  ;;  %v2525_v59 = vld [vmem:[#allocation3] sm:$0xff]  ;;  %v304_v46 = vsel %vm296_vm5, 1.0, %v3306_v47 }
  0x92   : > { %1834 = vmatmul.msk.f32.vlgmr.msra.gmra.mxu0 %vm308_vm0, %v300_v48  ;;  %1842 = vmatmul.msk.f32.vlgmr.msra.gmra.mxu1 %vm308_vm0, %v300_v48  ;;  %3425 = vst [vmem:[#allocation29_spill] sm:$0xff] %v2525_v59 }
  0x93   : > { %1850 = vmatmul.msk.f32.vlgmr.msra.gmra.mxu2 %vm308_vm0, %v300_v48  ;;  %1858 = vmatmul.msk.f32.vlgmr.msra.gmra.mxu3 %vm308_vm0, %v300_v48  ;;  %v2516_v48 = vld [vmem:[#allocation3 + $0x28] sm:$0xff] }
  0x94   : > { %3422 = vst [vmem:[#allocation26_spill] sm:$0xff] %v2516_v48  ;;  %563 = vmatpush.msrb.mxu1 %v2516_v48  ;;  %544 = vmatpush.msrb.mxu0 %v2525_v59  ;;  %v2544_v48 = vld [vmem:[#allocation3 + $0x30] sm:$0xff]  ;;  %v285_v59 = vpop.permute.xlu2 %284 }
  0x95   : > { %3430 = vst [vmem:[#allocation34_spill] sm:$0xff] %v2544_v48  ;;  %vm297_vm6 = vcmp.eq.s32.totalorder %v285_v59, %v2393_v40 }
  0x96   : > { %680 = vmatpush.msra.mxu0 %v2330_v17 }
  0x97   : > { %v273_v57 = vpop.permute.xlu0 %272  ;;  %v279_v11 = vpop.permute.xlu1 %278 }
  0x98   : > { %vm293_vm2 = vcmp.eq.s32.totalorder %v273_v57, %v2393_v40  ;;  %vm295_vm4 = vcmp.eq.s32.totalorder %v279_v11, %v2393_v40  ;;  %v2518_v57 = vld [vmem:[#allocation3 + $0x70] sm:$0xff]  ;;  %v2531_v11 = vld [vmem:[#allocation3 + $0x8] sm:$0xff]  ;;  %681 = vmatpush.msra.mxu0 %v2334_v19 }
  0x99   : > { %v301_v58 = vsel %vm293_vm2, 1.0, %v3306_v47  ;;  %v303_v15 = vsel %vm295_vm4, 1.0, %v3306_v47  ;;  %3423 = vst [vmem:[#allocation27_spill] sm:$0xff] %v2518_v57  ;;  %581 = vmatpush.msrb.mxu2 %v2518_v57  ;;  %564 = vmatpush.msrb.mxu1 %v2531_v11  ;;  %v2552_v47 = vld [vmem:[#allocation3 + $0x10] sm:$0xff] }
  0x9a   : > { %1835 = vmatmul.msk.f32.gmra.mxu0 %vm308_vm0, %v301_v58  ;;  %1843 = vmatmul.msk.f32.gmra.mxu1 %vm308_vm0, %v301_v58  ;;  %3427 = vst [vmem:[#allocation31_spill] sm:$0xff] %v2531_v11 }
  0x9b   : > { %1851 = vmatmul.msk.f32.gmra.mxu2 %vm308_vm0, %v301_v58  ;;  %1859 = vmatmul.msk.f32.gmra.mxu3 %vm308_vm0, %v301_v58  ;;  %v2523_v58 = vld [vmem:[#allocation3 + $0x58] sm:$0xff]  ;;  %3431 = vst [vmem:[#allocation35_spill] sm:$0xff] %v2552_v47 }
  0x9c   : > { %3424 = vst [vmem:[#allocation28_spill] sm:$0xff] %v2523_v58  ;;  %602 = vmatpush.msrb.mxu3 %v2523_v58  ;;  %700 = vmatpush.msra.mxu1 %v2332_v18 }
  0x9d   : > { %682 = vmatpush.msra.mxu0 %v2345_v22 }
  0x9e   : > { %701 = vmatpush.msra.mxu1 %v2338_v20 }
  0x9f   : > { %683 = vmatpush.msra.mxu0 %v2353_v25  ;;  %v288_v59 = vpop.permute.xlu0 %287 }
  0xa0   : > { %702 = vmatpush.msra.mxu1 %v2347_v23  ;;  %vm298_vm7 = vcmp.eq.s32.totalorder %v288_v59, %v2393_v40  ;;  %v291_v59 = vpop.permute.xlu1 %290 }
  0xa1   : > { %684 = vmatpush.msra.mxu0 %v2363_v28  ;;  %vm299_vm8 = vcmp.eq.s32.totalorder %v291_v59, %v2393_v40  ;;  %v3433_v40 = vld [vmem:[#allocation25_spill] sm:$0xff]  ;;  %v3434_v59 = vld [vmem:[#allocation26_spill] sm:$0xff] }
  0xa2   : > { %1836 = vmatmul.msk.f32.gmra.mxu0 %vm308_vm0, %v302_v4  ;;  %1844 = vmatmul.msk.f32.gmra.mxu1 %vm308_vm0, %v302_v4 }
  0xa3   : > { %1852 = vmatmul.msk.f32.gmra.mxu2 %vm308_vm0, %v302_v4  ;;  %1860 = vmatmul.msk.f32.gmra.mxu3 %vm308_vm0, %v302_v4  ;;  %v2529_v4 = vld [vmem:[#allocation3 + $0x50] sm:$0xff] }
  0xa4   : > { %3426 = vst [vmem:[#allocation30_spill] sm:$0xff] %v2529_v4  ;;  %582 = vmatpush.msrb.mxu2 %v2529_v4  ;;  %703 = vmatpush.msra.mxu1 %v2355_v26 }
  0xa5   : > { %685 = vmatpush.msra.mxu0 %v2373_v32 }
  0xa6   : > { %583 = vmatpush.msrb.mxu2 %v2544_v48  ;;  %704 = vmatpush.msra.mxu1 %v2365_v29 }
  0xa7   : > { %686 = vmatpush.msra.mxu0 %v2387_v37 }
  0xa8   : > { %584 = vmatpush.msrb.mxu2 %v2552_v47  ;;  %705 = vmatpush.msra.mxu1 %v2375_v33 }
  0xa9   : > { %687 = vmatpush.msra.mxu0 %v2399_v42 }
  0xaa   : > { %1837 = vmatmul.msk.f32.gmra.mxu0 %vm308_vm0, %v303_v15  ;;  %1845 = vmatmul.msk.f32.gmra.mxu1 %vm308_vm0, %v303_v15 }
  0xab   : > { %1853 = vmatmul.msk.f32.gmra.mxu2 %vm308_vm0, %v303_v15  ;;  %1861 = vmatmul.msk.f32.gmra.mxu3 %vm308_vm0, %v303_v15  ;;  %v2533_v15 = vld [vmem:[#allocation3 + $0x38] sm:$0xff] }
  0xac   : > { %3428 = vst [vmem:[#allocation32_spill] sm:$0xff] %v2533_v15  ;;  %603 = vmatpush.msrb.mxu3 %v2533_v15  ;;  %720 = vmatpush.msra.mxu2 %v2367_v30 }
  0xad   : > { %706 = vmatpush.msra.mxu1 %v2389_v38  ;;  %688 = vmatpush.msra.mxu0 %v2419_v49 }
  0xae   : > { %604 = vmatpush.msrb.mxu3 %v2537_v16  ;;  %721 = vmatpush.msra.mxu2 %v2379_v34 }
  0xaf   : > { %707 = vmatpush.msra.mxu1 %v2401_v43  ;;  %689 = vmatpush.msra.mxu0 %v2429_v53 }
  0xb0   : > { %740 = vmatpush.msra.mxu3 %v2342_v21  ;;  %722 = vmatpush.msra.mxu2 %v2391_v39 }
  0xb1   : > { %708 = vmatpush.msra.mxu1 %v2421_v50  ;;  %690 = vmatpush.msra.mxu0 %v2449_v60 }
  0xb2   : > { %1838 = vmatmul.msk.f32.gmra.mxu0 %vm308_vm0, %v304_v46  ;;  %1846 = vmatmul.msk.f32.gmra.mxu1 %vm308_vm0, %v304_v46 }
  0xb3   : > { %1854 = vmatmul.msk.f32.gmra.mxu2 %vm308_vm0, %v304_v46  ;;  %1862 = vmatmul.msk.f32.gmra.mxu3 %vm308_vm0, %v304_v46  ;;  %v3432_v46 = vmov 0.0  }
  0xb4   : > { %741 = vmatpush.msra.mxu3 %v2349_v24  ;;  %v305_v21 = vsel %vm297_vm6, 1.0, %v3432_v46  ;;  %723 = vmatpush.msra.mxu2 %v2405_v44 }
  0xb5   : > { %709 = vmatpush.msra.mxu1 %v2431_v54  ;;  %691 = vmatpush.msra.mxu0 %v2460_v0 }
  0xb6   : > { %742 = vmatpush.msra.mxu3 %v2360_v27  ;;  %724 = vmatpush.msra.mxu2 %v2423_v51 }
  0xb7   : > { %710 = vmatpush.msra.mxu1 %v2451_v61  ;;  %692 = vmatpush.msra.mxu0 %v2479_v5 }
  0xb8   : > { %743 = vmatpush.msra.mxu3 %v2371_v31  ;;  %725 = vmatpush.msra.mxu2 %v2435_v55 }
  0xb9   : > { %711 = vmatpush.msra.mxu1 %v2462_v1  ;;  %693 = vmatpush.msra.mxu0 %v2491_v10 }
  0xba   : > { %1839 = vmatmul.msk.f32.gmra.mxu0 %vm308_vm0, %v305_v21  ;;  %1847 = vmatmul.msk.f32.gmra.mxu1 %vm308_vm0, %v305_v21 }
  0xbb   : > { %1855 = vmatmul.msk.f32.gmra.mxu2 %vm308_vm0, %v305_v21  ;;  %1863 = vmatmul.msk.f32.gmra.mxu3 %vm308_vm0, %v305_v21  ;;  %v306_v21 = vsel %vm298_vm7, 1.0, %v3432_v46 }
  0xbc   : > { %744 = vmatpush.msra.mxu3 %v2381_v35  ;;  %726 = vmatpush.msra.mxu2 %v2453_v62 }
  0xbd   : > { %712 = vmatpush.msra.mxu1 %v2481_v6  ;;  %694 = vmatpush.msra.mxu0 %v3433_v40 }
  0xbe   : > { %745 = vmatpush.msra.mxu3 %v2397_v41  ;;  %727 = vmatpush.msra.mxu2 %v2466_v2 }
  0xbf   : > { %713 = vmatpush.msra.mxu1 %v2495_v12 }
  0xc0   : > { %746 = vmatpush.msra.mxu3 %v2407_v45  ;;  %728 = vmatpush.msra.mxu2 %v2483_v7 }
  0xc1   : > { %714 = vmatpush.msra.mxu1 %v3434_v59 }
  0xc2   : > { %1840 = vmatmul.msk.f32.gmra.mxu0 %vm308_vm0, %v306_v21  ;;  %1848 = vmatmul.msk.f32.gmra.mxu1 %vm308_vm0, %v306_v21 }
  0xc3   : > { %1856 = vmatmul.msk.f32.gmra.mxu2 %vm308_vm0, %v306_v21  ;;  %1864 = vmatmul.msk.f32.gmra.mxu3 %vm308_vm0, %v306_v21  ;;  %v307_v21 = vsel %vm299_vm8, 1.0, %v3432_v46 }
  0xc4   : > { %747 = vmatpush.msra.mxu3 %v2427_v52  ;;  %729 = vmatpush.msra.mxu2 %v2489_v9 }
  0xc5   : > { %715 = vmatpush.msra.mxu1 %v2531_v11 }
  0xc6   : > { %748 = vmatpush.msra.mxu3 %v2437_v56  ;;  %730 = vmatpush.msra.mxu2 %v2502_v14 }
  0xc8   : > { %749 = vmatpush.msra.mxu3 %v2458_v63  ;;  %731 = vmatpush.msra.mxu2 %v2508_v36 }
  0xca   : > { %1841 = vmatmul.msk.f32.gmra.mxu0 %vm308_vm0, %v307_v21  ;;  %1849 = vmatmul.msk.f32.gmra.mxu1 %vm308_vm0, %v307_v21 }
  0xcb   : > { %1857 = vmatmul.msk.f32.gmra.mxu2 %vm308_vm0, %v307_v21  ;;  %1865 = vmatmul.msk.f32.gmra.mxu3 %vm308_vm0, %v307_v21  ;;  %v3436_v21 = vld [vmem:[#allocation9_spill] sm:$0xff] }
  0xcc   : > { %750 = vmatpush.msra.mxu3 %v2468_v3  ;;  %732 = vmatpush.msra.mxu2 %v2518_v57 }
  0xce   : > { %751 = vmatpush.msra.mxu3 %v2487_v8  ;;  %733 = vmatpush.msra.mxu2 %v2529_v4 }
  0xd0   : > { %752 = vmatpush.msra.mxu3 %v2497_v13  ;;  %734 = vmatpush.msra.mxu2 %v2544_v48 }
  0xd2   : > { %545 = vmatmul.f32.vlgmr.msrb.gmra.mxu0 %v3432_v46  ;;  %565 = vmatmul.f32.vlgmr.msrb.gmra.mxu1 %v3432_v46 }
  0xd3   : > { %585 = vmatmul.f32.vlgmr.msrb.gmra.mxu2 %v3432_v46  ;;  %605 = vmatmul.f32.vlgmr.msrb.gmra.mxu3 %v3432_v46  ;;  %v3435_v46 = vld [vmem:[#allocation29_spill] sm:$0xff] }
  0xd4   : > { %753 = vmatpush.msra.mxu3 %v2523_v58  ;;  %695 = vmatpush.msra.mxu0 %v3435_v46 }
  0xd5   : > { %735 = vmatpush.msra.mxu2 %v2552_v47  ;;  %851 = vmatpush.msrb.mxu1 %v2332_v18 }
  0xd6   : > { %754 = vmatpush.msra.mxu3 %v2533_v15  ;;  %831 = vmatpush.msrb.mxu0 %v2330_v17 }
  0xd7   : > { %871 = vmatpush.msrb.mxu2 %v2367_v30  ;;  %852 = vmatpush.msrb.mxu1 %v2338_v20 }
  0xd8   : > { %755 = vmatpush.msra.mxu3 %v2537_v16  ;;  %832 = vmatpush.msrb.mxu0 %v2334_v19 }
  0xd9   : > { %872 = vmatpush.msrb.mxu2 %v2379_v34  ;;  %853 = vmatpush.msrb.mxu1 %v2347_v23 }
  0xda   : > { %891 = vmatpush.msrb.mxu3 %v3436_v21  ;;  %833 = vmatpush.msrb.mxu0 %v2345_v22 }
  0xdb   : > { %873 = vmatpush.msrb.mxu2 %v2391_v39  ;;  %854 = vmatpush.msrb.mxu1 %v2355_v26 }
  0xdc   : > { %892 = vmatpush.msrb.mxu3 %v2349_v24  ;;  %834 = vmatpush.msrb.mxu0 %v2353_v25 }
  0xdd   : > { %874 = vmatpush.msrb.mxu2 %v2405_v44  ;;  %855 = vmatpush.msrb.mxu1 %v2365_v29 }
  0xde   : > { %893 = vmatpush.msrb.mxu3 %v2360_v27  ;;  %835 = vmatpush.msrb.mxu0 %v2363_v28 }
  0xdf   : > { %875 = vmatpush.msrb.mxu2 %v2423_v51  ;;  %856 = vmatpush.msrb.mxu1 %v2375_v33 }
  0xe0   : > { %894 = vmatpush.msrb.mxu3 %v2371_v31  ;;  %836 = vmatpush.msrb.mxu0 %v2373_v32 }
  0xe1   : > { %876 = vmatpush.msrb.mxu2 %v2435_v55  ;;  %857 = vmatpush.msrb.mxu1 %v2389_v38 }
  0xe2   : > { %895 = vmatpush.msrb.mxu3 %v2381_v35  ;;  %837 = vmatpush.msrb.mxu0 %v2387_v37 }
  0xe3   : > { %877 = vmatpush.msrb.mxu2 %v2453_v62  ;;  %858 = vmatpush.msrb.mxu1 %v2401_v43 }
  0xe4   : > { %896 = vmatpush.msrb.mxu3 %v2397_v41  ;;  %838 = vmatpush.msrb.mxu0 %v2399_v42 }
  0xe5   : > { %878 = vmatpush.msrb.mxu2 %v2466_v2  ;;  %859 = vmatpush.msrb.mxu1 %v2421_v50 }
  0xe6   : > { %897 = vmatpush.msrb.mxu3 %v2407_v45  ;;  %839 = vmatpush.msrb.mxu0 %v2419_v49 }
  0xe7   : > { %879 = vmatpush.msrb.mxu2 %v2483_v7  ;;  %860 = vmatpush.msrb.mxu1 %v2431_v54 }
  0xe8   : > { %898 = vmatpush.msrb.mxu3 %v2427_v52  ;;  %840 = vmatpush.msrb.mxu0 %v2429_v53 }
  0xe9   : > { %880 = vmatpush.msrb.mxu2 %v2489_v9  ;;  %861 = vmatpush.msrb.mxu1 %v2451_v61 }
  0xea   : > { %899 = vmatpush.msrb.mxu3 %v2437_v56  ;;  %841 = vmatpush.msrb.mxu0 %v2449_v60 }
  0xeb   : > { %881 = vmatpush.msrb.mxu2 %v2502_v14  ;;  %862 = vmatpush.msrb.mxu1 %v2462_v1 }
  0xec   : > { %900 = vmatpush.msrb.mxu3 %v2458_v63  ;;  %842 = vmatpush.msrb.mxu0 %v2460_v0 }
  0xed   : > { %882 = vmatpush.msrb.mxu2 %v2508_v36  ;;  %863 = vmatpush.msrb.mxu1 %v2481_v6 }
  0xee   : > { %901 = vmatpush.msrb.mxu3 %v2468_v3  ;;  %843 = vmatpush.msrb.mxu0 %v2479_v5 }
  0xef   : > { %883 = vmatpush.msrb.mxu2 %v2518_v57  ;;  %864 = vmatpush.msrb.mxu1 %v2495_v12 }
  0xf0   : > { %902 = vmatpush.msrb.mxu3 %v2487_v8  ;;  %844 = vmatpush.msrb.mxu0 %v2491_v10 }
  0xf1   : > { %884 = vmatpush.msrb.mxu2 %v2529_v4  ;;  %865 = vmatpush.msrb.mxu1 %v3434_v59 }
  0xf2   : > { %903 = vmatpush.msrb.mxu3 %v2497_v13  ;;  %845 = vmatpush.msrb.mxu0 %v3433_v40 }
  0xf3   : > { %885 = vmatpush.msrb.mxu2 %v2544_v48  ;;  %866 = vmatpush.msrb.mxu1 %v2531_v11 }
  0xf4   : > { %904 = vmatpush.msrb.mxu3 %v2523_v58  ;;  %846 = vmatpush.msrb.mxu0 %v3435_v46 }
  0xf5   : > { %886 = vmatpush.msrb.mxu2 %v2552_v47 }
  0xf6   : > { %905 = vmatpush.msrb.mxu3 %v2533_v15 }
  0xf8   : > { %906 = vmatpush.msrb.mxu3 %v2537_v16 }
 0x10f   : > { %v350_v12 = vpop.f32.mrf.mxu0  ;;  %v391_v4 = vpop.f32.mrf.mxu1 }
 0x116   : > { %v432_v10 = vpop.f32.mrf.mxu2  ;;  %v473_v58 = vpop.f32.mrf.mxu3 }
 0x117   : > { %v2704_v13 = vpop.f32.mrf.mxu0  ;;  %v2706_v40 = vpop.f32.mrf.mxu1 }
 0x118   : > { %3437 = vst [vmem:[#allocation9_spill] sm:$0xff] %v2704_v13 }
 0x119   : > { %3438 = vst [vmem:[#allocation36_spill] sm:$0xff] %v2706_v40 }
 0x11e   : > { %v2708_v59 = vpop.f32.mrf.mxu2  ;;  %v2710_v48 = vpop.f32.mrf.mxu3 }
 0x11f   : > { %3439 = vst [vmem:[#allocation37_spill] sm:$0xff] %v2708_v59  ;;  %v2712_v15 = vpop.f32.mrf.mxu0  ;;  %v2714_v46 = vpop.f32.mrf.mxu1 }
 0x120   : > { %3440 = vst [vmem:[#allocation38_spill] sm:$0xff] %v2710_v48 }
 0x121   : > { %3441 = vst [vmem:[#allocation39_spill] sm:$0xff] %v2712_v15 }
 0x122   : > { %3442 = vst [vmem:[#allocation40_spill] sm:$0xff] %v2714_v46 }
 0x126   : > { %v2716_v11 = vpop.f32.mrf.mxu2  ;;  %v2718_v47 = vpop.f32.mrf.mxu3 }
 0x127   : > { %3443 = vst [vmem:[#allocation41_spill] sm:$0xff] %v2716_v11  ;;  %v2720_v16 = vpop.f32.mrf.mxu0  ;;  %v2722_v57 = vpop.f32.mrf.mxu1 }
 0x128   : > { %3444 = vst [vmem:[#allocation42_spill] sm:$0xff] %v2718_v47 }
 0x129   : > { %3445 = vst [vmem:[#allocation43_spill] sm:$0xff] %v2720_v16 }
 0x12a   : > { %3446 = vst [vmem:[#allocation44_spill] sm:$0xff] %v2722_v57 }
 0x12e   : > { %v2724_v6 = vpop.f32.mrf.mxu3  ;;  %v2730_v59 = vpop.f32.mrf.mxu2 }
 0x12f   : > { %3447 = vst [vmem:[#allocation45_spill] sm:$0xff] %v2724_v6  ;;  %v2726_v13 = vpop.f32.mrf.mxu0  ;;  %v2728_v40 = vpop.f32.mrf.mxu1 }
 0x130   : > { %3448 = vst [vmem:[#allocation46_spill] sm:$0xff] %v2726_v13 }
 0x131   : > { %3449 = vst [vmem:[#allocation47_spill] sm:$0xff] %v2728_v40 }
 0x132   : > { %3450 = vst [vmem:[#allocation48_spill] sm:$0xff] %v2730_v59 }
 0x136   : > { %v2732_v48 = vpop.f32.mrf.mxu3  ;;  %v2738_v11 = vpop.f32.mrf.mxu2 }
 0x137   : > { %3451 = vst [vmem:[#allocation49_spill] sm:$0xff] %v2732_v48  ;;  %v2734_v15 = vpop.f32.mrf.mxu0  ;;  %v2736_v46 = vpop.f32.mrf.mxu1 }
 0x138   : > { %3452 = vst [vmem:[#allocation50_spill] sm:$0xff] %v2734_v15 }
 0x139   : > { %3453 = vst [vmem:[#allocation51_spill] sm:$0xff] %v2736_v46 }
 0x13a   : > { %3454 = vst [vmem:[#allocation52_spill] sm:$0xff] %v2738_v11 }
 0x13e   : > { %v2740_v47 = vpop.f32.mrf.mxu3  ;;  %v2746_v6 = vpop.f32.mrf.mxu2 }
 0x13f   : > { %3455 = vst [vmem:[#allocation53_spill] sm:$0xff] %v2740_v47  ;;  %v2742_v16 = vpop.f32.mrf.mxu0  ;;  %v2744_v57 = vpop.f32.mrf.mxu1 }
 0x140   : > { %3456 = vst [vmem:[#allocation54_spill] sm:$0xff] %v2742_v16 }
 0x141   : > { %3457 = vst [vmem:[#allocation55_spill] sm:$0xff] %v2744_v57 }
 0x142   : > { %3458 = vst [vmem:[#allocation56_spill] sm:$0xff] %v2746_v6 }
 0x146   : > { %v2748_v13 = vpop.f32.mrf.mxu3  ;;  %v2754_v48 = vpop.f32.mrf.mxu2 }
 0x147   : > { %3459 = vst [vmem:[#allocation57_spill] sm:$0xff] %v2748_v13  ;;  %v2750_v40 = vpop.f32.mrf.mxu0  ;;  %v2752_v59 = vpop.f32.mrf.mxu1 }
 0x148   : > { %3460 = vst [vmem:[#allocation58_spill] sm:$0xff] %v2750_v40 }
 0x149   : > { %3461 = vst [vmem:[#allocation59_spill] sm:$0xff] %v2752_v59 }
 0x14a   : > { %3462 = vst [vmem:[#allocation60_spill] sm:$0xff] %v2754_v48 }
 0x14e   : > { %v2756_v15 = vpop.f32.mrf.mxu3  ;;  %v2758_v1 = vpop.f32.mrf.mxu2 }
 0x14f   : > { %3463 = vst [vmem:[#allocation61_spill] sm:$0xff] %v2756_v15  ;;  %v546_v46 = vpop.f32.mrf.mxu0  ;;  %v566_v11 = vpop.f32.mrf.mxu1 }
 0x150   : > { %v613_v5 = vadd.f32 %v546_v46, %v350_v12  ;;  %v614_v47 = vadd.f32 %v566_v11, %v391_v4  ;;  %3464 = vst [vmem:[#allocation62_spill] sm:$0xff] %v2758_v1 }
 0x152   : > { %v617_v8 = vsub.f32 0.0, %v613_v5  ;;  %v636_v16 = vsub.f32 0.0, %v614_v47 }
 0x154   : > { %v618_v36 = vmul.f32 1.442695, %v617_v8  ;;  %v637_v57 = vmul.f32 1.442695, %v636_v16 }
 0x156   : > { %1928 = vpow2.f32 %v618_v36  ;;  %v606_v6 = vpop.f32.mrf.mxu3  ;;  %v586_v12 = vpop.f32.mrf.mxu2 }
 0x157   : > { %1930 = vpow2.f32 %v637_v57  ;;  %v616_v13 = vadd.f32 %v606_v6, %v473_v58  ;;  %v615_v4 = vadd.f32 %v586_v12, %v432_v10 }
 0x159   : > { %v656_v40 = vsub.f32 0.0, %v616_v13 }
 0x15b   : > { %v657_v59 = vmul.f32 1.442695, %v656_v40 }
 0x15c   : > { %v1929_v0 = vpop.eup %1928 }
 0x15d   : > { %v1931_v48 = vpop.eup %1930  ;;  %v620_v3 = vadd.f32 1.0, %v1929_v0  ;;  %1932 = vpow2.f32 %v657_v59 }
 0x15e   : > { %v639_v15 = vadd.f32 1.0, %v1931_v48 }
 0x15f   : > { %1934 = vrcp.f32 %v620_v3  ;;  %v632_v13 = vand.u32 2147483648, %v620_v3  ;;  %v630_v0 = vand.u32 2147483647, %v620_v3  ;;  %vm626_vm11 = vweird.f32 %v620_v3 }
 0x160   : > { %1936 = vrcp.f32 %v639_v15  ;;  %v651_v16 = vand.u32 2147483648, %v639_v15  ;;  %v649_v59 = vand.u32 2147483647, %v639_v15  ;;  %vm645_vm12 = vweird.f32 %v639_v15 }
 0x161   : > { %v633_v10 = vor.u32 1.1754944e-38, %v632_v13  ;;  %vm631_vm14 = vcmp.eq.f32.partialorder %v630_v0, 8.507059e+37 }
 0x162   : > { %vm650_vm0 = vcmp.eq.f32.partialorder %v649_v59, 8.507059e+37 }
 0x163   : > { %v1933_v5 = vpop.eup %1932 }
 0x164   : > { %v659_v47 = vadd.f32 1.0, %v1933_v5 }
 0x165   : > { %v1935_v8 = vpop.eup %1934 }
 0x166   : > { %v1937_v36 = vpop.eup %1936  ;;  %v622_v11 = vmul.f32 %v1935_v8, %v620_v3  ;;  %1938 = vrcp.f32 %v659_v47  ;;  %vm627_vm9 = vweird.f32 %v1935_v8  ;;  %vm665_vm2 = vweird.f32 %v659_v47 }
 0x167   : > { %v641_v6 = vmul.f32 %v1937_v36, %v639_v15  ;;  %1940 = vtanh.f32 %v615_v4  ;;  %vm646_vm10 = vweird.f32 %v1937_v36  ;;  %vm628_vm13 = vmor %vm626_vm11, %vm627_vm9  ;;  %v671_v15 = vand.u32 2147483648, %v659_v47 }
 0x168   : > { %v623_v57 = vsub.f32 1.0, %v622_v11  ;;  %vm647_vm15 = vmor %vm645_vm12, %vm646_vm10  ;;  %v652_v11 = vor.u32 1.1754944e-38, %v651_v16 }
 0x169   : > { %v642_v58 = vsub.f32 1.0, %v641_v6  ;;  %v672_v13 = vor.u32 1.1754944e-38, %v671_v15 }
 0x16a   : > { %v624_v40 = vmul.f32 %v1935_v8, %v623_v57 }
 0x16b   : > { %v643_v48 = vmul.f32 %v1937_v36, %v642_v58 }
 0x16c   : > { %v1939_v46 = vpop.eup %1938  ;;  %v625_v1 = vadd.f32 %v1935_v8, %v624_v40 }
 0x16d   : > { %v644_v12 = vadd.f32 %v1937_v36, %v643_v48  ;;  %v661_v5 = vmul.f32 %v1939_v46, %v659_v47  ;;  %v1941_v4 = vpop.eup %1940  ;;  %vm666_vm1 = vweird.f32 %v1939_v46 }
 0x16e   : > { %v629_v14 = vsel %vm628_vm13, %v1935_v8, %v625_v1  ;;  %v669_v1 = vand.u32 2147483647, %v659_v47  ;;  %vm667_vm3 = vmor %vm665_vm2, %vm666_vm1 }
 0x16f   : > { %v634_v6 = vsel %vm631_vm14, %v633_v10, %v629_v14  ;;  %v648_v57 = vsel %vm647_vm15, %v1937_v36, %v644_v12  ;;  %v662_v61 = vsub.f32 1.0, %v661_v5 }
 0x170   : > { %v653_v58 = vsel %vm650_vm0, %v652_v11, %v648_v57  ;;  %v676_v60 = vmul.f32 %v1941_v4, %v634_v6  ;;  %vm670_vm4 = vcmp.eq.f32.partialorder %v669_v1, 8.507059e+37  ;;  %v3494_v6 = vld [vmem:[#allocation37_spill] sm:$0xff] }
 0x171   : > { %v675_v63 = vmul.f32 0.0, %v653_v58  ;;  %v663_v9 = vmul.f32 %v1939_v46, %v662_v61 }
 0x173   : > { %v2760_v40 = vadd.f32 %v676_v60, %v675_v63  ;;  %v664_v3 = vadd.f32 %v1939_v46, %v663_v9  ;;  %v3493_v9 = vld [vmem:[#allocation38_spill] sm:$0xff] }
 0x175   : > { %1942 = vtanh.f32 %v2760_v40  ;;  %v668_v8 = vsel %vm667_vm3, %v1939_v46, %v664_v3 }
 0x176   : > { %v673_v36 = vsel %vm670_vm4, %v672_v13, %v668_v8 }
 0x17b   : > { %v1943_v14 = vpop.eup %1942 }
 0x17c   : > { %v679_v16 = vmul.f32 %v1943_v14, %v673_v36 }
 0x17e   : > { %696 = vmatmul.f32.vlgmr.msra.gmra.mxu0 %v679_v16  ;;  %716 = vmatmul.f32.vlgmr.msra.gmra.mxu1 %v679_v16 }
 0x17f   : > { %736 = vmatmul.f32.vlgmr.msra.gmra.mxu2 %v679_v16  ;;  %756 = vmatmul.f32.vlgmr.msra.gmra.mxu3 %v679_v16 }
 0x180   : > { %982 = vmatpush.msra.mxu0 %v2330_v17  ;;  %1002 = vmatpush.msra.mxu1 %v2332_v18  ;;  %v3465_v17 = vld [vmem:[#allocation19_spill] sm:$0xff]  ;;  %v3466_v18 = vld [vmem:[#allocation12_spill] sm:$0xff] }
 0x181   : > { %1022 = vmatpush.msra.mxu2 %v2367_v30  ;;  %1042 = vmatpush.msra.mxu3 %v3436_v21  ;;  %v3477_v30 = vld [vmem:[#allocation27_spill] sm:$0xff] }
 0x182   : > { %983 = vmatpush.msra.mxu0 %v2334_v19  ;;  %1003 = vmatpush.msra.mxu1 %v2338_v20  ;;  %v3467_v19 = vld [vmem:[#allocation10_spill] sm:$0xff]  ;;  %v3468_v20 = vld [vmem:[#allocation11_spill] sm:$0xff] }
 0x183   : > { %1023 = vmatpush.msra.mxu2 %v2379_v34  ;;  %1043 = vmatpush.msra.mxu3 %v2349_v24  ;;  %v3471_v24 = vld [vmem:[#allocation13_spill] sm:$0xff]  ;;  %v3481_v34 = vld [vmem:[#allocation30_spill] sm:$0xff] }
 0x184   : > { %984 = vmatpush.msra.mxu0 %v2345_v22  ;;  %1004 = vmatpush.msra.mxu1 %v2347_v23  ;;  %v3469_v22 = vld [vmem:[#allocation23_spill] sm:$0xff] }
 0x185   : > { %1024 = vmatpush.msra.mxu2 %v2391_v39  ;;  %1044 = vmatpush.msra.mxu3 %v2360_v27  ;;  %v3470_v23 = vld [vmem:[#allocation15_spill] sm:$0xff]  ;;  %v3474_v27 = vld [vmem:[#allocation18_spill] sm:$0xff] }
 0x186   : > { %985 = vmatpush.msra.mxu0 %v2353_v25  ;;  %1005 = vmatpush.msra.mxu1 %v2355_v26  ;;  %v3472_v25 = vld [vmem:[#allocation14_spill] sm:$0xff]  ;;  %v3473_v26 = vld [vmem:[#allocation24_spill] sm:$0xff] }
 0x187   : > { %1025 = vmatpush.msra.mxu2 %v2405_v44  ;;  %1045 = vmatpush.msra.mxu3 %v2371_v31  ;;  %v3478_v31 = vld [vmem:[#allocation22_spill] sm:$0xff]  ;;  %v3489_v44 = vld [vmem:[#allocation35_spill] sm:$0xff] }
 0x188   : > { %986 = vmatpush.msra.mxu0 %v2363_v28  ;;  %1006 = vmatpush.msra.mxu1 %v2365_v29  ;;  %v3475_v28 = vld [vmem:[#allocation16_spill] sm:$0xff]  ;;  %v3476_v29 = vld [vmem:[#allocation17_spill] sm:$0xff]  ;;  %v3485_v39 = vld [vmem:[#allocation34_spill] sm:$0xff] }
 0x189   : > { %1026 = vmatpush.msra.mxu2 %v2423_v51  ;;  %1046 = vmatpush.msra.mxu3 %v2381_v35  ;;  %v3482_v35 = vld [vmem:[#allocation28_spill] sm:$0xff]  ;;  %v3491_v51 = vld [vmem:[#allocation9_spill] sm:$0xff] }
 0x18a   : > { %987 = vmatpush.msra.mxu0 %v2373_v32  ;;  %1007 = vmatpush.msra.mxu1 %v2375_v33  ;;  %v3479_v32 = vld [vmem:[#allocation20_spill] sm:$0xff]  ;;  %v3480_v33 = vld [vmem:[#allocation21_spill] sm:$0xff] }
 0x18b   : > { %1027 = vmatpush.msra.mxu2 %v2435_v55  ;;  %1047 = vmatpush.msra.mxu3 %v2397_v41  ;;  %v3486_v41 = vld [vmem:[#allocation32_spill] sm:$0xff] }
 0x18c   : > { %988 = vmatpush.msra.mxu0 %v2387_v37  ;;  %1008 = vmatpush.msra.mxu1 %v2389_v38  ;;  %v3483_v37 = vld [vmem:[#allocation25_spill] sm:$0xff]  ;;  %v3484_v38 = vld [vmem:[#allocation26_spill] sm:$0xff] }
 0x18d   : > { %1028 = vmatpush.msra.mxu2 %v2453_v62  ;;  %1048 = vmatpush.msra.mxu3 %v2407_v45  ;;  %v3490_v45 = vld [vmem:[#allocation33_spill] sm:$0xff] }
 0x18e   : > { %989 = vmatpush.msra.mxu0 %v2399_v42  ;;  %1009 = vmatpush.msra.mxu1 %v2401_v43  ;;  %v3487_v42 = vld [vmem:[#allocation29_spill] sm:$0xff]  ;;  %v3488_v43 = vld [vmem:[#allocation31_spill] sm:$0xff] }
 0x18f   : > { %1029 = vmatpush.msra.mxu2 %v2466_v2  ;;  %1049 = vmatpush.msra.mxu3 %v2427_v52 }
 0x190   : > { %990 = vmatpush.msra.mxu0 %v2419_v49  ;;  %1010 = vmatpush.msra.mxu1 %v2421_v50 }
 0x191   : > { %1030 = vmatpush.msra.mxu2 %v2483_v7  ;;  %1050 = vmatpush.msra.mxu3 %v2437_v56 }
 0x192   : > { %991 = vmatpush.msra.mxu0 %v2429_v53  ;;  %1011 = vmatpush.msra.mxu1 %v2431_v54  ;;  %v3492_v53 = vld [vmem:[#allocation36_spill] sm:$0xff] }
 0x193   : > { %1031 = vmatpush.msra.mxu2 %v3465_v17  ;;  %1051 = vmatpush.msra.mxu3 %v3466_v18 }
 0x194   : > { %992 = vmatpush.msra.mxu0 %v3467_v19  ;;  %1012 = vmatpush.msra.mxu1 %v3468_v20 }
 0x195   : > { %1032 = vmatpush.msra.mxu2 %v3469_v22  ;;  %1052 = vmatpush.msra.mxu3 %v3470_v23 }
 0x196   : > { %993 = vmatpush.msra.mxu0 %v3471_v24  ;;  %1013 = vmatpush.msra.mxu1 %v3472_v25 }
 0x197   : > { %1033 = vmatpush.msra.mxu2 %v3473_v26  ;;  %1053 = vmatpush.msra.mxu3 %v3474_v27 }
 0x198   : > { %994 = vmatpush.msra.mxu0 %v3475_v28  ;;  %1014 = vmatpush.msra.mxu1 %v3476_v29 }
 0x199   : > { %1034 = vmatpush.msra.mxu2 %v3477_v30  ;;  %1054 = vmatpush.msra.mxu3 %v3478_v31 }
 0x19a   : > { %995 = vmatpush.msra.mxu0 %v3479_v32  ;;  %1015 = vmatpush.msra.mxu1 %v3480_v33 }
 0x19b   : > { %1035 = vmatpush.msra.mxu2 %v3481_v34  ;;  %1055 = vmatpush.msra.mxu3 %v3482_v35 }
 0x19c   : > { %996 = vmatpush.msra.mxu0 %v3483_v37  ;;  %1016 = vmatpush.msra.mxu1 %v3484_v38 }
 0x19d   : > { %1036 = vmatpush.msra.mxu2 %v3485_v39  ;;  %1056 = vmatpush.msra.mxu3 %v3486_v41 }
 0x19e   : > { %997 = vmatpush.msra.mxu0 %v3487_v42  ;;  %1017 = vmatpush.msra.mxu1 %v3488_v43 }
 0x19f   : > { %1037 = vmatpush.msra.mxu2 %v3489_v44  ;;  %1057 = vmatpush.msra.mxu3 %v3490_v45 }
 0x1fb   : > { %v697_v49 = vpop.f32.mrf.mxu0  ;;  %v717_v50 = vpop.f32.mrf.mxu1 }
 0x1fc   : > { %v764_v52 = vadd.f32 %v697_v49, %v3491_v51  ;;  %v765_v54 = vadd.f32 %v717_v50, %v3492_v53 }
 0x1fe   : > { %v768_v55 = vsub.f32 0.0, %v764_v52  ;;  %v787_v56 = vsub.f32 0.0, %v765_v54 }
 0x200   : > { %v769_v60 = vmul.f32 1.442695, %v768_v55  ;;  %v788_v61 = vmul.f32 1.442695, %v787_v56 }
 0x202   : > { %1944 = vpow2.f32 %v769_v60  ;;  %v757_v63 = vpop.f32.mrf.mxu3  ;;  %v737_v12 = vpop.f32.mrf.mxu2 }
 0x203   : > { %1946 = vpow2.f32 %v788_v61  ;;  %v767_v21 = vadd.f32 %v757_v63, %v3493_v9  ;;  %v766_v57 = vadd.f32 %v737_v12, %v3494_v6  ;;  %v2841_v12 = vld [vmem:[#allocation3 + $0x1f0] sm:$0xff] }
 0x204   : > { %v2853_v6 = vld [vmem:[#allocation3 + $0x1d0] sm:$0xff] }
 0x205   : > { %v807_v47 = vsub.f32 0.0, %v767_v21 }
 0x207   : > { %v808_v0 = vmul.f32 1.442695, %v807_v47 }
 0x208   : > { %v1945_v48 = vpop.eup %1944 }
 0x209   : > { %v1947_v59 = vpop.eup %1946  ;;  %v771_v46 = vadd.f32 1.0, %v1945_v48  ;;  %1948 = vpow2.f32 %v808_v0 }
 0x20a   : > { %v790_v10 = vadd.f32 1.0, %v1947_v59 }
 0x20b   : > { %1950 = vrcp.f32 %v771_v46  ;;  %v783_v13 = vand.u32 2147483648, %v771_v46  ;;  %v781_v16 = vand.u32 2147483647, %v771_v46  ;;  %vm777_vm7 = vweird.f32 %v771_v46 }
 0x20c   : > { %1952 = vrcp.f32 %v790_v10  ;;  %v802_v14 = vand.u32 2147483648, %v790_v10  ;;  %v800_v19 = vand.u32 2147483647, %v790_v10  ;;  %vm796_vm8 = vweird.f32 %v790_v10 }
 0x20d   : > { %v784_v24 = vor.u32 1.1754944e-38, %v783_v13  ;;  %vm782_vm11 = vcmp.eq.f32.partialorder %v781_v16, 8.507059e+37  ;;  %v2874_v13 = vld [vmem:[#allocation3 + $0x188] sm:$0xff]  ;;  %v2883_v16 = vld [vmem:[#allocation3 + $0x160] sm:$0xff] }
 0x20e   : > { %v803_v29 = vor.u32 1.1754944e-38, %v802_v14  ;;  %vm801_vm12 = vcmp.eq.f32.partialorder %v800_v19, 8.507059e+37  ;;  %v2877_v14 = vld [vmem:[#allocation3 + $0x190] sm:$0xff] }
 0x20f   : > { %v1949_v5 = vpop.eup %1948  ;;  %v2889_v19 = vld [vmem:[#allocation3 + $0x170] sm:$0xff] }
 0x210   : > { %v810_v11 = vadd.f32 1.0, %v1949_v5  ;;  %v2844_v5 = vld [vmem:[#allocation3 + $0x1f8] sm:$0xff] }
 0x211   : > { %v1951_v4 = vpop.eup %1950 }
 0x212   : > { %v1953_v58 = vpop.eup %1952  ;;  %v773_v3 = vmul.f32 %v1951_v4, %v771_v46  ;;  %1954 = vrcp.f32 %v810_v11  ;;  %vm778_vm5 = vweird.f32 %v1951_v4  ;;  %v822_v9 = vand.u32 2147483648, %v810_v11 }
 0x213   : > { %v792_v15 = vmul.f32 %v1953_v58, %v790_v10  ;;  %1956 = vtanh.f32 %v766_v57  ;;  %vm797_vm6 = vweird.f32 %v1953_v58  ;;  %vm779_vm9 = vmor %vm777_vm7, %vm778_vm5  ;;  %vm816_vm14 = vweird.f32 %v810_v11  ;;  %v2838_v10 = vld [vmem:[#allocation3 + $0x1e8] sm:$0xff]  ;;  %v2856_v57 = vld [vmem:[#allocation3 + $0x1d8] sm:$0xff] }
 0x214   : > { %v774_v1 = vsub.f32 1.0, %v773_v3  ;;  %vm798_vm10 = vmor %vm796_vm8, %vm797_vm6  ;;  %v820_v21 = vand.u32 2147483647, %v810_v11  ;;  %v823_v0 = vor.u32 1.1754944e-38, %v822_v9  ;;  %v2862_v3 = vld [vmem:[#allocation3 + $0x1a8] sm:$0xff]  ;;  %v2954_v9 = vld [vmem:[#allocation3 + $0xb8] sm:$0xff] }
 0x215   : > { %v793_v8 = vsub.f32 1.0, %v792_v15  ;;  %v2865_v15 = vld [vmem:[#allocation3 + $0x1b0] sm:$0xff]  ;;  %3498 = vst [vmem:[#allocation11_spill] sm:$0xff] %v2954_v9 }
 0x216   : > { %v775_v36 = vmul.f32 %v1951_v4, %v774_v1  ;;  %vm821_vm0 = vcmp.eq.f32.partialorder %v820_v21, 8.507059e+37  ;;  %v2868_v1 = vld [vmem:[#allocation3 + $0x1b8] sm:$0xff]  ;;  %v2957_v21 = vld [vmem:[#allocation3 + $0x80] sm:$0xff] }
 0x217   : > { %v794_v18 = vmul.f32 %v1953_v58, %v793_v8  ;;  %v2871_v8 = vld [vmem:[#allocation3 + $0x180] sm:$0xff]  ;;  %3499 = vst [vmem:[#allocation23_spill] sm:$0xff] %v2957_v21 }
 0x218   : > { %v1955_v20 = vpop.eup %1954  ;;  %v776_v23 = vadd.f32 %v1951_v4, %v775_v36  ;;  %v2880_v36 = vld [vmem:[#allocation3 + $0x198] sm:$0xff] }
 0x219   : > { %v795_v25 = vadd.f32 %v1953_v58, %v794_v18  ;;  %v812_v28 = vmul.f32 %v1955_v20, %v810_v11  ;;  %v1957_v50 = vpop.eup %1956  ;;  %vm817_vm13 = vweird.f32 %v1955_v20  ;;  %v2847_v11 = vld [vmem:[#allocation3 + $0x1c0] sm:$0xff]  ;;  %v2886_v18 = vld [vmem:[#allocation3 + $0x168] sm:$0xff] }
 0x21a   : > { %v780_v49 = vsel %vm779_vm9, %v1951_v4, %v776_v23  ;;  %vm818_vm15 = vmor %vm816_vm14, %vm817_vm13  ;;  %v2850_v4 = vld [vmem:[#allocation3 + $0x1c8] sm:$0xff]  ;;  %v2895_v23 = vld [vmem:[#allocation3 + $0x140] sm:$0xff] }
 0x21b   : > { %v785_v51 = vsel %vm782_vm11, %v784_v24, %v780_v49  ;;  %v799_v52 = vsel %vm798_vm10, %v1953_v58, %v795_v25  ;;  %v813_v53 = vsub.f32 1.0, %v812_v28  ;;  %v2859_v58 = vld [vmem:[#allocation3 + $0x1a0] sm:$0xff]  ;;  %v2898_v24 = vld [vmem:[#allocation3 + $0x148] sm:$0xff]  ;;  %v2901_v25 = vld [vmem:[#allocation3 + $0x150] sm:$0xff] }
 0x21c   : > { %v804_v54 = vsel %vm801_vm12, %v803_v29, %v799_v52  ;;  %v827_v55 = vmul.f32 %v1957_v50, %v785_v51  ;;  %v2904_v28 = vld [vmem:[#allocation3 + $0x158] sm:$0xff]  ;;  %v2907_v29 = vld [vmem:[#allocation3 + $0x120] sm:$0xff]  ;;  %v2910_v49 = vld [vmem:[#allocation3 + $0x128] sm:$0xff] }
 0x21d   : > { %v826_v56 = vmul.f32 %v804_v54, %v2760_v40  ;;  %v814_v60 = vmul.f32 %v1955_v20, %v813_v53  ;;  %v2835_v40 = vld [vmem:[#allocation3 + $0x1e0] sm:$0xff]  ;;  %v2914_v50 = vld [vmem:[#allocation3 + $0x138] sm:$0xff]  ;;  %v2920_v52 = vld [vmem:[#allocation3 + $0x108] sm:$0xff] }
 0x21e   : > { %v2917_v51 = vld [vmem:[#allocation3 + $0x100] sm:$0xff]  ;;  %v2924_v53 = vld [vmem:[#allocation3 + $0x118] sm:$0xff] }
 0x21f   : > { %v2832_v61 = vadd.f32 %v827_v55, %v826_v56  ;;  %v815_v63 = vadd.f32 %v1955_v20, %v814_v60  ;;  %v2927_v54 = vld [vmem:[#allocation3 + $0xe0] sm:$0xff]  ;;  %v2934_v55 = vld [vmem:[#allocation3 + $0xf8] sm:$0xff] }
 0x220   : > { %v2937_v56 = vld [vmem:[#allocation3 + $0xc0] sm:$0xff]  ;;  %v2944_v60 = vld [vmem:[#allocation3 + $0xd8] sm:$0xff] }
 0x221   : > { %1958 = vtanh.f32 %v2832_v61  ;;  %v819_v47 = vsel %vm818_vm15, %v1955_v20, %v815_v63  ;;  %v2892_v20 = vld [vmem:[#allocation3 + $0x178] sm:$0xff]  ;;  %3495 = vst [vmem:[#allocation19_spill] sm:$0xff] %v2944_v60  ;;  %v2947_v63 = vld [vmem:[#allocation3 + $0xa0] sm:$0xff] }
 0x222   : > { %v824_v59 = vsel %vm821_vm0, %v823_v0, %v819_v47  ;;  %3496 = vst [vmem:[#allocation12_spill] sm:$0xff] %v2947_v63  ;;  %v2965_v47 = vld [vmem:[#allocation3 + $0x60] sm:$0xff] }
 0x223   : > { %3501 = vst [vmem:[#allocation13_spill] sm:$0xff] %v2965_v47 }
 0x227   : > { %v1959_v48 = vpop.eup %1958 }
 0x228   : > { %v830_v46 = vmul.f32 %v1959_v48, %v824_v59 }
 0x22a   : > { %847 = vmatmul.f32.vlgmr.msrb.gmra.mxu0 %v830_v46  ;;  %867 = vmatmul.f32.vlgmr.msrb.gmra.mxu1 %v830_v46 }
 0x22b   : > { %887 = vmatmul.f32.vlgmr.msrb.gmra.mxu2 %v830_v46  ;;  %907 = vmatmul.f32.vlgmr.msrb.gmra.mxu3 %v830_v46 }
 0x22c   : > { %1133 = vmatpush.msrb.mxu0 %v2835_v40  ;;  %1153 = vmatpush.msrb.mxu1 %v2838_v10 }
 0x22d   : > { %1173 = vmatpush.msrb.mxu2 %v2841_v12  ;;  %1193 = vmatpush.msrb.mxu3 %v2844_v5 }
 0x22e   : > { %1134 = vmatpush.msrb.mxu0 %v2847_v11  ;;  %1154 = vmatpush.msrb.mxu1 %v2850_v4 }
 0x22f   : > { %1174 = vmatpush.msrb.mxu2 %v2853_v6  ;;  %1194 = vmatpush.msrb.mxu3 %v2856_v57 }
 0x230   : > { %1135 = vmatpush.msrb.mxu0 %v2859_v58  ;;  %1155 = vmatpush.msrb.mxu1 %v2862_v3 }
 0x231   : > { %1175 = vmatpush.msrb.mxu2 %v2865_v15  ;;  %1195 = vmatpush.msrb.mxu3 %v2868_v1 }
 0x232   : > { %1136 = vmatpush.msrb.mxu0 %v2871_v8  ;;  %1156 = vmatpush.msrb.mxu1 %v2874_v13 }
 0x233   : > { %1176 = vmatpush.msrb.mxu2 %v2877_v14  ;;  %1196 = vmatpush.msrb.mxu3 %v2880_v36 }
 0x234   : > { %1137 = vmatpush.msrb.mxu0 %v2883_v16  ;;  %1157 = vmatpush.msrb.mxu1 %v2886_v18 }
 0x235   : > { %1177 = vmatpush.msrb.mxu2 %v2889_v19  ;;  %1197 = vmatpush.msrb.mxu3 %v2892_v20 }
 0x236   : > { %1138 = vmatpush.msrb.mxu0 %v2895_v23  ;;  %1158 = vmatpush.msrb.mxu1 %v2898_v24 }
 0x237   : > { %1178 = vmatpush.msrb.mxu2 %v2901_v25  ;;  %1198 = vmatpush.msrb.mxu3 %v2904_v28 }
 0x238   : > { %1139 = vmatpush.msrb.mxu0 %v2907_v29  ;;  %1159 = vmatpush.msrb.mxu1 %v2910_v49 }
 0x239   : > { %1179 = vmatpush.msrb.mxu2 %v2453_v62  ;;  %1199 = vmatpush.msrb.mxu3 %v2914_v50  ;;  %v2930_v62 = vld [vmem:[#allocation3 + $0xe8] sm:$0xff] }
 0x23a   : > { %1140 = vmatpush.msrb.mxu0 %v2917_v51  ;;  %1160 = vmatpush.msrb.mxu1 %v2920_v52 }
 0x23b   : > { %1180 = vmatpush.msrb.mxu2 %v2466_v2  ;;  %1200 = vmatpush.msrb.mxu3 %v2924_v53  ;;  %v2940_v2 = vld [vmem:[#allocation3 + $0xc8] sm:$0xff] }
 0x23c   : > { %1141 = vmatpush.msrb.mxu0 %v2927_v54  ;;  %1161 = vmatpush.msrb.mxu1 %v2930_v62 }
 0x23d   : > { %1181 = vmatpush.msrb.mxu2 %v2483_v7  ;;  %1201 = vmatpush.msrb.mxu3 %v2934_v55  ;;  %v2950_v7 = vld [vmem:[#allocation3 + $0xa8] sm:$0xff] }
 0x23e   : > { %1142 = vmatpush.msrb.mxu0 %v2937_v56  ;;  %1162 = vmatpush.msrb.mxu1 %v2940_v2  ;;  %3497 = vst [vmem:[#allocation10_spill] sm:$0xff] %v2950_v7 }
 0x23f   : > { %1182 = vmatpush.msrb.mxu2 %v3465_v17  ;;  %1202 = vmatpush.msrb.mxu3 %v2944_v60  ;;  %v2960_v17 = vld [vmem:[#allocation3 + $0x88] sm:$0xff] }
 0x240   : > { %1143 = vmatpush.msrb.mxu0 %v2947_v63  ;;  %1163 = vmatpush.msrb.mxu1 %v2950_v7  ;;  %3500 = vst [vmem:[#allocation15_spill] sm:$0xff] %v2960_v17 }
 0x241   : > { %1183 = vmatpush.msrb.mxu2 %v3469_v22  ;;  %1203 = vmatpush.msrb.mxu3 %v2954_v9  ;;  %v2968_v22 = vld [vmem:[#allocation3 + $0x68] sm:$0xff] }
 0x242   : > { %1144 = vmatpush.msrb.mxu0 %v2957_v21  ;;  %1164 = vmatpush.msrb.mxu1 %v2960_v17  ;;  %3502 = vst [vmem:[#allocation14_spill] sm:$0xff] %v2968_v22 }
 0x243   : > { %1184 = vmatpush.msrb.mxu2 %v3473_v26  ;;  %1204 = vmatpush.msrb.mxu3 %v3474_v27 }
 0x244   : > { %1145 = vmatpush.msrb.mxu0 %v2965_v47  ;;  %1165 = vmatpush.msrb.mxu1 %v2968_v22 }
 0x245   : > { %1185 = vmatpush.msrb.mxu2 %v3477_v30  ;;  %1205 = vmatpush.msrb.mxu3 %v3478_v31  ;;  %v3503_v30 = vld [vmem:[#allocation39_spill] sm:$0xff] }
 0x246   : > { %1146 = vmatpush.msrb.mxu0 %v3479_v32  ;;  %1166 = vmatpush.msrb.mxu1 %v3480_v33  ;;  %v3504_v32 = vld [vmem:[#allocation40_spill] sm:$0xff] }
 0x247   : > { %1186 = vmatpush.msrb.mxu2 %v3481_v34  ;;  %1206 = vmatpush.msrb.mxu3 %v3482_v35 }
 0x248   : > { %1147 = vmatpush.msrb.mxu0 %v3483_v37  ;;  %1167 = vmatpush.msrb.mxu1 %v3484_v38 }
 0x249   : > { %1187 = vmatpush.msrb.mxu2 %v3485_v39  ;;  %1207 = vmatpush.msrb.mxu3 %v3486_v41  ;;  %v3505_v41 = vld [vmem:[#allocation42_spill] sm:$0xff] }
 0x24a   : > { %1148 = vmatpush.msrb.mxu0 %v3487_v42  ;;  %1168 = vmatpush.msrb.mxu1 %v3488_v43 }
 0x24b   : > { %1188 = vmatpush.msrb.mxu2 %v3489_v44  ;;  %1208 = vmatpush.msrb.mxu3 %v3490_v45 }
 0x2a7   : > { %v848_v26 = vpop.f32.mrf.mxu0  ;;  %v868_v27 = vpop.f32.mrf.mxu1 }
 0x2a8   : > { %v915_v31 = vadd.f32 %v848_v26, %v3503_v30  ;;  %v916_v33 = vadd.f32 %v868_v27, %v3504_v32 }
 0x2aa   : > { %v919_v34 = vsub.f32 0.0, %v915_v31  ;;  %v938_v35 = vsub.f32 0.0, %v916_v33  ;;  %v3506_v31 = vld [vmem:[#allocation41_spill] sm:$0xff] }
 0x2ac   : > { %v920_v37 = vmul.f32 1.442695, %v919_v34  ;;  %v939_v38 = vmul.f32 1.442695, %v938_v35 }
 0x2ae   : > { %1960 = vpow2.f32 %v920_v37  ;;  %v908_v39 = vpop.f32.mrf.mxu3  ;;  %v888_v46 = vpop.f32.mrf.mxu2 }
 0x2af   : > { %1962 = vpow2.f32 %v939_v38  ;;  %v918_v42 = vadd.f32 %v908_v39, %v3505_v41  ;;  %v917_v32 = vadd.f32 %v888_v46, %v3506_v31 }
 0x2b1   : > { %v958_v43 = vsub.f32 0.0, %v918_v42 }
 0x2b3   : > { %v959_v0 = vmul.f32 1.442695, %v958_v43 }
 0x2b4   : > { %v1961_v44 = vpop.eup %1960 }
 0x2b5   : > { %v1963_v48 = vpop.eup %1962  ;;  %v922_v45 = vadd.f32 1.0, %v1961_v44  ;;  %1964 = vpow2.f32 %v959_v0 }
 0x2b6   : > { %v941_v59 = vadd.f32 1.0, %v1963_v48 }
 0x2b7   : > { %1966 = vrcp.f32 %v922_v45  ;;  %v934_v39 = vand.u32 2147483648, %v922_v45  ;;  %v932_v43 = vand.u32 2147483647, %v922_v45  ;;  %vm928_vm3 = vweird.f32 %v922_v45 }
 0x2b8   : > { %1968 = vrcp.f32 %v941_v59  ;;  %v953_v41 = vand.u32 2147483648, %v941_v59  ;;  %v951_v44 = vand.u32 2147483647, %v941_v59  ;;  %vm947_vm4 = vweird.f32 %v941_v59 }
 0x2b9   : > { %v935_v46 = vor.u32 1.1754944e-38, %v934_v39  ;;  %vm933_vm7 = vcmp.eq.f32.partialorder %v932_v43, 8.507059e+37 }
 0x2ba   : > { %vm952_vm8 = vcmp.eq.f32.partialorder %v951_v44, 8.507059e+37  ;;  %v3510_v44 = vld [vmem:[#allocation23_spill] sm:$0xff] }
 0x2bb   : > { %v1965_v26 = vpop.eup %1964 }
 0x2bc   : > { %v961_v27 = vadd.f32 1.0, %v1965_v26 }
 0x2bd   : > { %v1967_v30 = vpop.eup %1966 }
 0x2be   : > { %v1969_v33 = vpop.eup %1968  ;;  %v924_v34 = vmul.f32 %v1967_v30, %v922_v45  ;;  %1970 = vrcp.f32 %v961_v27  ;;  %vm929_vm1 = vweird.f32 %v1967_v30  ;;  %v973_v39 = vand.u32 2147483648, %v961_v27 }
 0x2bf   : > { %v943_v35 = vmul.f32 %v1969_v33, %v941_v59  ;;  %1972 = vtanh.f32 %v917_v32  ;;  %vm948_vm2 = vweird.f32 %v1969_v33  ;;  %vm930_vm5 = vmor %vm928_vm3, %vm929_vm1  ;;  %vm967_vm10 = vweird.f32 %v961_v27 }
 0x2c0   : > { %v925_v37 = vsub.f32 1.0, %v924_v34  ;;  %vm949_vm6 = vmor %vm947_vm4, %vm948_vm2  ;;  %v954_v34 = vor.u32 1.1754944e-38, %v953_v41  ;;  %v974_v43 = vor.u32 1.1754944e-38, %v973_v39  ;;  %v3075_v39 = vld [vmem:[#allocation3 + $0x20] sm:$0xff] }
 0x2c1   : > { %v944_v38 = vsub.f32 1.0, %v943_v35  ;;  %3522 = vst [vmem:[#allocation25_spill] sm:$0xff] %v3075_v39 }
 0x2c2   : > { %v926_v42 = vmul.f32 %v1967_v30, %v925_v37 }
 0x2c3   : > { %v945_v0 = vmul.f32 %v1969_v33, %v944_v38 }
 0x2c4   : > { %v1971_v48 = vpop.eup %1970  ;;  %v927_v26 = vadd.f32 %v1967_v30, %v926_v42 }
 0x2c5   : > { %v946_v31 = vadd.f32 %v1969_v33, %v945_v0  ;;  %v963_v22 = vmul.f32 %v1971_v48, %v961_v27  ;;  %v1973_v32 = vpop.eup %1972  ;;  %vm968_vm9 = vweird.f32 %v1971_v48 }
 0x2c6   : > { %v931_v35 = vsel %vm930_vm5, %v1967_v30, %v927_v26  ;;  %v971_v30 = vand.u32 2147483647, %v961_v27  ;;  %vm969_vm11 = vmor %vm967_vm10, %vm968_vm9  ;;  %v3509_v27 = vld [vmem:[#allocation11_spill] sm:$0xff]  ;;  %v3049_v26 = vld [vmem:[#allocation3 + $0x90] sm:$0xff] }
 0x2c7   : > { %v936_v47 = vsel %vm933_vm7, %v935_v46, %v931_v35  ;;  %v950_v37 = vsel %vm949_vm6, %v1969_v33, %v946_v31  ;;  %v964_v17 = vsub.f32 1.0, %v963_v22  ;;  %3512 = vst [vmem:[#allocation16_spill] sm:$0xff] %v3049_v26  ;;  %v3052_v46 = vld [vmem:[#allocation3 + $0x98] sm:$0xff]  ;;  %v3514_v31 = vld [vmem:[#allocation13_spill] sm:$0xff] }
 0x2c8   : > { %v955_v38 = vsel %vm952_vm8, %v954_v34, %v950_v37  ;;  %v978_v21 = vmul.f32 %v1973_v32, %v936_v47  ;;  %vm972_vm12 = vcmp.eq.f32.partialorder %v971_v30, 8.507059e+37  ;;  %v3043_v47 = vld [vmem:[#allocation3 + $0xb0] sm:$0xff]  ;;  %3513 = vst [vmem:[#allocation17_spill] sm:$0xff] %v3052_v46  ;;  %v3515_v34 = vld [vmem:[#allocation14_spill] sm:$0xff]  ;;  %v3063_v37 = vld [vmem:[#allocation3 + $0x40] sm:$0xff] }
 0x2c9   : > { %v977_v9 = vmul.f32 %v955_v38, %v2832_v61  ;;  %v965_v42 = vmul.f32 %v1971_v48, %v964_v17  ;;  %v3019_v61 = vld [vmem:[#allocation3 + $0x130] sm:$0xff]  ;;  %3508 = vst [vmem:[#allocation18_spill] sm:$0xff] %v3043_v47  ;;  %v3060_v32 = vld [vmem:[#allocation3 + $0x78] sm:$0xff]  ;;  %v3066_v38 = vld [vmem:[#allocation3 + $0x48] sm:$0xff] }
 0x2ca   : > { %v3037_v17 = vld [vmem:[#allocation3 + $0xd0] sm:$0xff]  ;;  %3517 = vst [vmem:[#allocation22_spill] sm:$0xff] %v3060_v32  ;;  %v3078_v30 = vld [vmem:[#allocation3 + $0x28] sm:$0xff] }
 0x2cb   : > { %v2990_v45 = vadd.f32 %v978_v21, %v977_v9  ;;  %v966_v59 = vadd.f32 %v1971_v48, %v965_v42  ;;  %v3025_v9 = vld [vmem:[#allocation3 + $0x110] sm:$0xff]  ;;  %3507 = vst [vmem:[#allocation24_spill] sm:$0xff] %v3037_v17 }
 0x2cc   : > { %v3031_v21 = vld [vmem:[#allocation3 + $0xf0] sm:$0xff]  ;;  %3518 = vst [vmem:[#allocation20_spill] sm:$0xff] %v3063_v37 }
 0x2cd   : > { %1974 = vtanh.f32 %v2990_v45  ;;  %v970_v41 = vsel %vm969_vm11, %v1971_v48, %v966_v59  ;;  %v3511_v48 = vld [vmem:[#allocation15_spill] sm:$0xff]  ;;  %v3057_v35 = vld [vmem:[#allocation3 + $0x70] sm:$0xff]  ;;  %3519 = vst [vmem:[#allocation21_spill] sm:$0xff] %v3066_v38  ;;  %v3072_v59 = vld [vmem:[#allocation3 + $0x58] sm:$0xff] }
 0x2ce   : > { %v975_v22 = vsel %vm972_vm12, %v974_v43, %v970_v41  ;;  %3516 = vst [vmem:[#allocation27_spill] sm:$0xff] %v3057_v35  ;;  %v3069_v42 = vld [vmem:[#allocation3 + $0x50] sm:$0xff]  ;;  %v3084_v43 = vld [vmem:[#allocation3 + $0x38] sm:$0xff] }
 0x2cf   : > { %3520 = vst [vmem:[#allocation30_spill] sm:$0xff] %v3069_v42  ;;  %v3081_v41 = vld [vmem:[#allocation3 + $0x30] sm:$0xff] }
 0x2d0   : > { %3521 = vst [vmem:[#allocation28_spill] sm:$0xff] %v3072_v59 }
 0x2d1   : > { %3523 = vst [vmem:[#allocation26_spill] sm:$0xff] %v3078_v30 }
 0x2d2   : > { %3524 = vst [vmem:[#allocation34_spill] sm:$0xff] %v3081_v41 }
 0x2d3   : > { %v1975_v33 = vpop.eup %1974  ;;  %3525 = vst [vmem:[#allocation32_spill] sm:$0xff] %v3084_v43 }
 0x2d4   : > { %v981_v0 = vmul.f32 %v1975_v33, %v975_v22  ;;  %v3087_v33 = vld [vmem:[#allocation3] sm:$0xff]  ;;  %v3090_v22 = vld [vmem:[#allocation3 + $0x8] sm:$0xff] }
 0x2d5   : > { %3526 = vst [vmem:[#allocation29_spill] sm:$0xff] %v3087_v33 }
 0x2d6   : > { %998 = vmatmul.f32.vlgmr.msra.gmra.mxu0 %v981_v0  ;;  %1018 = vmatmul.f32.vlgmr.msra.gmra.mxu1 %v981_v0  ;;  %3527 = vst [vmem:[#allocation31_spill] sm:$0xff] %v3090_v22 }
 0x2d7   : > { %1038 = vmatmul.f32.vlgmr.msra.gmra.mxu2 %v981_v0  ;;  %1058 = vmatmul.f32.vlgmr.msra.gmra.mxu3 %v981_v0  ;;  %v3093_v0 = vld [vmem:[#allocation3 + $0x10] sm:$0xff] }
 0x2d8   : > { %1284 = vmatpush.msra.mxu0 %v2835_v40  ;;  %1304 = vmatpush.msra.mxu1 %v2838_v10  ;;  %3528 = vst [vmem:[#allocation35_spill] sm:$0xff] %v3093_v0 }
 0x2d9   : > { %1324 = vmatpush.msra.mxu2 %v2841_v12  ;;  %1344 = vmatpush.msra.mxu3 %v2844_v5 }
 0x2da   : > { %1285 = vmatpush.msra.mxu0 %v2847_v11  ;;  %1305 = vmatpush.msra.mxu1 %v2850_v4 }
 0x2db   : > { %1325 = vmatpush.msra.mxu2 %v2853_v6  ;;  %1345 = vmatpush.msra.mxu3 %v2856_v57 }
 0x2dc   : > { %1286 = vmatpush.msra.mxu0 %v2859_v58  ;;  %1306 = vmatpush.msra.mxu1 %v2862_v3 }
 0x2dd   : > { %1326 = vmatpush.msra.mxu2 %v2865_v15  ;;  %1346 = vmatpush.msra.mxu3 %v2868_v1 }
 0x2de   : > { %1287 = vmatpush.msra.mxu0 %v2871_v8  ;;  %1307 = vmatpush.msra.mxu1 %v2874_v13 }
 0x2df   : > { %1327 = vmatpush.msra.mxu2 %v2877_v14  ;;  %1347 = vmatpush.msra.mxu3 %v2880_v36 }
 0x2e0   : > { %1288 = vmatpush.msra.mxu0 %v2883_v16  ;;  %1308 = vmatpush.msra.mxu1 %v2886_v18 }
 0x2e1   : > { %1328 = vmatpush.msra.mxu2 %v2889_v19  ;;  %1348 = vmatpush.msra.mxu3 %v2892_v20 }
 0x2e2   : > { %1289 = vmatpush.msra.mxu0 %v2895_v23  ;;  %1309 = vmatpush.msra.mxu1 %v2898_v24 }
 0x2e3   : > { %1329 = vmatpush.msra.mxu2 %v2901_v25  ;;  %1349 = vmatpush.msra.mxu3 %v2904_v28 }
 0x2e4   : > { %1290 = vmatpush.msra.mxu0 %v2907_v29  ;;  %1310 = vmatpush.msra.mxu1 %v2910_v49 }
 0x2e5   : > { %1330 = vmatpush.msra.mxu2 %v3019_v61  ;;  %1350 = vmatpush.msra.mxu3 %v2914_v50 }
 0x2e6   : > { %1291 = vmatpush.msra.mxu0 %v2917_v51  ;;  %1311 = vmatpush.msra.mxu1 %v2920_v52 }
 0x2e7   : > { %1331 = vmatpush.msra.mxu2 %v3025_v9  ;;  %1351 = vmatpush.msra.mxu3 %v2924_v53 }
 0x2e8   : > { %1292 = vmatpush.msra.mxu0 %v2927_v54  ;;  %1312 = vmatpush.msra.mxu1 %v2930_v62 }
 0x2e9   : > { %1332 = vmatpush.msra.mxu2 %v3031_v21  ;;  %1352 = vmatpush.msra.mxu3 %v2934_v55 }
 0x2ea   : > { %1293 = vmatpush.msra.mxu0 %v2937_v56  ;;  %1313 = vmatpush.msra.mxu1 %v2940_v2 }
 0x2eb   : > { %1333 = vmatpush.msra.mxu2 %v3037_v17  ;;  %1353 = vmatpush.msra.mxu3 %v2944_v60 }
 0x2ec   : > { %1294 = vmatpush.msra.mxu0 %v2947_v63  ;;  %1314 = vmatpush.msra.mxu1 %v2950_v7 }
 0x2ed   : > { %1334 = vmatpush.msra.mxu2 %v3043_v47  ;;  %1354 = vmatpush.msra.mxu3 %v3509_v27 }
 0x2ee   : > { %1295 = vmatpush.msra.mxu0 %v3510_v44  ;;  %1315 = vmatpush.msra.mxu1 %v3511_v48 }
 0x2ef   : > { %1335 = vmatpush.msra.mxu2 %v3049_v26  ;;  %1355 = vmatpush.msra.mxu3 %v3052_v46 }
 0x2f0   : > { %1296 = vmatpush.msra.mxu0 %v3514_v31  ;;  %1316 = vmatpush.msra.mxu1 %v3515_v34  ;;  %v3532_v34 = vld [vmem:[#allocation45_spill] sm:$0xff] }
 0x2f1   : > { %1336 = vmatpush.msra.mxu2 %v3057_v35  ;;  %1356 = vmatpush.msra.mxu3 %v3060_v32 }
 0x2f2   : > { %1297 = vmatpush.msra.mxu0 %v3063_v37  ;;  %1317 = vmatpush.msra.mxu1 %v3066_v38 }
 0x2f3   : > { %1337 = vmatpush.msra.mxu2 %v3069_v42  ;;  %1357 = vmatpush.msra.mxu3 %v3072_v59  ;;  %v3530_v59 = vld [vmem:[#allocation43_spill] sm:$0xff]  ;;  %v3531_v42 = vld [vmem:[#allocation44_spill] sm:$0xff] }
 0x2f4   : > { %1298 = vmatpush.msra.mxu0 %v3075_v39  ;;  %1318 = vmatpush.msra.mxu1 %v3078_v30  ;;  %v3096_v30 = vld [vmem:[#allocation3 + $0x18] sm:$0xff] }
 0x2f5   : > { %1338 = vmatpush.msra.mxu2 %v3081_v41  ;;  %1358 = vmatpush.msra.mxu3 %v3084_v43  ;;  %3529 = vst [vmem:[#allocation33_spill] sm:$0xff] %v3096_v30 }
 0x2f6   : > { %1299 = vmatpush.msra.mxu0 %v3087_v33  ;;  %1319 = vmatpush.msra.mxu1 %v3090_v22 }
 0x2f7   : > { %1339 = vmatpush.msra.mxu2 %v3093_v0  ;;  %1359 = vmatpush.msra.mxu3 %v3096_v30 }
 0x353   : > { %v999_v41 = vpop.f32.mrf.mxu0  ;;  %v1019_v39 = vpop.f32.mrf.mxu1 }
 0x354   : > { %v1066_v43 = vadd.f32 %v999_v41, %v3530_v59  ;;  %v1067_v38 = vadd.f32 %v1019_v39, %v3531_v42 }
 0x356   : > { %v1070_v37 = vsub.f32 0.0, %v1066_v43  ;;  %v1089_v33 = vsub.f32 0.0, %v1067_v38 }
 0x358   : > { %v1071_v32 = vmul.f32 1.442695, %v1070_v37  ;;  %v1090_v35 = vmul.f32 1.442695, %v1089_v33  ;;  %v3533_v37 = vld [vmem:[#allocation48_spill] sm:$0xff] }
 0x35a   : > { %1976 = vpow2.f32 %v1071_v32  ;;  %v1059_v22 = vpop.f32.mrf.mxu3  ;;  %v1039_v59 = vpop.f32.mrf.mxu2 }
 0x35b   : > { %1978 = vpow2.f32 %v1090_v35  ;;  %v1069_v31 = vadd.f32 %v1059_v22, %v3532_v34  ;;  %v1068_v41 = vadd.f32 %v1039_v59, %v3533_v37 }
 0x35d   : > { %v1109_v0 = vsub.f32 0.0, %v1069_v31 }
 0x35f   : > { %v1110_v46 = vmul.f32 1.442695, %v1109_v0 }
 0x360   : > { %v1977_v26 = vpop.eup %1976 }
 0x361   : > { %v1979_v48 = vpop.eup %1978  ;;  %v1073_v30 = vadd.f32 1.0, %v1977_v26  ;;  %1980 = vpow2.f32 %v1110_v46 }
 0x362   : > { %v1092_v44 = vadd.f32 1.0, %v1979_v48 }
 0x363   : > { %1982 = vrcp.f32 %v1073_v30  ;;  %v1085_v33 = vand.u32 2147483648, %v1073_v30  ;;  %v1083_v48 = vand.u32 2147483647, %v1073_v30  ;;  %vm1079_vm15 = vweird.f32 %v1073_v30 }
 0x364   : > { %1984 = vrcp.f32 %v1092_v44  ;;  %v1104_v22 = vand.u32 2147483648, %v1092_v44  ;;  %v1102_v0 = vand.u32 2147483647, %v1092_v44  ;;  %vm1098_vm0 = vweird.f32 %v1092_v44 }
 0x365   : > { %v1086_v59 = vor.u32 1.1754944e-38, %v1085_v33  ;;  %vm1084_vm3 = vcmp.eq.f32.partialorder %v1083_v48, 8.507059e+37 }
 0x366   : > { %vm1103_vm4 = vcmp.eq.f32.partialorder %v1102_v0, 8.507059e+37  ;;  %v3541_v0 = vld [vmem:[#allocation15_spill] sm:$0xff] }
 0x367   : > { %v1981_v42 = vpop.eup %1980 }
 0x368   : > { %v1112_v39 = vadd.f32 1.0, %v1981_v42 }
 0x369   : > { %v1983_v38 = vpop.eup %1982 }
 0x36a   : > { %v1985_v32 = vpop.eup %1984  ;;  %v1075_v43 = vmul.f32 %v1983_v38, %v1073_v30  ;;  %1986 = vrcp.f32 %v1112_v39  ;;  %vm1080_vm13 = vweird.f32 %v1983_v38  ;;  %v1124_v33 = vand.u32 2147483648, %v1112_v39 }
 0x36b   : > { %v1094_v35 = vmul.f32 %v1985_v32, %v1092_v44  ;;  %1988 = vtanh.f32 %v1068_v41  ;;  %vm1099_vm14 = vweird.f32 %v1985_v32  ;;  %vm1081_vm1 = vmor %vm1079_vm15, %vm1080_vm13  ;;  %vm1118_vm6 = vweird.f32 %v1112_v39 }
 0x36c   : > { %v1076_v34 = vsub.f32 1.0, %v1075_v43  ;;  %vm1100_vm2 = vmor %vm1098_vm0, %vm1099_vm14  ;;  %v1105_v43 = vor.u32 1.1754944e-38, %v1104_v22  ;;  %v1125_v48 = vor.u32 1.1754944e-38, %v1124_v33  ;;  %v3552_v33 = vld [vmem:[#allocation25_spill] sm:$0xff] }
 0x36d   : > { %v1095_v31 = vsub.f32 1.0, %v1094_v35 }
 0x36e   : > { %v1077_v26 = vmul.f32 %v1983_v38, %v1076_v34 }
 0x36f   : > { %v1096_v46 = vmul.f32 %v1985_v32, %v1095_v31 }
 0x370   : > { %v1987_v27 = vpop.eup %1986  ;;  %v1078_v42 = vadd.f32 %v1983_v38, %v1077_v26 }
 0x371   : > { %v1097_v37 = vadd.f32 %v1985_v32, %v1096_v46  ;;  %v1114_v47 = vmul.f32 %v1987_v27, %v1112_v39  ;;  %v1989_v41 = vpop.eup %1988  ;;  %vm1119_vm5 = vweird.f32 %v1987_v27 }
 0x372   : > { %v1082_v35 = vsel %vm1081_vm1, %v1983_v38, %v1078_v42  ;;  %v1122_v38 = vand.u32 2147483647, %v1112_v39  ;;  %vm1120_vm7 = vmor %vm1118_vm6, %vm1119_vm5  ;;  %v3540_v39 = vld [vmem:[#allocation23_spill] sm:$0xff]  ;;  %v3542_v42 = vld [vmem:[#allocation16_spill] sm:$0xff] }
 0x373   : > { %v1087_v7 = vsel %vm1084_vm3, %v1086_v59, %v1082_v35  ;;  %v1101_v34 = vsel %vm1100_vm2, %v1985_v32, %v1097_v37  ;;  %v1115_v63 = vsub.f32 1.0, %v1114_v47  ;;  %v3543_v59 = vld [vmem:[#allocation17_spill] sm:$0xff]  ;;  %v3546_v35 = vld [vmem:[#allocation27_spill] sm:$0xff] }
 0x374   : > { %v1106_v31 = vsel %vm1103_vm4, %v1105_v43, %v1101_v34  ;;  %v1129_v60 = vmul.f32 %v1989_v41, %v1087_v7  ;;  %vm1123_vm8 = vcmp.eq.f32.partialorder %v1122_v38, 8.507059e+37  ;;  %v3536_v7 = vld [vmem:[#allocation12_spill] sm:$0xff]  ;;  %v3544_v37 = vld [vmem:[#allocation13_spill] sm:$0xff]  ;;  %v3545_v43 = vld [vmem:[#allocation14_spill] sm:$0xff] }
 0x375   : > { %v1128_v17 = vmul.f32 %v1106_v31, %v2990_v45  ;;  %v1116_v26 = vmul.f32 %v1987_v27, %v1115_v63  ;;  %v3535_v63 = vld [vmem:[#allocation19_spill] sm:$0xff]  ;;  %v3537_v45 = vld [vmem:[#allocation10_spill] sm:$0xff]  ;;  %v3548_v34 = vld [vmem:[#allocation20_spill] sm:$0xff] }
 0x376   : > { %v3547_v41 = vld [vmem:[#allocation22_spill] sm:$0xff]  ;;  %v3549_v31 = vld [vmem:[#allocation21_spill] sm:$0xff] }
 0x377   : > { %v3104_v30 = vadd.f32 %v1129_v60, %v1128_v17  ;;  %v1117_v44 = vadd.f32 %v1987_v27, %v1116_v26  ;;  %v3534_v60 = vld [vmem:[#allocation24_spill] sm:$0xff]  ;;  %v3538_v17 = vld [vmem:[#allocation18_spill] sm:$0xff] }
 0x378   : > { %v3550_v26 = vld [vmem:[#allocation30_spill] sm:$0xff] }
 0x379   : > { %1990 = vtanh.f32 %v3104_v30  ;;  %v1121_v22 = vsel %vm1120_vm7, %v1987_v27, %v1117_v44  ;;  %v3539_v27 = vld [vmem:[#allocation11_spill] sm:$0xff]  ;;  %v3551_v44 = vld [vmem:[#allocation28_spill] sm:$0xff]  ;;  %v3553_v38 = vld [vmem:[#allocation26_spill] sm:$0xff] }
 0x37a   : > { %v1126_v47 = vsel %vm1123_vm8, %v1125_v48, %v1121_v22  ;;  %v3554_v22 = vld [vmem:[#allocation34_spill] sm:$0xff]  ;;  %v3555_v48 = vld [vmem:[#allocation32_spill] sm:$0xff] }
 0x37f   : > { %v1991_v32 = vpop.eup %1990 }
 0x380   : > { %v1132_v46 = vmul.f32 %v1991_v32, %v1126_v47  ;;  %v3556_v32 = vld [vmem:[#allocation29_spill] sm:$0xff]  ;;  %v3557_v47 = vld [vmem:[#allocation31_spill] sm:$0xff] }
 0x382   : > { %1149 = vmatmul.f32.vlgmr.msrb.gmra.mxu0 %v1132_v46  ;;  %1169 = vmatmul.f32.vlgmr.msrb.gmra.mxu1 %v1132_v46 }
 0x383   : > { %1189 = vmatmul.f32.vlgmr.msrb.gmra.mxu2 %v1132_v46  ;;  %1209 = vmatmul.f32.vlgmr.msrb.gmra.mxu3 %v1132_v46  ;;  %v3558_v46 = vld [vmem:[#allocation35_spill] sm:$0xff] }
 0x384   : > { %1435 = vmatpush.msrb.mxu0 %v2835_v40  ;;  %1455 = vmatpush.msrb.mxu1 %v2838_v10 }
 0x385   : > { %1475 = vmatpush.msrb.mxu2 %v2841_v12  ;;  %1495 = vmatpush.msrb.mxu3 %v2844_v5 }
 0x386   : > { %1436 = vmatpush.msrb.mxu0 %v2847_v11  ;;  %1456 = vmatpush.msrb.mxu1 %v2850_v4 }
 0x387   : > { %1476 = vmatpush.msrb.mxu2 %v2853_v6  ;;  %1496 = vmatpush.msrb.mxu3 %v2856_v57 }
 0x388   : > { %1437 = vmatpush.msrb.mxu0 %v2859_v58  ;;  %1457 = vmatpush.msrb.mxu1 %v2862_v3 }
 0x389   : > { %1477 = vmatpush.msrb.mxu2 %v2865_v15  ;;  %1497 = vmatpush.msrb.mxu3 %v2868_v1 }
 0x38a   : > { %1438 = vmatpush.msrb.mxu0 %v2871_v8  ;;  %1458 = vmatpush.msrb.mxu1 %v2874_v13 }
 0x38b   : > { %1478 = vmatpush.msrb.mxu2 %v2877_v14  ;;  %1498 = vmatpush.msrb.mxu3 %v2880_v36 }
 0x38c   : > { %1439 = vmatpush.msrb.mxu0 %v2883_v16  ;;  %1459 = vmatpush.msrb.mxu1 %v2886_v18 }
 0x38d   : > { %1479 = vmatpush.msrb.mxu2 %v2889_v19  ;;  %1499 = vmatpush.msrb.mxu3 %v2892_v20 }
 0x38e   : > { %1440 = vmatpush.msrb.mxu0 %v2895_v23  ;;  %1460 = vmatpush.msrb.mxu1 %v2898_v24 }
 0x38f   : > { %1480 = vmatpush.msrb.mxu2 %v2901_v25  ;;  %1500 = vmatpush.msrb.mxu3 %v2904_v28 }
 0x390   : > { %1441 = vmatpush.msrb.mxu0 %v2907_v29  ;;  %1461 = vmatpush.msrb.mxu1 %v2910_v49 }
 0x391   : > { %1481 = vmatpush.msrb.mxu2 %v3019_v61  ;;  %1501 = vmatpush.msrb.mxu3 %v2914_v50 }
 0x392   : > { %1442 = vmatpush.msrb.mxu0 %v2917_v51  ;;  %1462 = vmatpush.msrb.mxu1 %v2920_v52 }
 0x393   : > { %1482 = vmatpush.msrb.mxu2 %v3025_v9  ;;  %1502 = vmatpush.msrb.mxu3 %v2924_v53 }
 0x394   : > { %1443 = vmatpush.msrb.mxu0 %v2927_v54  ;;  %1463 = vmatpush.msrb.mxu1 %v2930_v62 }
 0x395   : > { %1483 = vmatpush.msrb.mxu2 %v3031_v21  ;;  %1503 = vmatpush.msrb.mxu3 %v2934_v55 }
 0x396   : > { %1444 = vmatpush.msrb.mxu0 %v2937_v56  ;;  %1464 = vmatpush.msrb.mxu1 %v2940_v2 }
 0x397   : > { %1484 = vmatpush.msrb.mxu2 %v3534_v60  ;;  %1504 = vmatpush.msrb.mxu3 %v3535_v63 }
 0x398   : > { %1445 = vmatpush.msrb.mxu0 %v3536_v7  ;;  %1465 = vmatpush.msrb.mxu1 %v3537_v45 }
 0x399   : > { %1485 = vmatpush.msrb.mxu2 %v3538_v17  ;;  %1505 = vmatpush.msrb.mxu3 %v3539_v27 }
 0x39a   : > { %1446 = vmatpush.msrb.mxu0 %v3540_v39  ;;  %1466 = vmatpush.msrb.mxu1 %v3541_v0 }
 0x39b   : > { %1486 = vmatpush.msrb.mxu2 %v3542_v42  ;;  %1506 = vmatpush.msrb.mxu3 %v3543_v59 }
 0x39c   : > { %1447 = vmatpush.msrb.mxu0 %v3544_v37  ;;  %1467 = vmatpush.msrb.mxu1 %v3545_v43 }
 0x39d   : > { %1487 = vmatpush.msrb.mxu2 %v3546_v35  ;;  %1507 = vmatpush.msrb.mxu3 %v3547_v41  ;;  %v3560_v41 = vld [vmem:[#allocation46_spill] sm:$0xff]  ;;  %v3561_v35 = vld [vmem:[#allocation47_spill] sm:$0xff] }
 0x39e   : > { %1448 = vmatpush.msrb.mxu0 %v3548_v34  ;;  %1468 = vmatpush.msrb.mxu1 %v3549_v31  ;;  %v3559_v34 = vld [vmem:[#allocation33_spill] sm:$0xff] }
 0x39f   : > { %1488 = vmatpush.msrb.mxu2 %v3550_v26  ;;  %1508 = vmatpush.msrb.mxu3 %v3551_v44 }
 0x3a0   : > { %1449 = vmatpush.msrb.mxu0 %v3552_v33  ;;  %1469 = vmatpush.msrb.mxu1 %v3553_v38 }
 0x3a1   : > { %1489 = vmatpush.msrb.mxu2 %v3554_v22  ;;  %1509 = vmatpush.msrb.mxu3 %v3555_v48 }
 0x3a2   : > { %1450 = vmatpush.msrb.mxu0 %v3556_v32  ;;  %1470 = vmatpush.msrb.mxu1 %v3557_v47  ;;  %v3562_v32 = vld [vmem:[#allocation49_spill] sm:$0xff] }
 0x3a3   : > { %1490 = vmatpush.msrb.mxu2 %v3558_v46  ;;  %1510 = vmatpush.msrb.mxu3 %v3559_v34 }
 0x3ff   : > { %v1150_v31 = vpop.f32.mrf.mxu0  ;;  %v1170_v26 = vpop.f32.mrf.mxu1 }
 0x400   : > { %v1217_v44 = vadd.f32 %v1150_v31, %v3560_v41  ;;  %v1218_v33 = vadd.f32 %v1170_v26, %v3561_v35 }
 0x402   : > { %v1221_v43 = vsub.f32 0.0, %v1217_v44  ;;  %v1240_v38 = vsub.f32 0.0, %v1218_v33 }
 0x404   : > { %v1222_v37 = vmul.f32 1.442695, %v1221_v43  ;;  %v1241_v22 = vmul.f32 1.442695, %v1240_v38  ;;  %v3563_v43 = vld [vmem:[#allocation52_spill] sm:$0xff] }
 0x406   : > { %1992 = vpow2.f32 %v1222_v37  ;;  %v1210_v48 = vpop.f32.mrf.mxu3  ;;  %v1190_v41 = vpop.f32.mrf.mxu2 }
 0x407   : > { %1994 = vpow2.f32 %v1241_v22  ;;  %v1220_v59 = vadd.f32 %v1210_v48, %v3562_v32  ;;  %v1219_v44 = vadd.f32 %v1190_v41, %v3563_v43 }
 0x409   : > { %v1260_v47 = vsub.f32 0.0, %v1220_v59 }
 0x40b   : > { %v1261_v42 = vmul.f32 1.442695, %v1260_v47 }
 0x40c   : > { %v1993_v46 = vpop.eup %1992 }
 0x40d   : > { %v1995_v0 = vpop.eup %1994  ;;  %v1224_v34 = vadd.f32 1.0, %v1993_v46  ;;  %1996 = vpow2.f32 %v1261_v42 }
 0x40e   : > { %v1243_v39 = vadd.f32 1.0, %v1995_v0 }
 0x40f   : > { %1998 = vrcp.f32 %v1224_v34  ;;  %v1236_v48 = vand.u32 2147483648, %v1224_v34  ;;  %v1234_v0 = vand.u32 2147483647, %v1224_v34  ;;  %vm1230_vm11 = vweird.f32 %v1224_v34 }
 0x410   : > { %2000 = vrcp.f32 %v1243_v39  ;;  %v1255_v32 = vand.u32 2147483648, %v1243_v39  ;;  %v1253_v46 = vand.u32 2147483647, %v1243_v39  ;;  %vm1249_vm12 = vweird.f32 %v1243_v39 }
 0x411   : > { %v1237_v41 = vor.u32 1.1754944e-38, %v1236_v48  ;;  %vm1235_vm15 = vcmp.eq.f32.partialorder %v1234_v0, 8.507059e+37 }
 0x412   : > { %vm1254_vm0 = vcmp.eq.f32.partialorder %v1253_v46, 8.507059e+37 }
 0x413   : > { %v1997_v35 = vpop.eup %1996 }
 0x414   : > { %v1263_v31 = vadd.f32 1.0, %v1997_v35 }
 0x415   : > { %v1999_v26 = vpop.eup %1998 }
 0x416   : > { %v2001_v37 = vpop.eup %2000  ;;  %v1226_v33 = vmul.f32 %v1999_v26, %v1224_v34  ;;  %2002 = vrcp.f32 %v1263_v31  ;;  %vm1231_vm9 = vweird.f32 %v1999_v26  ;;  %v1275_v48 = vand.u32 2147483648, %v1263_v31 }
 0x417   : > { %v1245_v38 = vmul.f32 %v2001_v37, %v1243_v39  ;;  %2004 = vtanh.f32 %v1219_v44  ;;  %vm1250_vm10 = vweird.f32 %v2001_v37  ;;  %vm1232_vm13 = vmor %vm1230_vm11, %vm1231_vm9  ;;  %vm1269_vm2 = vweird.f32 %v1263_v31 }
 0x418   : > { %v1227_v22 = vsub.f32 1.0, %v1226_v33  ;;  %vm1251_vm14 = vmor %vm1249_vm12, %vm1250_vm10  ;;  %v1256_v33 = vor.u32 1.1754944e-38, %v1255_v32  ;;  %v1276_v0 = vor.u32 1.1754944e-38, %v1275_v48 }
 0x419   : > { %v1246_v59 = vsub.f32 1.0, %v1245_v38 }
 0x41a   : > { %v1228_v47 = vmul.f32 %v1999_v26, %v1227_v22 }
 0x41b   : > { %v1247_v42 = vmul.f32 %v2001_v37, %v1246_v59 }
 0x41c   : > { %v2003_v27 = vpop.eup %2002  ;;  %v1229_v35 = vadd.f32 %v1999_v26, %v1228_v47 }
 0x41d   : > { %v1248_v43 = vadd.f32 %v2001_v37, %v1247_v42  ;;  %v1265_v17 = vmul.f32 %v2003_v27, %v1263_v31  ;;  %v2005_v44 = vpop.eup %2004  ;;  %vm1270_vm1 = vweird.f32 %v2003_v27 }
 0x41e   : > { %v1233_v38 = vsel %vm1232_vm13, %v1999_v26, %v1229_v35  ;;  %v1273_v26 = vand.u32 2147483647, %v1263_v31  ;;  %vm1271_vm3 = vmor %vm1269_vm2, %vm1270_vm1 }
 0x41f   : > { %v1238_v45 = vsel %vm1235_vm15, %v1237_v41, %v1233_v38  ;;  %v1252_v22 = vsel %vm1251_vm14, %v2001_v37, %v1248_v43  ;;  %v1266_v7 = vsub.f32 1.0, %v1265_v17 }
 0x420   : > { %v1257_v59 = vsel %vm1254_vm0, %v1256_v33, %v1252_v22  ;;  %v1280_v63 = vmul.f32 %v2005_v44, %v1238_v45  ;;  %vm1274_vm4 = vcmp.eq.f32.partialorder %v1273_v26, 8.507059e+37  ;;  %v3593_v33 = vld [vmem:[#allocation56_spill] sm:$0xff] }
 0x421   : > { %v1279_v60 = vmul.f32 %v1257_v59, %v3104_v30  ;;  %v1267_v47 = vmul.f32 %v2003_v27, %v1266_v7 }
 0x423   : > { %v3176_v34 = vadd.f32 %v1280_v63, %v1279_v60  ;;  %v1268_v39 = vadd.f32 %v2003_v27, %v1267_v47 }
 0x425   : > { %2006 = vtanh.f32 %v3176_v34  ;;  %v1272_v32 = vsel %vm1271_vm3, %v2003_v27, %v1268_v39 }
 0x426   : > { %v1277_v17 = vsel %vm1274_vm4, %v1276_v0, %v1272_v32 }
 0x42b   : > { %v2007_v37 = vpop.eup %2006 }
 0x42c   : > { %v1283_v42 = vmul.f32 %v2007_v37, %v1277_v17 }
 0x42e   : > { %1300 = vmatmul.f32.vlgmr.msra.gmra.mxu0 %v1283_v42  ;;  %1320 = vmatmul.f32.vlgmr.msra.gmra.mxu1 %v1283_v42 }
 0x42f   : > { %1340 = vmatmul.f32.vlgmr.msra.gmra.mxu2 %v1283_v42  ;;  %1360 = vmatmul.f32.vlgmr.msra.gmra.mxu3 %v1283_v42 }
 0x430   : > { %1586 = vmatpush.msra.mxu0 %v2835_v40  ;;  %1606 = vmatpush.msra.mxu1 %v2838_v10  ;;  %v3564_v40 = vld [vmem:[#allocation24_spill] sm:$0xff]  ;;  %v3565_v10 = vld [vmem:[#allocation19_spill] sm:$0xff] }
 0x431   : > { %1626 = vmatpush.msra.mxu2 %v2841_v12  ;;  %1646 = vmatpush.msra.mxu3 %v2844_v5  ;;  %v3566_v12 = vld [vmem:[#allocation12_spill] sm:$0xff]  ;;  %v3567_v5 = vld [vmem:[#allocation10_spill] sm:$0xff] }
 0x432   : > { %1587 = vmatpush.msra.mxu0 %v2847_v11  ;;  %1607 = vmatpush.msra.mxu1 %v2850_v4  ;;  %v3568_v11 = vld [vmem:[#allocation18_spill] sm:$0xff]  ;;  %v3569_v4 = vld [vmem:[#allocation11_spill] sm:$0xff] }
 0x433   : > { %1627 = vmatpush.msra.mxu2 %v2853_v6  ;;  %1647 = vmatpush.msra.mxu3 %v2856_v57  ;;  %v3570_v6 = vld [vmem:[#allocation23_spill] sm:$0xff] }
 0x434   : > { %1588 = vmatpush.msra.mxu0 %v2859_v58  ;;  %1608 = vmatpush.msra.mxu1 %v2862_v3  ;;  %v3571_v57 = vld [vmem:[#allocation15_spill] sm:$0xff]  ;;  %v3572_v58 = vld [vmem:[#allocation16_spill] sm:$0xff]  ;;  %v3573_v3 = vld [vmem:[#allocation17_spill] sm:$0xff] }
 0x435   : > { %1628 = vmatpush.msra.mxu2 %v2865_v15  ;;  %1648 = vmatpush.msra.mxu3 %v2868_v1  ;;  %v3574_v15 = vld [vmem:[#allocation13_spill] sm:$0xff]  ;;  %v3575_v1 = vld [vmem:[#allocation14_spill] sm:$0xff] }
 0x436   : > { %1589 = vmatpush.msra.mxu0 %v2871_v8  ;;  %1609 = vmatpush.msra.mxu1 %v2874_v13  ;;  %v3576_v8 = vld [vmem:[#allocation27_spill] sm:$0xff]  ;;  %v3577_v13 = vld [vmem:[#allocation22_spill] sm:$0xff] }
 0x437   : > { %1629 = vmatpush.msra.mxu2 %v2877_v14  ;;  %1649 = vmatpush.msra.mxu3 %v2880_v36  ;;  %v3578_v14 = vld [vmem:[#allocation20_spill] sm:$0xff]  ;;  %v3579_v36 = vld [vmem:[#allocation21_spill] sm:$0xff] }
 0x438   : > { %1590 = vmatpush.msra.mxu0 %v2883_v16  ;;  %1610 = vmatpush.msra.mxu1 %v2886_v18  ;;  %v3580_v16 = vld [vmem:[#allocation30_spill] sm:$0xff]  ;;  %v3581_v18 = vld [vmem:[#allocation28_spill] sm:$0xff] }
 0x439   : > { %1630 = vmatpush.msra.mxu2 %v2889_v19  ;;  %1650 = vmatpush.msra.mxu3 %v2892_v20  ;;  %v3582_v19 = vld [vmem:[#allocation25_spill] sm:$0xff]  ;;  %v3583_v20 = vld [vmem:[#allocation26_spill] sm:$0xff] }
 0x43a   : > { %1591 = vmatpush.msra.mxu0 %v2895_v23  ;;  %1611 = vmatpush.msra.mxu1 %v2898_v24  ;;  %v3584_v23 = vld [vmem:[#allocation34_spill] sm:$0xff]  ;;  %v3585_v24 = vld [vmem:[#allocation32_spill] sm:$0xff] }
 0x43b   : > { %1631 = vmatpush.msra.mxu2 %v2901_v25  ;;  %1651 = vmatpush.msra.mxu3 %v2904_v28  ;;  %v3586_v25 = vld [vmem:[#allocation29_spill] sm:$0xff]  ;;  %v3587_v28 = vld [vmem:[#allocation31_spill] sm:$0xff] }
 0x43c   : > { %1592 = vmatpush.msra.mxu0 %v2907_v29  ;;  %1612 = vmatpush.msra.mxu1 %v2910_v49  ;;  %v3588_v29 = vld [vmem:[#allocation35_spill] sm:$0xff]  ;;  %v3589_v49 = vld [vmem:[#allocation33_spill] sm:$0xff] }
 0x43d   : > { %1632 = vmatpush.msra.mxu2 %v3019_v61  ;;  %1652 = vmatpush.msra.mxu3 %v2914_v50 }
 0x43e   : > { %1593 = vmatpush.msra.mxu0 %v2917_v51  ;;  %1613 = vmatpush.msra.mxu1 %v2920_v52  ;;  %v3590_v52 = vld [vmem:[#allocation50_spill] sm:$0xff] }
 0x43f   : > { %1633 = vmatpush.msra.mxu2 %v3025_v9  ;;  %1653 = vmatpush.msra.mxu3 %v2924_v53 }
 0x440   : > { %1594 = vmatpush.msra.mxu0 %v2927_v54  ;;  %1614 = vmatpush.msra.mxu1 %v2930_v62  ;;  %v3591_v54 = vld [vmem:[#allocation51_spill] sm:$0xff] }
 0x441   : > { %1634 = vmatpush.msra.mxu2 %v3031_v21  ;;  %1654 = vmatpush.msra.mxu3 %v2934_v55  ;;  %v3592_v21 = vld [vmem:[#allocation53_spill] sm:$0xff] }
 0x442   : > { %1595 = vmatpush.msra.mxu0 %v2937_v56  ;;  %1615 = vmatpush.msra.mxu1 %v2940_v2 }
 0x443   : > { %1635 = vmatpush.msra.mxu2 %v3564_v40  ;;  %1655 = vmatpush.msra.mxu3 %v3565_v10 }
 0x444   : > { %1596 = vmatpush.msra.mxu0 %v3566_v12  ;;  %1616 = vmatpush.msra.mxu1 %v3567_v5 }
 0x445   : > { %1636 = vmatpush.msra.mxu2 %v3568_v11  ;;  %1656 = vmatpush.msra.mxu3 %v3569_v4 }
 0x446   : > { %1597 = vmatpush.msra.mxu0 %v3570_v6  ;;  %1617 = vmatpush.msra.mxu1 %v3571_v57 }
 0x447   : > { %1637 = vmatpush.msra.mxu2 %v3572_v58  ;;  %1657 = vmatpush.msra.mxu3 %v3573_v3 }
 0x448   : > { %1598 = vmatpush.msra.mxu0 %v3574_v15  ;;  %1618 = vmatpush.msra.mxu1 %v3575_v1 }
 0x449   : > { %1638 = vmatpush.msra.mxu2 %v3576_v8  ;;  %1658 = vmatpush.msra.mxu3 %v3577_v13 }
 0x44a   : > { %1599 = vmatpush.msra.mxu0 %v3578_v14  ;;  %1619 = vmatpush.msra.mxu1 %v3579_v36 }
 0x44b   : > { %1639 = vmatpush.msra.mxu2 %v3580_v16  ;;  %1659 = vmatpush.msra.mxu3 %v3581_v18 }
 0x44c   : > { %1600 = vmatpush.msra.mxu0 %v3582_v19  ;;  %1620 = vmatpush.msra.mxu1 %v3583_v20 }
 0x44d   : > { %1640 = vmatpush.msra.mxu2 %v3584_v23  ;;  %1660 = vmatpush.msra.mxu3 %v3585_v24 }
 0x44e   : > { %1601 = vmatpush.msra.mxu0 %v3586_v25  ;;  %1621 = vmatpush.msra.mxu1 %v3587_v28 }
 0x44f   : > { %1641 = vmatpush.msra.mxu2 %v3588_v29  ;;  %1661 = vmatpush.msra.mxu3 %v3589_v49  ;;  %v3594_v29 = vld [vmem:[#allocation54_spill] sm:$0xff] }
 0x4ab   : > { %v1301_v50 = vpop.f32.mrf.mxu0  ;;  %v1321_v51 = vpop.f32.mrf.mxu1 }
 0x4ac   : > { %v1368_v53 = vadd.f32 %v1301_v50, %v3590_v52  ;;  %v1369_v62 = vadd.f32 %v1321_v51, %v3591_v54  ;;  %v3595_v50 = vld [vmem:[#allocation55_spill] sm:$0xff] }
 0x4ae   : > { %v1372_v55 = vsub.f32 0.0, %v1368_v53  ;;  %v1391_v56 = vsub.f32 0.0, %v1369_v62 }
 0x4b0   : > { %v1373_v2 = vmul.f32 1.442695, %v1372_v55  ;;  %v1392_v61 = vmul.f32 1.442695, %v1391_v56  ;;  %v3596_v56 = vld [vmem:[#allocation57_spill] sm:$0xff] }
 0x4b2   : > { %2008 = vpow2.f32 %v1373_v2  ;;  %v1361_v9 = vpop.f32.mrf.mxu3  ;;  %v1341_v46 = vpop.f32.mrf.mxu2 }
 0x4b3   : > { %2010 = vpow2.f32 %v1392_v61  ;;  %v1371_v30 = vadd.f32 %v1361_v9, %v3592_v21  ;;  %v1370_v38 = vadd.f32 %v1341_v46, %v3593_v33  ;;  %v3597_v46 = vld [vmem:[#allocation60_spill] sm:$0xff] }
 0x4b5   : > { %v1411_v60 = vsub.f32 0.0, %v1371_v30 }
 0x4b7   : > { %v1412_v63 = vmul.f32 1.442695, %v1411_v60 }
 0x4b8   : > { %v2009_v7 = vpop.eup %2008 }
 0x4b9   : > { %v2011_v45 = vpop.eup %2010  ;;  %v1375_v27 = vadd.f32 1.0, %v2009_v7  ;;  %2012 = vpow2.f32 %v1412_v63 }
 0x4ba   : > { %v1394_v31 = vadd.f32 1.0, %v2011_v45 }
 0x4bb   : > { %2014 = vrcp.f32 %v1375_v27  ;;  %v1387_v48 = vand.u32 2147483648, %v1375_v27  ;;  %v1385_v0 = vand.u32 2147483647, %v1375_v27  ;;  %vm1381_vm7 = vweird.f32 %v1375_v27 }
 0x4bc   : > { %2016 = vrcp.f32 %v1394_v31  ;;  %v1406_v26 = vand.u32 2147483648, %v1394_v31  ;;  %v1404_v17 = vand.u32 2147483647, %v1394_v31  ;;  %vm1400_vm8 = vweird.f32 %v1394_v31 }
 0x4bd   : > { %v1388_v10 = vor.u32 1.1754944e-38, %v1387_v48  ;;  %vm1386_vm11 = vcmp.eq.f32.partialorder %v1385_v0, 8.507059e+37 }
 0x4be   : > { %v1407_v11 = vor.u32 1.1754944e-38, %v1406_v26  ;;  %vm1405_vm12 = vcmp.eq.f32.partialorder %v1404_v17, 8.507059e+37 }
 0x4bf   : > { %v2013_v35 = vpop.eup %2012 }
 0x4c0   : > { %v1414_v41 = vadd.f32 1.0, %v2013_v35 }
 0x4c1   : > { %v2015_v43 = vpop.eup %2014 }
 0x4c2   : > { %v2017_v44 = vpop.eup %2016  ;;  %v1377_v22 = vmul.f32 %v2015_v43, %v1375_v27  ;;  %2018 = vrcp.f32 %v1414_v41  ;;  %vm1382_vm5 = vweird.f32 %v2015_v43  ;;  %v1426_v16 = vand.u32 2147483648, %v1414_v41 }
 0x4c3   : > { %v1396_v59 = vmul.f32 %v2017_v44, %v1394_v31  ;;  %2020 = vtanh.f32 %v1370_v38  ;;  %vm1401_vm6 = vweird.f32 %v2017_v44  ;;  %vm1383_vm9 = vmor %vm1381_vm7, %vm1382_vm5  ;;  %vm1420_vm14 = vweird.f32 %v1414_v41 }
 0x4c4   : > { %v1378_v47 = vsub.f32 1.0, %v1377_v22  ;;  %vm1402_vm10 = vmor %vm1400_vm8, %vm1401_vm6  ;;  %v1424_v18 = vand.u32 2147483647, %v1414_v41  ;;  %v1427_v20 = vor.u32 1.1754944e-38, %v1426_v16 }
 0x4c5   : > { %v1397_v39 = vsub.f32 1.0, %v1396_v59 }
 0x4c6   : > { %v1379_v32 = vmul.f32 %v2015_v43, %v1378_v47  ;;  %vm1425_vm0 = vcmp.eq.f32.partialorder %v1424_v18, 8.507059e+37 }
 0x4c7   : > { %v1398_v37 = vmul.f32 %v2017_v44, %v1397_v39 }
 0x4c8   : > { %v2019_v42 = vpop.eup %2018  ;;  %v1380_v40 = vadd.f32 %v2015_v43, %v1379_v32 }
 0x4c9   : > { %v1399_v12 = vadd.f32 %v2017_v44, %v1398_v37  ;;  %v1416_v5 = vmul.f32 %v2019_v42, %v1414_v41  ;;  %v2021_v6 = vpop.eup %2020  ;;  %vm1421_vm13 = vweird.f32 %v2019_v42 }
 0x4ca   : > { %v1384_v4 = vsel %vm1383_vm9, %v2015_v43, %v1380_v40  ;;  %vm1422_vm15 = vmor %vm1420_vm14, %vm1421_vm13 }
 0x4cb   : > { %v1389_v57 = vsel %vm1386_vm11, %v1388_v10, %v1384_v4  ;;  %v1403_v58 = vsel %vm1402_vm10, %v2017_v44, %v1399_v12  ;;  %v1417_v3 = vsub.f32 1.0, %v1416_v5 }
 0x4cc   : > { %v1408_v15 = vsel %vm1405_vm12, %v1407_v11, %v1403_v58  ;;  %v1431_v1 = vmul.f32 %v2021_v6, %v1389_v57 }
 0x4cd   : > { %v1430_v8 = vmul.f32 %v1408_v15, %v3176_v34  ;;  %v1418_v13 = vmul.f32 %v2019_v42, %v1417_v3 }
 0x4cf   : > { %v3248_v14 = vadd.f32 %v1431_v1, %v1430_v8  ;;  %v1419_v36 = vadd.f32 %v2019_v42, %v1418_v13 }
 0x4d1   : > { %2022 = vtanh.f32 %v3248_v14  ;;  %v1423_v19 = vsel %vm1422_vm15, %v2019_v42, %v1419_v36 }
 0x4d2   : > { %v1428_v24 = vsel %vm1425_vm0, %v1427_v20, %v1423_v19 }
 0x4d7   : > { %v2023_v23 = vpop.eup %2022 }
 0x4d8   : > { %v1434_v25 = vmul.f32 %v2023_v23, %v1428_v24  ;;  %v3598_v24 = vld [vmem:[#allocation58_spill] sm:$0xff] }
 0x4da   : > { %1451 = vmatmul.f32.vlgmr.msrb.gmra.mxu0 %v1434_v25  ;;  %1471 = vmatmul.f32.vlgmr.msrb.gmra.mxu1 %v1434_v25 }
 0x4db   : > { %1491 = vmatmul.f32.vlgmr.msrb.gmra.mxu2 %v1434_v25  ;;  %1511 = vmatmul.f32.vlgmr.msrb.gmra.mxu3 %v1434_v25 }
 0x557   : > { %v1452_v34 = vpop.f32.mrf.mxu0  ;;  %v1472_v28 = vpop.f32.mrf.mxu1 }
 0x558   : > { %v1519_v49 = vadd.f32 %v1452_v34, %v3594_v29  ;;  %v1520_v51 = vadd.f32 %v1472_v28, %v3595_v50  ;;  %v3599_v34 = vld [vmem:[#allocation59_spill] sm:$0xff] }
 0x55a   : > { %v1523_v52 = vsub.f32 0.0, %v1519_v49  ;;  %v1542_v53 = vsub.f32 0.0, %v1520_v51 }
 0x55c   : > { %v1524_v54 = vmul.f32 1.442695, %v1523_v52  ;;  %v1543_v62 = vmul.f32 1.442695, %v1542_v53  ;;  %v3600_v53 = vld [vmem:[#allocation61_spill] sm:$0xff] }
 0x55e   : > { %2024 = vpow2.f32 %v1524_v54  ;;  %v1512_v55 = vpop.f32.mrf.mxu3  ;;  %v1492_v7 = vpop.f32.mrf.mxu2 }
 0x55f   : > { %2026 = vpow2.f32 %v1543_v62  ;;  %v1522_v2 = vadd.f32 %v1512_v55, %v3596_v56  ;;  %v1521_v35 = vadd.f32 %v1492_v7, %v3597_v46  ;;  %v3601_v7 = vld [vmem:[#allocation62_spill] sm:$0xff] }
 0x561   : > { %v1562_v61 = vsub.f32 0.0, %v1522_v2 }
 0x563   : > { %v1563_v9 = vmul.f32 1.442695, %v1562_v61 }
 0x564   : > { %v2025_v21 = vpop.eup %2024 }
 0x565   : > { %v2027_v30 = vpop.eup %2026  ;;  %v1526_v60 = vadd.f32 1.0, %v2025_v21  ;;  %2028 = vpow2.f32 %v1563_v9 }
 0x566   : > { %v1545_v63 = vadd.f32 1.0, %v2027_v30 }
 0x567   : > { %2030 = vrcp.f32 %v1526_v60  ;;  %v1538_v22 = vand.u32 2147483648, %v1526_v60  ;;  %v1536_v39 = vand.u32 2147483647, %v1526_v60  ;;  %vm1532_vm3 = vweird.f32 %v1526_v60 }
 0x568   : > { %2032 = vrcp.f32 %v1545_v63  ;;  %v1557_v59 = vand.u32 2147483648, %v1545_v63  ;;  %v1555_v26 = vand.u32 2147483647, %v1545_v63  ;;  %vm1551_vm4 = vweird.f32 %v1545_v63 }
 0x569   : > { %v1539_v37 = vor.u32 1.1754944e-38, %v1538_v22  ;;  %vm1537_vm7 = vcmp.eq.f32.partialorder %v1536_v39, 8.507059e+37 }
 0x56a   : > { %v1558_v40 = vor.u32 1.1754944e-38, %v1557_v59  ;;  %vm1556_vm8 = vcmp.eq.f32.partialorder %v1555_v26, 8.507059e+37 }
 0x56b   : > { %v2029_v45 = vpop.eup %2028 }
 0x56c   : > { %v1565_v27 = vadd.f32 1.0, %v2029_v45 }
 0x56d   : > { %v2031_v31 = vpop.eup %2030 }
 0x56e   : > { %v2033_v41 = vpop.eup %2032  ;;  %v1528_v43 = vmul.f32 %v2031_v31, %v1526_v60  ;;  %2034 = vrcp.f32 %v1565_v27  ;;  %vm1533_vm1 = vweird.f32 %v2031_v31  ;;  %v1577_v8 = vand.u32 2147483648, %v1565_v27 }
 0x56f   : > { %v1547_v33 = vmul.f32 %v2033_v41, %v1545_v63  ;;  %2036 = vtanh.f32 %v1521_v35  ;;  %vm1552_vm2 = vweird.f32 %v2033_v41  ;;  %vm1534_vm5 = vmor %vm1532_vm3, %vm1533_vm1  ;;  %vm1571_vm10 = vweird.f32 %v1565_v27 }
 0x570   : > { %v1529_v38 = vsub.f32 1.0, %v1528_v43  ;;  %vm1553_vm6 = vmor %vm1551_vm4, %vm1552_vm2  ;;  %v1575_v13 = vand.u32 2147483647, %v1565_v27  ;;  %v1578_v16 = vor.u32 1.1754944e-38, %v1577_v8 }
 0x571   : > { %v1548_v44 = vsub.f32 1.0, %v1547_v33 }
 0x572   : > { %v1530_v47 = vmul.f32 %v2031_v31, %v1529_v38  ;;  %vm1576_vm12 = vcmp.eq.f32.partialorder %v1575_v13, 8.507059e+37 }
 0x573   : > { %v1549_v48 = vmul.f32 %v2033_v41, %v1548_v44 }
 0x574   : > { %v2035_v32 = vpop.eup %2034  ;;  %v1531_v0 = vadd.f32 %v2031_v31, %v1530_v47 }
 0x575   : > { %v1550_v17 = vadd.f32 %v2033_v41, %v1549_v48  ;;  %v1567_v42 = vmul.f32 %v2035_v32, %v1565_v27  ;;  %v2037_v12 = vpop.eup %2036  ;;  %vm1572_vm9 = vweird.f32 %v2035_v32 }
 0x576   : > { %v1535_v10 = vsel %vm1534_vm5, %v2031_v31, %v1531_v0  ;;  %vm1573_vm11 = vmor %vm1571_vm10, %vm1572_vm9 }
 0x577   : > { %v1540_v5 = vsel %vm1537_vm7, %v1539_v37, %v1535_v10  ;;  %v1554_v11 = vsel %vm1553_vm6, %v2033_v41, %v1550_v17  ;;  %v1568_v4 = vsub.f32 1.0, %v1567_v42 }
 0x578   : > { %v1559_v6 = vsel %vm1556_vm8, %v1558_v40, %v1554_v11  ;;  %v1582_v57 = vmul.f32 %v2037_v12, %v1540_v5 }
 0x579   : > { %v1581_v58 = vmul.f32 %v1559_v6, %v3248_v14  ;;  %v1569_v3 = vmul.f32 %v2035_v32, %v1568_v4 }
 0x57b   : > { %v3256_v15 = vadd.f32 %v1582_v57, %v1581_v58  ;;  %v1570_v1 = vadd.f32 %v2035_v32, %v1569_v3 }
 0x57d   : > { %2038 = vtanh.f32 %v3256_v15  ;;  %v1574_v36 = vsel %vm1573_vm11, %v2035_v32, %v1570_v1 }
 0x57e   : > { %v1579_v19 = vsel %vm1576_vm12, %v1578_v16, %v1574_v36 }
 0x583   : > { %v2039_v18 = vpop.eup %2038 }
 0x584   : > { %v1585_v20 = vmul.f32 %v2039_v18, %v1579_v19 }
 0x586   : > { %1602 = vmatmul.f32.vlgmr.msra.gmra.mxu0 %v1585_v20  ;;  %1622 = vmatmul.f32.vlgmr.msra.gmra.mxu1 %v1585_v20 }
 0x587   : > { %1642 = vmatmul.f32.vlgmr.msra.gmra.mxu2 %v1585_v20  ;;  %1662 = vmatmul.f32.vlgmr.msra.gmra.mxu3 %v1585_v20 }
 0x603   : > { %v1603_v14 = vpop.f32.mrf.mxu0  ;;  %v1623_v23 = vpop.f32.mrf.mxu1 }
 0x604   : > { %v1670_v25 = vadd.f32 %v1603_v14, %v3598_v24  ;;  %v1671_v28 = vadd.f32 %v1623_v23, %v3599_v34 }
 0x606   : > { %v1674_v29 = vsub.f32 0.0, %v1670_v25  ;;  %v1693_v49 = vsub.f32 0.0, %v1671_v28 }
 0x608   : > { %v1675_v50 = vmul.f32 1.442695, %v1674_v29  ;;  %v1694_v51 = vmul.f32 1.442695, %v1693_v49 }
 0x60a   : > { %2040 = vpow2.f32 %v1675_v50  ;;  %v1663_v52 = vpop.f32.mrf.mxu3  ;;  %v1643_v21 = vpop.f32.mrf.mxu2 }
 0x60b   : > { %2042 = vpow2.f32 %v1694_v51  ;;  %v1673_v54 = vadd.f32 %v1663_v52, %v3600_v53  ;;  %v1672_v45 = vadd.f32 %v1643_v21, %v3601_v7 }
 0x60d   : > { %v1713_v62 = vsub.f32 0.0, %v1673_v54 }
 0x60f   : > { %v1714_v55 = vmul.f32 1.442695, %v1713_v62 }
 0x610   : > { %v2041_v56 = vpop.eup %2040 }
 0x611   : > { %v2043_v2 = vpop.eup %2042  ;;  %v1677_v61 = vadd.f32 1.0, %v2041_v56  ;;  %2044 = vpow2.f32 %v1714_v55 }
 0x612   : > { %v1696_v9 = vadd.f32 1.0, %v2043_v2 }
 0x613   : > { %2046 = vrcp.f32 %v1677_v61  ;;  %v1689_v43 = vand.u32 2147483648, %v1677_v61  ;;  %v1687_v44 = vand.u32 2147483647, %v1677_v61  ;;  %vm1683_vm15 = vweird.f32 %v1677_v61 }
 0x614   : > { %2048 = vrcp.f32 %v1696_v9  ;;  %v1708_v33 = vand.u32 2147483648, %v1696_v9  ;;  %v1706_v59 = vand.u32 2147483647, %v1696_v9  ;;  %vm1702_vm0 = vweird.f32 %v1696_v9 }
 0x615   : > { %v1690_v48 = vor.u32 1.1754944e-38, %v1689_v43  ;;  %vm1688_vm3 = vcmp.eq.f32.partialorder %v1687_v44, 8.507059e+37 }
 0x616   : > { %v1709_v0 = vor.u32 1.1754944e-38, %v1708_v33  ;;  %vm1707_vm4 = vcmp.eq.f32.partialorder %v1706_v59, 8.507059e+37 }
 0x617   : > { %v2045_v30 = vpop.eup %2044 }
 0x618   : > { %v1716_v60 = vadd.f32 1.0, %v2045_v30 }
 0x619   : > { %v2047_v63 = vpop.eup %2046 }
 0x61a   : > { %v2049_v27 = vpop.eup %2048  ;;  %v1679_v31 = vmul.f32 %v2047_v63, %v1677_v61  ;;  %2050 = vrcp.f32 %v1716_v60  ;;  %vm1684_vm13 = vweird.f32 %v2047_v63  ;;  %v1728_v58 = vand.u32 2147483648, %v1716_v60 }
 0x61b   : > { %v1698_v46 = vmul.f32 %v2049_v27, %v1696_v9  ;;  %2052 = vtanh.f32 %v1672_v45  ;;  %vm1703_vm14 = vweird.f32 %v2049_v27  ;;  %vm1685_vm1 = vmor %vm1683_vm15, %vm1684_vm13  ;;  %vm1722_vm6 = vweird.f32 %v1716_v60 }
 0x61c   : > { %v1680_v35 = vsub.f32 1.0, %v1679_v31  ;;  %vm1704_vm2 = vmor %vm1702_vm0, %vm1703_vm14  ;;  %v1726_v3 = vand.u32 2147483647, %v1716_v60  ;;  %v1729_v8 = vor.u32 1.1754944e-38, %v1728_v58 }
 0x61d   : > { %v1699_v41 = vsub.f32 1.0, %v1698_v46 }
 0x61e   : > { %v1681_v38 = vmul.f32 %v2047_v63, %v1680_v35  ;;  %vm1727_vm8 = vcmp.eq.f32.partialorder %v1726_v3, 8.507059e+37 }
 0x61f   : > { %v1700_v22 = vmul.f32 %v2049_v27, %v1699_v41 }
 0x620   : > { %v2051_v47 = vpop.eup %2050  ;;  %v1682_v39 = vadd.f32 %v2047_v63, %v1681_v38 }
 0x621   : > { %v1701_v26 = vadd.f32 %v2049_v27, %v1700_v22  ;;  %v1718_v32 = vmul.f32 %v2051_v47, %v1716_v60  ;;  %v2053_v17 = vpop.eup %2052  ;;  %vm1723_vm5 = vweird.f32 %v2051_v47 }
 0x622   : > { %v1686_v37 = vsel %vm1685_vm1, %v2047_v63, %v1682_v39  ;;  %vm1724_vm7 = vmor %vm1722_vm6, %vm1723_vm5 }
 0x623   : > { %v1691_v42 = vsel %vm1688_vm3, %v1690_v48, %v1686_v37  ;;  %v1705_v40 = vsel %vm1704_vm2, %v2049_v27, %v1701_v26  ;;  %v1719_v10 = vsub.f32 1.0, %v1718_v32 }
 0x624   : > { %v1710_v12 = vsel %vm1707_vm4, %v1709_v0, %v1705_v40  ;;  %v1733_v5 = vmul.f32 %v2053_v17, %v1691_v42 }
 0x625   : > { %v1732_v11 = vmul.f32 %v1710_v12, %v3256_v15  ;;  %v1720_v4 = vmul.f32 %v2051_v47, %v1719_v10 }
 0x627   : > { %v1734_v6 = vadd.f32 %v1733_v5, %v1732_v11  ;;  %v1721_v57 = vadd.f32 %v2051_v47, %v1720_v4 }
 0x629   : > { %2054 = vtanh.f32 %v1734_v6  ;;  %v1725_v1 = vsel %vm1724_vm7, %v2051_v47, %v1721_v57 }
 0x62a   : > { %v1730_v13 = vsel %vm1727_vm8, %v1729_v8, %v1725_v1 }
 0x62f   : > { %v2055_v15 = vpop.eup %2054 }
 0x630   : > { %v1736_v36 = vmul.f32 %v2055_v15, %v1730_v13 }
 0x632   : > { %1737 = vst [vmem:[%s180_s19] sm:$0xff] %v1736_v36 }
 0x633   : > { %2177 = shalt.err (!%p2174_p8)
}
 0x634   : > { %1875 = dma.vmem_to_hbm [thread:$0]  (%p2281_p5), %s1752_s20, 128, %s1754_s24, %s1739_s16  }
 0x635 PF: > { %p1887_p9 = scmp.ge.s32.totalorder %s2216_s15, 2  ;;  %s1765_s5 = sand.u32 1, %s2204_s12  }
 0x636   : > { %s1766_s6 = scalar_lea.sflag [#allocation5], %s1765_s5 }
 0x637   : > { %p1882_p10 = pnand %p1887_p9, %p2285_p6 }
 0x639   : > { %p1883_p11 = pneg %p1882_p10 }
 0x63b   : > { %2199 = dma.done.wait (%p1883_p11), %s1766_s6, 128  }
 0x63c   : > { %2201 = vsyncadd (%p1883_p11), %s1766_s6, 4294967168  ;;  %p14_p12 = scmp.ge.s32.totalorder %s2268_s18, 4   ;;  %s3602_s12 = smov %s2208_s13 }
 0x63d   : > { %s3603_s13 = smov %s2212_s14  ;;  %s3604_s14 = smov %s2279_s21 }
 0x63e   : > { %s3605_s15 = smov %s2268_s18  ;;  %16 = sbr.rel (!%p14_p12) target bundleno = 4 (0x4), region = 72 }
 0x643   :  { %1772 = vsyncpa [#allocation4], 1 }
 0x644   :  { %1774 = vsyncpa [#allocation4 + $0x1], 1 }
 0x645   :  { %1775 = vsyncpa [#allocation5], 1 }
 0x646   :  { %1777 = vsyncpa [#allocation5 + $0x1], 1 }

</bundles_post_ra>
